<compile_context>
chip_gen: v6e
topology: v6e:2x2x1
jax: 0.10.0
libtpu: 0.0.40
codegen_flags: <defaults>
</compile_context>

<pallas_src>
import math

import jax
import jax.numpy as jnp
from jax.experimental import pallas as pl
from jax.experimental.pallas import tpu as pltpu


# ----------------------------- config (small) -----------------------------
N          = 2          # batch
IMG_SIZE   = 64
IN_CHANS   = 3
PATCH_SIZE = 16
C_ENC      = 256        # stand-in encoder width (only used at param prep; folded away)
DEC_DIM    = 256        # decoder stand-in width (256-dense for v6e/v7x MXU)
MASK_RATIO = 0.6

H_P = IMG_SIZE // PATCH_SIZE              # patches per side
L   = H_P * H_P                           # num patches
P   = PATCH_SIZE * PATCH_SIZE * IN_CHANS  # patch dim (p*p*3)
T   = N * L                               # total tokens

TM  = min(T, 256)                         # token tile (rows per grid step)
assert T % TM == 0


# ----------------------------- JAX glue utils -----------------------------
def patchify(imgs, p):
    """imgs: (N, 3, H, W) -> (N, L, p*p*3)  (matches torch einsum 'nchpwq->nhwpqc')"""
    n, c, hh, ww = imgs.shape
    h = w = hh // p
    x = imgs.reshape(n, c, h, p, w, p)
    x = jnp.einsum("nchpwq->nhwpqc", x)
    return x.reshape(n, h * w, p * p * c)


def unpatchify(x, p):
    """x: (N, L, p*p*3) -> (N, 3, H, W)"""
    n, l, _ = x.shape
    h = w = int(round(l ** 0.5))
    x = x.reshape(n, h, w, p, p, 3)
    x = jnp.einsum("nhwpqc->nchpwq", x)
    return x.reshape(n, 3, h * p, h * p)


def gen_random_mask(key, n, img_size, patch_size, mask_ratio):
    """Same semantics as SSMAE.gen_random_mask (0 = keep, 1 = remove)."""
    l = (img_size // patch_size) ** 2
    len_keep = int(l * (1 - mask_ratio))
    noise = jax.random.normal(key, (n, l), dtype=jnp.float32)
    ids_shuffle = jnp.argsort(noise, axis=1)
    ids_restore = jnp.argsort(ids_shuffle, axis=1)
    mask = jnp.ones((n, l), dtype=jnp.float32)
    mask = mask.at[:, :len_keep].set(0.0)
    mask = jnp.take_along_axis(mask, ids_restore, axis=1)
    return mask


# ----------------------------- fused Pallas kernel -----------------------------
def ssmae_fused_kernel(tok_ref, mask_ref,
                       w_fold_ref, b_fold_ref, mask_tok_ref,
                       gamma_ref, beta_ref,
                       w1_ref, b1_ref, w2_ref, b2_ref,
                       w_pred_ref, b_pred_ref,
                       pred_ref, partial_ref):
    """Folded (encoder-standin @ proj) + mask-token mix + decoder block + pred
    + per-token masked-MSE partials.

    Weights are bf16 (MXU operands), element-wise math is f32.  No cross-step
    state -> the token grid axis is fully parallel (v7x megacore friendly).
    """
    tok = tok_ref[...]                      # (TM, P) f32 -- also the loss target
    m = mask_ref[...]                       # (TM, 1) f32, 0 = keep, 1 = remove
    keep = 1.0 - m

    # --- encoder stand-in (masked linear patch embedding) folded with proj ---
    # TODO(synk): SparseConvNeXtV2 encoder is not defined in the provided
    # source; replaced with a masked linear patch-embedding stand-in (so the
    # two linear maps enc @ proj are legally folded into w_fold).
    h = jnp.dot((tok * keep).astype(jnp.bfloat16), w_fold_ref[...],
                preferred_element_type=jnp.float32) + b_fold_ref[...]   # (TM, DEC_DIM)

    # --- mask-token mixing: x*(1-mask) + mask_token*mask ---
    h = h * keep + mask_tok_ref[...] * m

    # --- decoder Block (pointwise parts: LN + pwconv1 + GELU + pwconv2 + residual) ---
    # TODO(synk): ConvNeXtV2 Block's 7x7 depthwise conv and GRN are not in the
    # provided source and are omitted here.
    mu = jnp.mean(h, axis=-1, keepdims=True)          # two-pass LN stats (safe)
    d = h - mu
    var = jnp.mean(d * d, axis=-1, keepdims=True)
    hn = d * jax.lax.rsqrt(var + 1e-6)
    hn = hn * gamma_ref[...] + beta_ref[...]
    z = jnp.dot(hn.astype(jnp.bfloat16), w1_ref[...],
                preferred_element_type=jnp.float32) + b1_ref[...]
    # TODO(synk): PyTorch nn.GELU() is the exact erf form; tanh approximation used.
    z = jax.nn.gelu(z, approximate=True)
    z = jnp.dot(z.astype(jnp.bfloat16), w2_ref[...],
                preferred_element_type=jnp.float32) + b2_ref[...]
    h = h + z

    # --- pred: 1x1 conv -> patch pixels ---
    pred = jnp.dot(h.astype(jnp.bfloat16), w_pred_ref[...],
                   preferred_element_type=jnp.float32) + b_pred_ref[...]
    pred_ref[...] = pred

    # --- fused masked-MSE per-token partials (pred/tok/m still live in vregs) ---
    diff = pred - tok
    partial_ref[...] = jnp.mean(diff * diff, axis=-1, keepdims=True) * m


# ----------------------------- pallas_call wrapper -----------------------------
@jax.jit
def ssmae_forward(imgs, labels, params, mask):
    """Returns (loss, pred, mask) matching SSMAE.forward semantics."""
    # ---- glue: patchify image, flatten tokens/mask ----
    target = patchify(imgs, PATCH_SIZE)                 # (N, L, P)
    tok = target.reshape(T, P)                          # (T, P) f32
    m_flat = mask.reshape(T, 1)                         # (T, 1) f32

    in_arrays = [
        tok, m_flat,
        params["w_fold"], params["b_fold"], params["mask_token"],
        params["gamma"], params["beta"],
        params["w1"], params["b1"], params["w2"], params["b2"],
        params["w_pred"], params["b_pred"],
    ]

    def _tile_spec(cols):
        return pl.BlockSpec((TM, cols), lambda i: (i, 0))

    def _resident_spec(shape):
        # constant index_map -> block never changes -> stays VMEM-resident
        return pl.BlockSpec(shape, lambda i, _s=len(shape): (0,) * _s)

    in_specs = [_tile_spec(P), _tile_spec(1)] + \
               [_resident_spec(a.shape) for a in in_arrays[2:]]

    out_shapes = (jax.ShapeDtypeStruct((T, P), jnp.float32),   # pred (token-major)
                  jax.ShapeDtypeStruct((T, 1), jnp.float32))   # per-token masked MSE

    # advisory cost estimate so XLA schedules around the custom call
    macs_per_tok = (P * DEC_DIM + DEC_DIM * 4 * DEC_DIM
                    + 4 * DEC_DIM * DEC_DIM + DEC_DIM * P)
    bytes_accessed = sum(math.prod(a.shape) * jnp.dtype(a.dtype).itemsize
                         for a in list(in_arrays) + list(out_shapes))
    cost = pl.CostEstimate(flops=2 * T * macs_per_tok,
                           transcendentals=T * 4 * DEC_DIM,
                           bytes_accessed=bytes_accessed)

    pred_tok, loss_partial = pl.pallas_call(
        ssmae_fused_kernel,
        out_shape=out_shapes,
        grid=(T // TM,),
        in_specs=in_specs,
        out_specs=(pl.BlockSpec((TM, P), lambda i: (i, 0)),
                   pl.BlockSpec((TM, 1), lambda i: (i, 0))),
        compiler_params=pltpu.CompilerParams(
            # no cross-step state -> token axis can shard across v7x's 2 TCs
            dimension_semantics=("parallel",),
            vmem_limit_bytes=16 * 1024 * 1024),
        cost_estimate=cost,
    )(*in_arrays)

    # (loss*mask).sum() / mask.sum() -- tiny reduction, done in JAX
    rec_loss = jnp.sum(loss_partial) / jnp.sum(mask)

    # TODO(synk): SLMNet SOD network and pytorch_iou.IOU are not defined in the
    # provided source; forward_salloss (and its im_paste composition) is omitted,
    # so the saliency loss contribution is 0.
    del labels
    loss = rec_loss

    # pred in PyTorch conv-output shape: (N, p*p*3, h, w)
    pred = jnp.transpose(pred_tok.reshape(N, L, P), (0, 2, 1)).reshape(N, P, H_P, H_P)
    return loss, pred, mask


# ----------------------------- param init / prep -----------------------------
def init_params(key):
    """Raw (f32) parameters, mirroring the module's separate enc/proj/decoder/pred."""
    ks = jax.random.split(key, 8)
    s = 0.02
    return {
        "w_enc":  s * jax.random.normal(ks[0], (P, C_ENC), jnp.float32),
        "b_enc":  jnp.zeros((1, C_ENC), jnp.float32),
        "w_proj": s * jax.random.normal(ks[1], (C_ENC, DEC_DIM), jnp.float32),
        "b_proj": jnp.zeros((1, DEC_DIM), jnp.float32),
        "mask_token": jnp.zeros((1, DEC_DIM), jnp.float32),   # nn.Parameter(zeros)
        "gamma":  jnp.ones((1, DEC_DIM), jnp.float32),
        "beta":   jnp.zeros((1, DEC_DIM), jnp.float32),
        "w1":     s * jax.random.normal(ks[2], (DEC_DIM, 4 * DEC_DIM), jnp.float32),
        "b1":     jnp.zeros((1, 4 * DEC_DIM), jnp.float32),
        "w2":     s * jax.random.normal(ks[3], (4 * DEC_DIM, DEC_DIM), jnp.float32),
        "b2":     jnp.zeros((1, DEC_DIM), jnp.float32),
        "w_pred": s * jax.random.normal(ks[4], (DEC_DIM, P), jnp.float32),
        "b_pred": jnp.zeros((1, P), jnp.float32),
    }


def prepare_params(raw):
    """One-time (outside jit) weight prep: fold enc@proj, cast MXU operands to bf16."""
    w_fold = raw["w_enc"] @ raw["w_proj"]                          # (P, DEC_DIM)
    b_fold = raw["b_enc"] @ raw["w_proj"] + raw["b_proj"]          # (1, DEC_DIM)
    return {
        "w_fold": w_fold.astype(jnp.bfloat16),
        "b_fold": b_fold.astype(jnp.float32),
        "mask_token": raw["mask_token"],
        "gamma": raw["gamma"],
        "beta": raw["beta"],
        "w1": raw["w1"].astype(jnp.bfloat16),
        "b1": raw["b1"],
        "w2": raw["w2"].astype(jnp.bfloat16),
        "b2": raw["b2"],
        "w_pred": raw["w_pred"].astype(jnp.bfloat16),
        "b_pred": raw["b_pred"],
    }


# ----------------------------- main -----------------------------
if __name__ == "__main__":
    root = jax.random.PRNGKey(0)
    k_img, k_lbl, k_mask, k_param = jax.random.split(root, 4)

    imgs = jax.random.normal(k_img, (N, IN_CHANS, IMG_SIZE, IMG_SIZE), jnp.float32)
    labels = (jax.random.uniform(k_lbl, (N, 1, IMG_SIZE, IMG_SIZE)) > 0.5).astype(jnp.float32)
    params = jax.block_until_ready(prepare_params(init_params(k_param)))  # cast/fold once
    mask = gen_random_mask(k_mask, N, IMG_SIZE, PATCH_SIZE, MASK_RATIO)   # (N, L)

    loss, pred, mask_out = ssmae_forward(imgs, labels, params, mask)
    jax.block_until_ready((loss, pred, mask_out))

    assert pred.shape == (N, P, H_P, H_P)
    assert mask_out.shape == (N, L)
    assert jnp.isfinite(loss)
    print("KERNEL_OK")
</pallas_src>

<mosaic_0001>
module attributes {stable_mosaic.version = 11 : i64} {
  func.func @ssmae_fused_kernel(%arg0: i32, %arg1: memref<32x768xf32, #tpu.memory_space<vmem>>, %arg2: memref<32x1xf32, #tpu.memory_space<vmem>>, %arg3: memref<768x256xbf16, #tpu.memory_space<vmem>>, %arg4: memref<1x256xf32, #tpu.memory_space<vmem>>, %arg5: memref<1x256xf32, #tpu.memory_space<vmem>>, %arg6: memref<1x256xf32, #tpu.memory_space<vmem>>, %arg7: memref<1x256xf32, #tpu.memory_space<vmem>>, %arg8: memref<256x1024xbf16, #tpu.memory_space<vmem>>, %arg9: memref<1x1024xf32, #tpu.memory_space<vmem>>, %arg10: memref<1024x256xbf16, #tpu.memory_space<vmem>>, %arg11: memref<1x256xf32, #tpu.memory_space<vmem>>, %arg12: memref<256x768xbf16, #tpu.memory_space<vmem>>, %arg13: memref<1x768xf32, #tpu.memory_space<vmem>>, %arg14: memref<32x768xf32, #tpu.memory_space<vmem>>, %arg15: memref<32x1xf32, #tpu.memory_space<vmem>>) attributes {dimension_semantics = [#tpu.dimension_semantics<parallel>], iteration_bounds = array<i64: 1>, scalar_prefetch = 0 : i64, scratch_operands = 0 : i64, tpu.core_type = #tpu.core_type<tc>, window_params = [{transform_indices = @transform_0, window_bounds = array<i64: 32, 768>}, {transform_indices = @transform_1, window_bounds = array<i64: 32, 1>}, {pipeline_mode = #tpu.pipeline_mode<synchronous>, transform_indices = @transform_2, window_bounds = array<i64: 768, 256>}, {pipeline_mode = #tpu.pipeline_mode<synchronous>, transform_indices = @transform_3, window_bounds = array<i64: 1, 256>}, {pipeline_mode = #tpu.pipeline_mode<synchronous>, transform_indices = @transform_4, window_bounds = array<i64: 1, 256>}, {pipeline_mode = #tpu.pipeline_mode<synchronous>, transform_indices = @transform_5, window_bounds = array<i64: 1, 256>}, {pipeline_mode = #tpu.pipeline_mode<synchronous>, transform_indices = @transform_6, window_bounds = array<i64: 1, 256>}, {pipeline_mode = #tpu.pipeline_mode<synchronous>, transform_indices = @transform_7, window_bounds = array<i64: 256, 1024>}, {pipeline_mode = #tpu.pipeline_mode<synchronous>, transform_indices = @transform_8, window_bounds = array<i64: 1, 1024>}, {pipeline_mode = #tpu.pipeline_mode<synchronous>, transform_indices = @transform_9, window_bounds = array<i64: 1024, 256>}, {pipeline_mode = #tpu.pipeline_mode<synchronous>, transform_indices = @transform_10, window_bounds = array<i64: 1, 256>}, {pipeline_mode = #tpu.pipeline_mode<synchronous>, transform_indices = @transform_11, window_bounds = array<i64: 256, 768>}, {pipeline_mode = #tpu.pipeline_mode<synchronous>, transform_indices = @transform_12, window_bounds = array<i64: 1, 768>}, {transform_indices = @transform_13, window_bounds = array<i64: 32, 768>}, {transform_indices = @transform_14, window_bounds = array<i64: 32, 1>}]} {
    %c0 = arith.constant 0 : index
    %c0_0 = arith.constant 0 : index
    %0 = vector.load %arg1[%c0, %c0_0] : memref<32x768xf32, #tpu.memory_space<vmem>>, vector<32x768xf32>
    %c0_1 = arith.constant 0 : index
    %c0_2 = arith.constant 0 : index
    %1 = vector.load %arg2[%c0_1, %c0_2] : memref<32x1xf32, #tpu.memory_space<vmem>>, vector<32x1xf32>
    %cst = arith.constant 1.000000e+00 : f32
    %2 = vector.broadcast %cst : f32 to vector<32x1xf32>
    %3 = arith.subf %2, %1 : vector<32x1xf32>
    %4 = vector.broadcast %3 : vector<32x1xf32> to vector<32x768xf32>
    %5 = arith.mulf %0, %4 : vector<32x768xf32>
    %6 = arith.truncf %5 : vector<32x768xf32> to vector<32x768xbf16>
    %c0_3 = arith.constant 0 : index
    %c0_4 = arith.constant 0 : index
    %7 = vector.load %arg3[%c0_3, %c0_4] : memref<768x256xbf16, #tpu.memory_space<vmem>>, vector<768x256xbf16>
    %cst_5 = arith.constant dense<0.000000e+00> : vector<32x256xf32>
    %8 = tpu.matmul %6, %7, %cst_5 {dimension_numbers = #tpu.dot_dimension_numbers<[1], [0], [0], [1], [0, 0, 1, 1], [], []>} : vector<32x768xbf16>, vector<768x256xbf16>, vector<32x256xf32> -> vector<32x256xf32>
    %c0_6 = arith.constant 0 : index
    %c0_7 = arith.constant 0 : index
    %9 = vector.load %arg4[%c0_6, %c0_7] : memref<1x256xf32, #tpu.memory_space<vmem>>, vector<1x256xf32>
    %10 = vector.broadcast %9 : vector<1x256xf32> to vector<32x256xf32>
    %11 = arith.addf %8, %10 : vector<32x256xf32>
    %12 = vector.broadcast %3 : vector<32x1xf32> to vector<32x256xf32>
    %13 = arith.mulf %11, %12 : vector<32x256xf32>
    %c0_8 = arith.constant 0 : index
    %c0_9 = arith.constant 0 : index
    %14 = vector.load %arg5[%c0_8, %c0_9] : memref<1x256xf32, #tpu.memory_space<vmem>>, vector<1x256xf32>
    %15 = vector.broadcast %14 : vector<1x256xf32> to vector<32x256xf32>
    %16 = vector.broadcast %1 : vector<32x1xf32> to vector<32x256xf32>
    %17 = arith.mulf %15, %16 : vector<32x256xf32>
    %18 = arith.addf %13, %17 : vector<32x256xf32>
    %cst_10 = arith.constant dense<0.000000e+00> : vector<32xf32>
    %19 = vector.multi_reduction <add>, %18, %cst_10 [1] : vector<32x256xf32> to vector<32xf32>
    %20 = vector.shape_cast %19 : vector<32xf32> to vector<32x1xf32>
    %cst_11 = arith.constant 2.560000e+02 : f32
    %21 = vector.broadcast %cst_11 : f32 to vector<32x1xf32>
    %22 = arith.divf %20, %21 : vector<32x1xf32>
    %23 = vector.broadcast %22 : vector<32x1xf32> to vector<32x256xf32>
    %24 = arith.subf %18, %23 : vector<32x256xf32>
    %25 = arith.mulf %24, %24 : vector<32x256xf32>
    %cst_12 = arith.constant dense<0.000000e+00> : vector<32xf32>
    %26 = vector.multi_reduction <add>, %25, %cst_12 [1] : vector<32x256xf32> to vector<32xf32>
    %27 = vector.shape_cast %26 : vector<32xf32> to vector<32x1xf32>
    %cst_13 = arith.constant 2.560000e+02 : f32
    %28 = vector.broadcast %cst_13 : f32 to vector<32x1xf32>
    %29 = arith.divf %27, %28 : vector<32x1xf32>
    %cst_14 = arith.constant 9.99999997E-7 : f32
    %30 = vector.broadcast %cst_14 : f32 to vector<32x1xf32>
    %31 = arith.addf %29, %30 : vector<32x1xf32>
    %32 = math.rsqrt %31 : vector<32x1xf32>
    %33 = vector.broadcast %32 : vector<32x1xf32> to vector<32x256xf32>
    %34 = arith.mulf %24, %33 : vector<32x256xf32>
    %c0_15 = arith.constant 0 : index
    %c0_16 = arith.constant 0 : index
    %35 = vector.load %arg6[%c0_15, %c0_16] : memref<1x256xf32, #tpu.memory_space<vmem>>, vector<1x256xf32>
    %36 = vector.broadcast %35 : vector<1x256xf32> to vector<32x256xf32>
    %37 = arith.mulf %34, %36 : vector<32x256xf32>
    %c0_17 = arith.constant 0 : index
    %c0_18 = arith.constant 0 : index
    %38 = vector.load %arg7[%c0_17, %c0_18] : memref<1x256xf32, #tpu.memory_space<vmem>>, vector<1x256xf32>
    %39 = vector.broadcast %38 : vector<1x256xf32> to vector<32x256xf32>
    %40 = arith.addf %37, %39 : vector<32x256xf32>
    %41 = arith.truncf %40 : vector<32x256xf32> to vector<32x256xbf16>
    %c0_19 = arith.constant 0 : index
    %c0_20 = arith.constant 0 : index
    %42 = vector.load %arg8[%c0_19, %c0_20] : memref<256x1024xbf16, #tpu.memory_space<vmem>>, vector<256x1024xbf16>
    %cst_21 = arith.constant dense<0.000000e+00> : vector<32x1024xf32>
    %43 = tpu.matmul %41, %42, %cst_21 {dimension_numbers = #tpu.dot_dimension_numbers<[1], [0], [0], [1], [0, 0, 1, 1], [], []>} : vector<32x256xbf16>, vector<256x1024xbf16>, vector<32x1024xf32> -> vector<32x1024xf32>
    %c0_22 = arith.constant 0 : index
    %c0_23 = arith.constant 0 : index
    %44 = vector.load %arg9[%c0_22, %c0_23] : memref<1x1024xf32, #tpu.memory_space<vmem>>, vector<1x1024xf32>
    %45 = vector.broadcast %44 : vector<1x1024xf32> to vector<32x1024xf32>
    %46 = arith.addf %43, %45 : vector<32x1024xf32>
    %47 = arith.mulf %46, %46 : vector<32x1024xf32>
    %48 = arith.mulf %46, %47 : vector<32x1024xf32>
    %cst_24 = arith.constant 4.471500e-02 : f32
    %49 = vector.broadcast %cst_24 : f32 to vector<32x1024xf32>
    %50 = arith.mulf %49, %48 : vector<32x1024xf32>
    %51 = arith.addf %46, %50 : vector<32x1024xf32>
    %cst_25 = arith.constant 0.797884583 : f32
    %52 = vector.broadcast %cst_25 : f32 to vector<32x1024xf32>
    %53 = arith.mulf %52, %51 : vector<32x1024xf32>
    %54 = math.tanh %53 : vector<32x1024xf32>
    %cst_26 = arith.constant 1.000000e+00 : f32
    %55 = vector.broadcast %cst_26 : f32 to vector<32x1024xf32>
    %56 = arith.addf %55, %54 : vector<32x1024xf32>
    %cst_27 = arith.constant 5.000000e-01 : f32
    %57 = vector.broadcast %cst_27 : f32 to vector<32x1024xf32>
    %58 = arith.mulf %57, %56 : vector<32x1024xf32>
    %59 = arith.mulf %46, %58 : vector<32x1024xf32>
    %60 = arith.truncf %59 : vector<32x1024xf32> to vector<32x1024xbf16>
    %c0_28 = arith.constant 0 : index
    %c0_29 = arith.constant 0 : index
    %61 = vector.load %arg10[%c0_28, %c0_29] : memref<1024x256xbf16, #tpu.memory_space<vmem>>, vector<1024x256xbf16>
    %cst_30 = arith.constant dense<0.000000e+00> : vector<32x256xf32>
    %62 = tpu.matmul %60, %61, %cst_30 {dimension_numbers = #tpu.dot_dimension_numbers<[1], [0], [0], [1], [0, 0, 1, 1], [], []>} : vector<32x1024xbf16>, vector<1024x256xbf16>, vector<32x256xf32> -> vector<32x256xf32>
    %c0_31 = arith.constant 0 : index
    %c0_32 = arith.constant 0 : index
    %63 = vector.load %arg11[%c0_31, %c0_32] : memref<1x256xf32, #tpu.memory_space<vmem>>, vector<1x256xf32>
    %64 = vector.broadcast %63 : vector<1x256xf32> to vector<32x256xf32>
    %65 = arith.addf %62, %64 : vector<32x256xf32>
    %66 = arith.addf %18, %65 : vector<32x256xf32>
    %67 = arith.truncf %66 : vector<32x256xf32> to vector<32x256xbf16>
    %c0_33 = arith.constant 0 : index
    %c0_34 = arith.constant 0 : index
    %68 = vector.load %arg12[%c0_33, %c0_34] : memref<256x768xbf16, #tpu.memory_space<vmem>>, vector<256x768xbf16>
    %cst_35 = arith.constant dense<0.000000e+00> : vector<32x768xf32>
    %69 = tpu.matmul %67, %68, %cst_35 {dimension_numbers = #tpu.dot_dimension_numbers<[1], [0], [0], [1], [0, 0, 1, 1], [], []>} : vector<32x256xbf16>, vector<256x768xbf16>, vector<32x768xf32> -> vector<32x768xf32>
    %c0_36 = arith.constant 0 : index
    %c0_37 = arith.constant 0 : index
    %70 = vector.load %arg13[%c0_36, %c0_37] : memref<1x768xf32, #tpu.memory_space<vmem>>, vector<1x768xf32>
    %71 = vector.broadcast %70 : vector<1x768xf32> to vector<32x768xf32>
    %72 = arith.addf %69, %71 : vector<32x768xf32>
    %c0_38 = arith.constant 0 : index
    %c0_39 = arith.constant 0 : index
    %73 = vector.load %arg14[%c0_38, %c0_39] : memref<32x768xf32, #tpu.memory_space<vmem>>, vector<32x768xf32>
    tpu.vector_store %arg14[%c0_38, %c0_39], %72 {strides = array<i32>} : memref<32x768xf32, #tpu.memory_space<vmem>>, vector<32x768xf32>,
    %74 = arith.subf %72, %0 : vector<32x768xf32>
    %75 = arith.mulf %74, %74 : vector<32x768xf32>
    %cst_40 = arith.constant dense<0.000000e+00> : vector<32xf32>
    %76 = vector.multi_reduction <add>, %75, %cst_40 [1] : vector<32x768xf32> to vector<32xf32>
    %77 = vector.shape_cast %76 : vector<32xf32> to vector<32x1xf32>
    %cst_41 = arith.constant 7.680000e+02 : f32
    %78 = vector.broadcast %cst_41 : f32 to vector<32x1xf32>
    %79 = arith.divf %77, %78 : vector<32x1xf32>
    %80 = arith.mulf %79, %1 : vector<32x1xf32>
    %c0_42 = arith.constant 0 : index
    %c0_43 = arith.constant 0 : index
    %81 = vector.load %arg15[%c0_42, %c0_43] : memref<32x1xf32, #tpu.memory_space<vmem>>, vector<32x1xf32>
    tpu.vector_store %arg15[%c0_42, %c0_43], %80 {strides = array<i32>} : memref<32x1xf32, #tpu.memory_space<vmem>>, vector<32x1xf32>,
    return
  }
  func.func @transform_0(%arg0: i32) -> (i32, i32) {
    %c0_i32 = arith.constant 0 : i32
    %c0_i32_0 = arith.constant 0 : i32
    return %arg0, %c0_i32 : i32, i32
  }
  func.func @transform_1(%arg0: i32) -> (i32, i32) {
    %c0_i32 = arith.constant 0 : i32
    %c0_i32_0 = arith.constant 0 : i32
    return %arg0, %c0_i32 : i32, i32
  }
  func.func @transform_2(%arg0: i32) -> (i32, i32) {
    %c0_i32 = arith.constant 0 : i32
    %c0_i32_0 = arith.constant 0 : i32
    %c0_i32_1 = arith.constant 0 : i32
    return %c0_i32, %c0_i32_0 : i32, i32
  }
  func.func @transform_3(%arg0: i32) -> (i32, i32) {
    %c0_i32 = arith.constant 0 : i32
    %c0_i32_0 = arith.constant 0 : i32
    %c0_i32_1 = arith.constant 0 : i32
    return %c0_i32, %c0_i32_0 : i32, i32
  }
  func.func @transform_4(%arg0: i32) -> (i32, i32) {
    %c0_i32 = arith.constant 0 : i32
    %c0_i32_0 = arith.constant 0 : i32
    %c0_i32_1 = arith.constant 0 : i32
    return %c0_i32, %c0_i32_0 : i32, i32
  }
  func.func @transform_5(%arg0: i32) -> (i32, i32) {
    %c0_i32 = arith.constant 0 : i32
    %c0_i32_0 = arith.constant 0 : i32
    %c0_i32_1 = arith.constant 0 : i32
    return %c0_i32, %c0_i32_0 : i32, i32
  }
  func.func @transform_6(%arg0: i32) -> (i32, i32) {
    %c0_i32 = arith.constant 0 : i32
    %c0_i32_0 = arith.constant 0 : i32
    %c0_i32_1 = arith.constant 0 : i32
    return %c0_i32, %c0_i32_0 : i32, i32
  }
  func.func @transform_7(%arg0: i32) -> (i32, i32) {
    %c0_i32 = arith.constant 0 : i32
    %c0_i32_0 = arith.constant 0 : i32
    %c0_i32_1 = arith.constant 0 : i32
    return %c0_i32, %c0_i32_0 : i32, i32
  }
  func.func @transform_8(%arg0: i32) -> (i32, i32) {
    %c0_i32 = arith.constant 0 : i32
    %c0_i32_0 = arith.constant 0 : i32
    %c0_i32_1 = arith.constant 0 : i32
    return %c0_i32, %c0_i32_0 : i32, i32
  }
  func.func @transform_9(%arg0: i32) -> (i32, i32) {
    %c0_i32 = arith.constant 0 : i32
    %c0_i32_0 = arith.constant 0 : i32
    %c0_i32_1 = arith.constant 0 : i32
    return %c0_i32, %c0_i32_0 : i32, i32
  }
  func.func @transform_10(%arg0: i32) -> (i32, i32) {
    %c0_i32 = arith.constant 0 : i32
    %c0_i32_0 = arith.constant 0 : i32
    %c0_i32_1 = arith.constant 0 : i32
    return %c0_i32, %c0_i32_0 : i32, i32
  }
  func.func @transform_11(%arg0: i32) -> (i32, i32) {
    %c0_i32 = arith.constant 0 : i32
    %c0_i32_0 = arith.constant 0 : i32
    %c0_i32_1 = arith.constant 0 : i32
    return %c0_i32, %c0_i32_0 : i32, i32
  }
  func.func @transform_12(%arg0: i32) -> (i32, i32) {
    %c0_i32 = arith.constant 0 : i32
    %c0_i32_0 = arith.constant 0 : i32
    %c0_i32_1 = arith.constant 0 : i32
    return %c0_i32, %c0_i32_0 : i32, i32
  }
  func.func @transform_13(%arg0: i32) -> (i32, i32) {
    %c0_i32 = arith.constant 0 : i32
    %c0_i32_0 = arith.constant 0 : i32
    return %arg0, %c0_i32 : i32, i32
  }
  func.func @transform_14(%arg0: i32) -> (i32, i32) {
    %c0_i32 = arith.constant 0 : i32
    %c0_i32_0 = arith.constant 0 : i32
    return %arg0, %c0_i32 : i32, i32
  }
}

</mosaic_0001>

<bundles_post_ra>
// kernel: ssmae_forward.1
= control target key start
LH: loop header
LB: loop body
LE: loop exit
PB: predicated region body
PF: predicated region fallthrough
CT: control target
= control target key end

     0   :  { %v5296_v0 = vmov 0   ;;  %vm4252_vm0 = vcmask 7168   ;;  %s7520_s1 = inlined_call_operand.vmem [shape: f32[32,1], index: 1, kind: input, shape index: {}]   ;;  %s7521_s2 = inlined_call_operand.vmem [shape: bf16[768,256], index: 2, kind: input, shape index: {}]   ;;  %s7522_s0 = inlined_call_operand.vmem [shape: f32[32,768], index: 0, kind: input, shape index: {}]   ;;  %s7523_s3 = inlined_call_operand.vmem [shape: f32[1,256], index: 3, kind: input, shape index: {}]   ;;  %s7524_s4 = inlined_call_operand.vmem [shape: f32[1,256], index: 4, kind: input, shape index: {}]   ;;  %s7525_s7 = inlined_call_operand.vmem [shape: bf16[256,1024], index: 7, kind: input, shape index: {}]   ;;  %s7526_s9 = inlined_call_operand.vmem [shape: bf16[1024,256], index: 9, kind: input, shape index: {}]   ;;  %s7527_s5 = inlined_call_operand.vmem [shape: f32[1,256], index: 5, kind: input, shape index: {}]   ;;  %s7528_s6 = inlined_call_operand.vmem [shape: f32[1,256], index: 6, kind: input, shape index: {}]   ;;  %s7529_s8 = inlined_call_operand.vmem [shape: f32[1,1024], index: 8, kind: input, shape index: {}]   ;;  %s7530_s11 = inlined_call_operand.vmem [shape: bf16[256,768], index: 11, kind: input, shape index: {}]   ;;  %s7531_s10 = inlined_call_operand.vmem [shape: f32[1,256], index: 10, kind: input, shape index: {}]   ;;  %s7532_s12 = inlined_call_operand.vmem [shape: f32[1,768], index: 12, kind: input, shape index: {}]   ;;  %s7533_s13 = inlined_call_operand.vmem [shape: f32[32,768], index: 13, kind: output, shape index: {0}]   ;;  %s7534_s14 = inlined_call_operand.vmem [shape: f32[32,1], index: 14, kind: output, shape index: {1}]  }
   0x1   :  { %4714 = vset.pattern.permute.xlu0 %v5296_v0  ;;  %v70_v1 = vld [vmem:[%s7520_s1] sm:$0xff]  ;;  %v71_v2 = vld [vmem:[%s7520_s1 + $0x8] sm:$0xff]  ;;  %4715 = vset.pattern.permute.xlu1 %v5296_v0  ;;  %v72_v3 = vld [vmem:[%s7520_s1 + $0x10] sm:$0xff] }
   0x2   :  { %v74_v4 = vsub.f32 1.0, %v70_v1  ;;  %v76_v5 = vsub.f32 1.0, %v72_v3  ;;  %v73_v6 = vld [vmem:[%s7520_s1 + $0x18] sm:$0xff]  ;;  %v75_v7 = vsub.f32 1.0, %v71_v2  ;;  %v4722_v13 = vld [vmem:[%s7521_s2 + $0x64] ss:$8 sps:$4 sm:$0xff]  }
   0x3   :  { %v4716_v8 = vld [vmem:[%s7521_s2 + $0x74] ss:$8 sps:$4 sm:$0xff]   ;;  %v4718_v9 = vld [vmem:[%s7521_s2 + $0x70] ss:$8 sps:$4 sm:$0xff]   ;;  %v77_v10 = vsub.f32 1.0, %v73_v6 }
   0x4   :  { %80 = vperm.xlu0 %4714, %v74_v4   ;;  %90 = vperm.xlu1 %4715, %v76_v5   ;;  %v4719_v11 = vld [vmem:[%s7521_s2 + $0x174] ss:$8 sps:$4 sm:$0xff]   ;;  %v4721_v12 = vld [vmem:[%s7521_s2 + $0x170] ss:$8 sps:$4 sm:$0xff]   ;;  %v4724_v14 = vld [vmem:[%s7521_s2 + $0x60] ss:$8 sps:$4 sm:$0xff]  }
   0x5   :  { %722 = vmatprep.subr.bf16.mxu0 %v4716_v8  ;;  %775 = vmatprep.subr.bf16.mxu1 %v4719_v11  ;;  %v4725_v15 = vld [vmem:[%s7521_s2 + $0x164] ss:$8 sps:$4 sm:$0xff]   ;;  %v4727_v16 = vld [vmem:[%s7521_s2 + $0x160] ss:$8 sps:$4 sm:$0xff]   ;;  %v4728_v17 = vld [vmem:[%s7521_s2 + $0x54] ss:$8 sps:$4 sm:$0xff]  }
   0x6   :  { %723 = vmatpush1.bf16.msra.mxu0 %v4718_v9  ;;  %776 = vmatpush1.bf16.msra.mxu1 %v4721_v12  ;;  %v4731_v18 = vld [vmem:[%s7521_s2 + $0x154] ss:$8 sps:$4 sm:$0xff]   ;;  %v4730_v19 = vld [vmem:[%s7521_s2 + $0x50] ss:$8 sps:$4 sm:$0xff]   ;;  %v4734_v21 = vld [vmem:[%s7521_s2 + $0x44] ss:$8 sps:$4 sm:$0xff]  }
   0x7   :  { %724 = vmatprep.subr.bf16.mxu0 %v4722_v13  ;;  %777 = vmatprep.subr.bf16.mxu1 %v4725_v15  ;;  %v4733_v20 = vld [vmem:[%s7521_s2 + $0x150] ss:$8 sps:$4 sm:$0xff]   ;;  %v4737_v22 = vld [vmem:[%s7521_s2 + $0x144] ss:$8 sps:$4 sm:$0xff]   ;;  %v4736_v23 = vld [vmem:[%s7521_s2 + $0x40] ss:$8 sps:$4 sm:$0xff]  }
   0x8   :  { %85 = vperm.xlu0 %4714, %v75_v7   ;;  %95 = vperm.xlu1 %4715, %v77_v10   ;;  %v4739_v24 = vld [vmem:[%s7521_s2 + $0x140] ss:$8 sps:$4 sm:$0xff]   ;;  %v4740_v25 = vld [vmem:[%s7521_s2 + $0x34] ss:$8 sps:$4 sm:$0xff]   ;;  %v4742_v27 = vld [vmem:[%s7521_s2 + $0x30] ss:$8 sps:$4 sm:$0xff]  }
   0x9   :  { %v4743_v26 = vld [vmem:[%s7521_s2 + $0x134] ss:$8 sps:$4 sm:$0xff]   ;;  %v4745_v28 = vld [vmem:[%s7521_s2 + $0x130] ss:$8 sps:$4 sm:$0xff]   ;;  %v4746_v29 = vld [vmem:[%s7521_s2 + $0x24] ss:$8 sps:$4 sm:$0xff]  }
   0xa   :  { %725 = vmatpush1.bf16.msra.mxu0 %v4724_v14  ;;  %778 = vmatpush1.bf16.msra.mxu1 %v4727_v16  ;;  %v4749_v30 = vld [vmem:[%s7521_s2 + $0x124] ss:$8 sps:$4 sm:$0xff]   ;;  %v4748_v31 = vld [vmem:[%s7521_s2 + $0x20] ss:$8 sps:$4 sm:$0xff]   ;;  %v4752_v33 = vld [vmem:[%s7521_s2 + $0x14] ss:$8 sps:$4 sm:$0xff]  }
   0xb   :  { %726 = vmatprep.subr.bf16.mxu0 %v4728_v17  ;;  %779 = vmatprep.subr.bf16.mxu1 %v4731_v18  ;;  %v4751_v32 = vld [vmem:[%s7521_s2 + $0x120] ss:$8 sps:$4 sm:$0xff]   ;;  %v4755_v34 = vld [vmem:[%s7521_s2 + $0x114] ss:$8 sps:$4 sm:$0xff]   ;;  %v4754_v35 = vld [vmem:[%s7521_s2 + $0x10] ss:$8 sps:$4 sm:$0xff]  }
   0xc   :  { %903 = vperm.xlu0 %4714, %v70_v1   ;;  %908 = vperm.xlu1 %4715, %v71_v2   ;;  %v4757_v36 = vld [vmem:[%s7521_s2 + $0x110] ss:$8 sps:$4 sm:$0xff]   ;;  %v4758_v37 = vld [vmem:[%s7521_s2 + $0x4] ss:$8 sps:$4 sm:$0xff]   ;;  %v4760_v39 = vld [vmem:[%s7521_s2] ss:$8 sps:$4 sm:$0xff]  }
   0xd   :  { %v4761_v38 = vld [vmem:[%s7521_s2 + $0x104] ss:$8 sps:$4 sm:$0xff]   ;;  %v4763_v40 = vld [vmem:[%s7521_s2 + $0x100] ss:$8 sps:$4 sm:$0xff]   ;;  %v4764_v41 = vld [vmem:[%s7521_s2 + $0xf4] ss:$8 sps:$4 sm:$0xff]  }
   0xe   :  { %727 = vmatpush1.bf16.msra.mxu0 %v4730_v19  ;;  %780 = vmatpush1.bf16.msra.mxu1 %v4733_v20  ;;  %v4767_v42 = vld [vmem:[%s7521_s2 + $0x1f4] ss:$8 sps:$4 sm:$0xff]   ;;  %v4766_v43 = vld [vmem:[%s7521_s2 + $0xf0] ss:$8 sps:$4 sm:$0xff]   ;;  %v4770_v45 = vld [vmem:[%s7521_s2 + $0xe4] ss:$8 sps:$4 sm:$0xff]  }
   0xf   :  { %728 = vmatprep.subr.bf16.mxu0 %v4734_v21  ;;  %781 = vmatprep.subr.bf16.mxu1 %v4737_v22  ;;  %v4769_v44 = vld [vmem:[%s7521_s2 + $0x1f0] ss:$8 sps:$4 sm:$0xff]   ;;  %v4773_v46 = vld [vmem:[%s7521_s2 + $0x1e4] ss:$8 sps:$4 sm:$0xff]   ;;  %v4772_v47 = vld [vmem:[%s7521_s2 + $0xe0] ss:$8 sps:$4 sm:$0xff]  }
  0x10   :  { %913 = vperm.xlu0 %4714, %v72_v3   ;;  %918 = vperm.xlu1 %4715, %v73_v6   ;;  %v4775_v48 = vld [vmem:[%s7521_s2 + $0x1e0] ss:$8 sps:$4 sm:$0xff]   ;;  %v4776_v49 = vld [vmem:[%s7521_s2 + $0xd4] ss:$8 sps:$4 sm:$0xff]   ;;  %v4778_v51 = vld [vmem:[%s7521_s2 + $0xd0] ss:$8 sps:$4 sm:$0xff]  }
  0x11   :  { %v4779_v50 = vld [vmem:[%s7521_s2 + $0x1d4] ss:$8 sps:$4 sm:$0xff]   ;;  %v4781_v52 = vld [vmem:[%s7521_s2 + $0x1d0] ss:$8 sps:$4 sm:$0xff]   ;;  %v4782_v53 = vld [vmem:[%s7521_s2 + $0xc4] ss:$8 sps:$4 sm:$0xff]  }
  0x12   :  { %729 = vmatpush1.bf16.msra.mxu0 %v4736_v23  ;;  %782 = vmatpush1.bf16.msra.mxu1 %v4739_v24  ;;  %v4785_v54 = vld [vmem:[%s7521_s2 + $0x1c4] ss:$8 sps:$4 sm:$0xff]   ;;  %v4784_v55 = vld [vmem:[%s7521_s2 + $0xc0] ss:$8 sps:$4 sm:$0xff]   ;;  %v4788_v57 = vld [vmem:[%s7521_s2 + $0xb4] ss:$8 sps:$4 sm:$0xff]  }
  0x13   :  { %730 = vmatprep.subr.bf16.mxu0 %v4740_v25  ;;  %783 = vmatprep.subr.bf16.mxu1 %v4743_v26  ;;  %v4787_v56 = vld [vmem:[%s7521_s2 + $0x1c0] ss:$8 sps:$4 sm:$0xff]   ;;  %v4791_v58 = vld [vmem:[%s7521_s2 + $0x1b4] ss:$8 sps:$4 sm:$0xff]   ;;  %v4790_v59 = vld [vmem:[%s7521_s2 + $0xb0] ss:$8 sps:$4 sm:$0xff]  }
  0x14   :  { %v4793_v60 = vld [vmem:[%s7521_s2 + $0x1b0] ss:$8 sps:$4 sm:$0xff]   ;;  %v4794_v61 = vld [vmem:[%s7521_s2 + $0xa4] ss:$8 sps:$4 sm:$0xff]   ;;  %v4796_v63 = vld [vmem:[%s7521_s2 + $0xa0] ss:$8 sps:$4 sm:$0xff]  }
  0x15   :  { %v4797_v62 = vld [vmem:[%s7521_s2 + $0x1a4] ss:$8 sps:$4 sm:$0xff]   ;;  %v4799_v0 = vld [vmem:[%s7521_s2 + $0x1a0] ss:$8 sps:$4 sm:$0xff]   ;;  %v4800_v1 = vld [vmem:[%s7521_s2 + $0x94] ss:$8 sps:$4 sm:$0xff]  }
  0x16   :  { %731 = vmatpush1.bf16.msra.mxu0 %v4742_v27  ;;  %784 = vmatpush1.bf16.msra.mxu1 %v4745_v28  ;;  %v4803_v2 = vld [vmem:[%s7521_s2 + $0x194] ss:$8 sps:$4 sm:$0xff]   ;;  %v4802_v3 = vld [vmem:[%s7521_s2 + $0x90] ss:$8 sps:$4 sm:$0xff]   ;;  %v4806_v5 = vld [vmem:[%s7521_s2 + $0x84] ss:$8 sps:$4 sm:$0xff]  }
  0x17   :  { %732 = vmatprep.subr.bf16.mxu0 %v4746_v29  ;;  %785 = vmatprep.subr.bf16.mxu1 %v4749_v30  ;;  %v4805_v4 = vld [vmem:[%s7521_s2 + $0x190] ss:$8 sps:$4 sm:$0xff]   ;;  %v4809_v6 = vld [vmem:[%s7521_s2 + $0x184] ss:$8 sps:$4 sm:$0xff]   ;;  %v4808_v7 = vld [vmem:[%s7521_s2 + $0x80] ss:$8 sps:$4 sm:$0xff]  }
  0x18   :  { %v4811_v8 = vld [vmem:[%s7521_s2 + $0x180] ss:$8 sps:$4 sm:$0xff]   ;;  %v4814_v9 = vld [vmem:[%s7521_s2 + $0x274] ss:$8 sps:$4 sm:$0xff]  }
  0x19   :  { %v47_v10 = vld [vmem:[%s7522_s0 + $0x8] sm:$0xff]  ;;  %v53_v13 = vld [vmem:[%s7522_s0 + $0x38] sm:$0xff]  ;;  %v46_v15 = vld [vmem:[%s7522_s0] sm:$0xff] }
  0x1a   :  { %733 = vmatpush1.bf16.msra.mxu0 %v4748_v31  ;;  %786 = vmatpush1.bf16.msra.mxu1 %v4751_v32  ;;  %v49_v14 = vld [vmem:[%s7522_s0 + $0x18] sm:$0xff]  ;;  %v48_v16 = vld [vmem:[%s7522_s0 + $0x10] sm:$0xff]  ;;  %v59_v17 = vld [vmem:[%s7522_s0 + $0x68] sm:$0xff] }
  0x1b   :  { %734 = vmatprep.subr.bf16.mxu0 %v4752_v33  ;;  %787 = vmatprep.subr.bf16.mxu1 %v4755_v34  ;;  %v61_v18 = vld [vmem:[%s7522_s0 + $0x78] sm:$0xff]  ;;  %v55_v19 = vld [vmem:[%s7522_s0 + $0x48] sm:$0xff]  ;;  %v52_v20 = vld [vmem:[%s7522_s0 + $0x30] sm:$0xff] }
  0x1c   :  { %v54_v21 = vld [vmem:[%s7522_s0 + $0x40] sm:$0xff]  ;;  %v65_v24 = vld [vmem:[%s7522_s0 + $0x98] sm:$0xff]  ;;  %v67_v25 = vld [vmem:[%s7522_s0 + $0xa8] sm:$0xff] }
  0x1e   :  { %735 = vmatpush1.bf16.msra.mxu0 %v4754_v35  ;;  %788 = vmatpush1.bf16.msra.mxu1 %v4757_v36  ;;  %v4812_v36 = vld [vmem:[%s7521_s2 + $0x270] ss:$8 sps:$4 sm:$0xff]  }
  0x1f   :  { %736 = vmatprep.subr.bf16.mxu0 %v4758_v37  ;;  %789 = vmatprep.subr.bf16.mxu1 %v4761_v38  ;;  %v58_v38 = vld [vmem:[%s7522_s0 + $0x60] sm:$0xff] }
  0x22   :  { %737 = vmatpush1.bf16.msra.mxu0 %v4760_v39  ;;  %790 = vmatpush1.bf16.msra.mxu1 %v4763_v40 }
  0x23   :  { %738 = vmatprep.subr.bf16.mxu0 %v4764_v41  ;;  %791 = vmatprep.subr.bf16.mxu1 %v4767_v42 }
  0x26   :  { %739 = vmatpush2.bf16.msra.mxu0 %v4766_v43  ;;  %792 = vmatpush2.bf16.msra.mxu1 %v4769_v44  ;;  %v64_v44 = vld [vmem:[%s7522_s0 + $0x90] sm:$0xff] }
  0x27   :  { %740 = vmatprep.subr.bf16.mxu0 %v4770_v45  ;;  %793 = vmatprep.subr.bf16.mxu1 %v4773_v46  ;;  %v60_v45 = vld [vmem:[%s7522_s0 + $0x70] sm:$0xff]  ;;  %v66_v46 = vld [vmem:[%s7522_s0 + $0xa0] sm:$0xff] }
  0x2a   :  { %741 = vmatpush2.bf16.msra.mxu0 %v4772_v47  ;;  %794 = vmatpush2.bf16.msra.mxu1 %v4775_v48  ;;  %v4817_v47 = vld [vmem:[%s7521_s2 + $0x264] ss:$8 sps:$4 sm:$0xff]  }
  0x2b   :  { %742 = vmatprep.subr.bf16.mxu0 %v4776_v49  ;;  %795 = vmatprep.subr.bf16.mxu1 %v4779_v50 }
  0x2e   :  { %743 = vmatpush2.bf16.msra.mxu0 %v4778_v51  ;;  %796 = vmatpush2.bf16.msra.mxu1 %v4781_v52  ;;  %v57_v52 = vld [vmem:[%s7522_s0 + $0x58] sm:$0xff] }
  0x2f   :  { %744 = vmatprep.subr.bf16.mxu0 %v4782_v53  ;;  %797 = vmatprep.subr.bf16.mxu1 %v4785_v54 }
  0x32   :  { %745 = vmatpush2.bf16.msra.mxu0 %v4784_v55  ;;  %798 = vmatpush2.bf16.msra.mxu1 %v4787_v56  ;;  %v4815_v55 = vld [vmem:[%s7521_s2 + $0x260] ss:$8 sps:$4 sm:$0xff]   ;;  %v4820_v56 = vld [vmem:[%s7521_s2 + $0x254] ss:$8 sps:$4 sm:$0xff]  }
  0x33   :  { %746 = vmatprep.subr.bf16.mxu0 %v4788_v57  ;;  %799 = vmatprep.subr.bf16.mxu1 %v4791_v58  ;;  %v51_v57 = vld [vmem:[%s7522_s0 + $0x28] sm:$0xff] }
  0x36   :  { %747 = vmatpush2.bf16.msra.mxu0 %v4790_v59  ;;  %800 = vmatpush2.bf16.msra.mxu1 %v4793_v60 }
  0x37   :  { %748 = vmatprep.subr.bf16.mxu0 %v4794_v61  ;;  %801 = vmatprep.subr.bf16.mxu1 %v4797_v62  ;;  %v4818_v61 = vld [vmem:[%s7521_s2 + $0x250] ss:$8 sps:$4 sm:$0xff]  }
  0x3a   :  { %749 = vmatpush2.bf16.msra.mxu0 %v4796_v63  ;;  %802 = vmatpush2.bf16.msra.mxu1 %v4799_v0  ;;  %v4823_v63 = vld [vmem:[%s7521_s2 + $0x244] ss:$8 sps:$4 sm:$0xff]  }
  0x3b   :  { %750 = vmatprep.subr.bf16.mxu0 %v4800_v1  ;;  %803 = vmatprep.subr.bf16.mxu1 %v4803_v2  ;;  %v4821_v1 = vld [vmem:[%s7521_s2 + $0x240] ss:$8 sps:$4 sm:$0xff]   ;;  %v4826_v2 = vld [vmem:[%s7521_s2 + $0x234] ss:$8 sps:$4 sm:$0xff]  }
  0x3e   :  { %751 = vmatpush2.bf16.msra.mxu0 %v4802_v3  ;;  %804 = vmatpush2.bf16.msra.mxu1 %v4805_v4  ;;  %v4824_v3 = vld [vmem:[%s7521_s2 + $0x230] ss:$8 sps:$4 sm:$0xff]   ;;  %v4829_v4 = vld [vmem:[%s7521_s2 + $0x224] ss:$8 sps:$4 sm:$0xff]  }
  0x3f   :  { %752 = vmatprep.subr.bf16.mxu0 %v4806_v5  ;;  %805 = vmatprep.subr.bf16.mxu1 %v4809_v6  ;;  %v4827_v5 = vld [vmem:[%s7521_s2 + $0x220] ss:$8 sps:$4 sm:$0xff]   ;;  %v4832_v6 = vld [vmem:[%s7521_s2 + $0x214] ss:$8 sps:$4 sm:$0xff]  }
  0x42   :  { %753 = vmatpush2.bf16.msra.mxu0 %v4808_v7  ;;  %806 = vmatpush2.bf16.msra.mxu1 %v4811_v8  ;;  %v4830_v7 = vld [vmem:[%s7521_s2 + $0x210] ss:$8 sps:$4 sm:$0xff]   ;;  %v4835_v8 = vld [vmem:[%s7521_s2 + $0x204] ss:$8 sps:$4 sm:$0xff]  }
  0x43   :  { %828 = vmatprep.subr.bf16.mxu0 %v4814_v9  ;;  %v4833_v9 = vld [vmem:[%s7521_s2 + $0x200] ss:$8 sps:$4 sm:$0xff]  }
  0x7f   :  { %v5582_v11 = vpop.permute.xlu0 %80  ;;  %v5584_v12 = vpop.permute.xlu1 %90 }
  0x80   :  { %v99_v22 = vmul.f32 %v5582_v11, %v47_v10  ;;  %v101_v23 = vmul.f32 %v5582_v11, %v49_v14  ;;  %v98_v27 = vmul.f32 %v5582_v11, %v46_v15  ;;  %v100_v28 = vmul.f32 %v5582_v11, %v48_v16  ;;  %v4838_v10 = vld [vmem:[%s7521_s2 + $0x2f4] ss:$8 sps:$4 sm:$0xff]   ;;  %v4841_v14 = vld [vmem:[%s7521_s2 + $0x2e4] ss:$8 sps:$4 sm:$0xff]   ;;  %v4839_v15 = vld [vmem:[%s7521_s2 + $0x2e0] ss:$8 sps:$4 sm:$0xff]  }
  0x81   :  { %v111_v30 = vmul.f32 %v5584_v12, %v59_v17  ;;  %v113_v31 = vmul.f32 %v5584_v12, %v61_v18  ;;  %v110_v50 = vmul.f32 %v5584_v12, %v58_v38  ;;  %v112_v53 = vmul.f32 %v5584_v12, %v60_v45  ;;  %v4844_v16 = vld [vmem:[%s7521_s2 + $0x2d4] ss:$8 sps:$4 sm:$0xff]   ;;  %v4842_v17 = vld [vmem:[%s7521_s2 + $0x2d0] ss:$8 sps:$4 sm:$0xff]   ;;  %v4847_v18 = vld [vmem:[%s7521_s2 + $0x2c4] ss:$8 sps:$4 sm:$0xff]  }
  0x82   :  { %v103_v62 = vmul.f32 %v5582_v11, %v51_v57 }
  0x83   :  { %v5621_v26 = vpop.permute.xlu0 %85  ;;  %v5625_v29 = vpop.permute.xlu1 %95 }
  0x84   :  { %v105_v32 = vmul.f32 %v5621_v26, %v53_v13  ;;  %v107_v33 = vmul.f32 %v5621_v26, %v55_v19  ;;  %v104_v34 = vmul.f32 %v5621_v26, %v52_v20  ;;  %v106_v35 = vmul.f32 %v5621_v26, %v54_v21  ;;  %v4836_v13 = vld [vmem:[%s7521_s2 + $0x2f0] ss:$8 sps:$4 sm:$0xff]   ;;  %v4845_v19 = vld [vmem:[%s7521_s2 + $0x2c0] ss:$8 sps:$4 sm:$0xff]   ;;  %v4850_v20 = vld [vmem:[%s7521_s2 + $0x2b4] ss:$8 sps:$4 sm:$0xff]  }
  0x85   :  { %v117_v37 = vmul.f32 %v5625_v29, %v65_v24  ;;  %v119_v39 = vmul.f32 %v5625_v29, %v67_v25  ;;  %v116_v51 = vmul.f32 %v5625_v29, %v64_v44  ;;  %v118_v54 = vmul.f32 %v5625_v29, %v66_v46  ;;  %v4848_v21 = vld [vmem:[%s7521_s2 + $0x2b0] ss:$8 sps:$4 sm:$0xff]   ;;  %v4856_v24 = vld [vmem:[%s7521_s2 + $0x294] ss:$8 sps:$4 sm:$0xff]  }
  0x86   :  { %v123_v40 = vpack.c.bf16 %v105_v32, %v99_v22  ;;  %v125_v41 = vpack.c.bf16 %v107_v33, %v101_v23  ;;  %v122_v42 = vpack.c.bf16 %v104_v34, %v98_v27  ;;  %v124_v43 = vpack.c.bf16 %v106_v35, %v100_v28  ;;  %v4853_v22 = vld [vmem:[%s7521_s2 + $0x2a4] ss:$8 sps:$4 sm:$0xff]   ;;  %v4851_v23 = vld [vmem:[%s7521_s2 + $0x2a0] ss:$8 sps:$4 sm:$0xff]   ;;  %v4854_v25 = vld [vmem:[%s7521_s2 + $0x290] ss:$8 sps:$4 sm:$0xff]  }
  0x87   :  { %v129_v48 = vpack.c.bf16 %v117_v37, %v111_v30  ;;  %v131_v49 = vpack.c.bf16 %v119_v39, %v113_v31  ;;  %v109_v58 = vmul.f32 %v5621_v26, %v57_v52  ;;  %v128_v59 = vpack.c.bf16 %v116_v51, %v110_v50  ;;  %v4859_v27 = vld [vmem:[%s7521_s2 + $0x284] ss:$8 sps:$4 sm:$0xff]   ;;  %v56_v28 = vld [vmem:[%s7522_s0 + $0x50] sm:$0xff]  ;;  %v69_v31 = vld [vmem:[%s7522_s0 + $0xb8] sm:$0xff] }
  0x88   :  { %754 = vmatprep.mubr.bf16.mxu0 %v123_v40  ;;  %807 = vmatprep.mubr.bf16.mxu1 %v125_v41  ;;  %v130_v60 = vpack.c.bf16 %v118_v54, %v112_v53  ;;  %v63_v30 = vld [vmem:[%s7522_s0 + $0x88] sm:$0xff]  ;;  %v50_v33 = vld [vmem:[%s7522_s0 + $0x20] sm:$0xff]  ;;  %v108_v34 = vmul.f32 %v5621_v26, %v56_v28  ;;  %v68_v41 = vld [vmem:[%s7522_s0 + $0xb0] sm:$0xff] }
  0x89   :  { %755 = vmatmul.mubr.bf16.vlgmr.msra.gmra.mxu0 %v122_v42  ;;  %808 = vmatmul.mubr.bf16.vlgmr.msra.gmra.mxu1 %v124_v43  ;;  %v127_v0 = vpack.c.bf16 %v109_v58, %v103_v62  ;;  %v4857_v32 = vld [vmem:[%s7521_s2 + $0x280] ss:$8 sps:$4 sm:$0xff]   ;;  %v115_v35 = vmul.f32 %v5584_v12, %v63_v30  ;;  %v102_v37 = vmul.f32 %v5582_v11, %v50_v33 }
  0x8a   :  { %829 = vmatpush1.bf16.msra.mxu0 %v4812_v36  ;;  %764 = vmatprep.mubr.bf16.mxu0 %v129_v48  ;;  %v121_v36 = vmul.f32 %v5625_v29, %v69_v31  ;;  %v62_v40 = vld [vmem:[%s7522_s0 + $0x80] sm:$0xff]  ;;  %v120_v43 = vmul.f32 %v5625_v29, %v68_v41  ;;  %v232_v48 = vlaneseq }
  0x8b   :  { %830 = vmatprep.subr.bf16.mxu0 %v4817_v47  ;;  %817 = vmatprep.mubr.bf16.mxu1 %v131_v49  ;;  %v126_v38 = vpack.c.bf16 %v108_v34, %v102_v37  ;;  %v114_v42 = vmul.f32 %v5584_v12, %v62_v40  ;;  %v230_v53 = vld [vmem:[%s7523_s3] sm:$0x3]  ;;  %v909_v34 = vpop.permute.xlu1 %908 }
  0x8c   :  { %v133_v39 = vpack.c.bf16 %v121_v36, %v115_v35  ;;  %v5776_v51 = vshrl.u32 %v232_v48, 7 }
  0x8d   :  { %v132_v44 = vpack.c.bf16 %v120_v43, %v114_v42 }
  0x8e   :  { %831 = vmatpush1.bf16.msra.mxu0 %v4815_v55  ;;  %v5782_v55 = vsub.s32 0, %v5776_v51  ;;  %v5785_v57 = vsub.s32 1, %v5776_v51 }
  0x8f   :  { %832 = vmatprep.subr.bf16.mxu0 %v4820_v56 }
  0x90   :  { %v235_v58 = vrot.slane %v230_v53, %v5782_v55 }
  0x91   :  { %765 = vmatmul.mubr.bf16.gmra.mxu0 %v128_v59  ;;  %818 = vmatmul.mubr.bf16.gmra.mxu1 %v130_v60  ;;  %v239_v60 = vrot.slane %v230_v53, %v5785_v57 }
  0x92   :  { %833 = vmatpush1.bf16.msra.mxu0 %v4818_v61  ;;  %860 = vmatprep.mubr.bf16.mxu0 %v127_v0  ;;  %v889_v0 = vld [vmem:[%s7524_s4] sm:$0x3] }
  0x93   :  { %834 = vmatprep.subr.bf16.mxu0 %v4823_v63 }
  0x96   :  { %835 = vmatpush1.bf16.msra.mxu0 %v4821_v1 }
  0x97   :  { %836 = vmatprep.subr.bf16.mxu0 %v4826_v2 }
  0x9a   :  { %837 = vmatpush1.bf16.msra.mxu0 %v4824_v3 }
  0x9b   :  { %838 = vmatprep.subr.bf16.mxu0 %v4829_v4 }
  0x9e   :  { %839 = vmatpush1.bf16.msra.mxu0 %v4827_v5 }
  0x9f   :  { %840 = vmatprep.subr.bf16.mxu0 %v4832_v6  ;;  %v894_v6 = vrot.slane %v889_v0, %v5782_v55 }
  0xa2   :  { %841 = vmatpush1.bf16.msra.mxu0 %v4830_v7 }
  0xa3   :  { %842 = vmatprep.subr.bf16.mxu0 %v4835_v8  ;;  %v898_v8 = vrot.slane %v889_v0, %v5785_v57 }
  0xa5   :  { %v924_v40 = vmul.f32 %v909_v34, %v898_v8 }
  0xa6   :  { %843 = vmatpush1.bf16.msra.mxu0 %v4833_v9  ;;  %v904_v9 = vpop.permute.xlu0 %903 }
  0xa7   :  { %844 = vmatprep.subr.bf16.mxu0 %v4838_v10 }
  0xaa   :  { %845 = vmatpush2.bf16.msra.mxu0 %v4836_v13  ;;  %v914_v43 = vpop.permute.xlu0 %913 }
  0xab   :  { %846 = vmatprep.subr.bf16.mxu0 %v4841_v14 }
  0xae   :  { %847 = vmatpush2.bf16.msra.mxu0 %v4839_v15 }
  0xaf   :  { %848 = vmatprep.subr.bf16.mxu0 %v4844_v16 }
  0xb2   :  { %849 = vmatpush2.bf16.msra.mxu0 %v4842_v17 }
  0xb3   :  { %850 = vmatprep.subr.bf16.mxu0 %v4847_v18 }
  0xb6   :  { %851 = vmatpush2.bf16.msra.mxu0 %v4845_v19 }
  0xb7   :  { %852 = vmatprep.subr.bf16.mxu0 %v4850_v20 }
  0xba   :  { %853 = vmatpush2.bf16.msra.mxu0 %v4848_v21  ;;  %v921_v21 = vmul.f32 %v904_v9, %v894_v6 }
  0xbb   :  { %854 = vmatprep.subr.bf16.mxu0 %v4853_v22 }
  0xbe   :  { %855 = vmatpush2.bf16.msra.mxu0 %v4851_v23 }
  0xbf   :  { %856 = vmatprep.subr.bf16.mxu0 %v4856_v24  ;;  %v922_v24 = vmul.f32 %v904_v9, %v898_v8 }
  0xc2   :  { %857 = vmatpush2.bf16.msra.mxu0 %v4854_v25 }
  0xc3   :  { %858 = vmatprep.subr.bf16.mxu0 %v4859_v27 }
  0xc6   :  { %859 = vmatpush2.bf16.msra.mxu0 %v4857_v32 }
  0xc9   :  { %861 = vmatmul.mubr.bf16.vlgmr.msra.gmra.mxu0 %v126_v38 }
  0xca   :  { %870 = vmatprep.mubr.bf16.mxu0 %v133_v39  ;;  %v923_v39 = vmul.f32 %v909_v34, %v894_v6 }
  0xd1   :  { %871 = vmatmul.mubr.bf16.gmra.mxu0 %v132_v44 }
 0x149   :  { %v756_v45 = vpop.f32.mrf.mxu0  ;;  %v809_v49 = vpop.f32.mrf.mxu1 }
 0x14a   :  { %v757_v62 = vadd.f32 %v756_v45, %v235_v58 }
 0x14b   :  { %v758_v46 = vpop.f32.mrf.mxu0  ;;  %v811_v54 = vpop.f32.mrf.mxu1 }
 0x14c   :  { %v759_v1 = vadd.f32 %v758_v46, %v239_v60  ;;  %v810_v4 = vadd.f32 %v809_v49, %v757_v62 }
 0x14d   :  { %v760_v47 = vpop.f32.mrf.mxu0  ;;  %v813_v59 = vpop.f32.mrf.mxu1 }
 0x14e   :  { %v761_v5 = vadd.f32 %v760_v47, %v235_v58  ;;  %v812_v10 = vadd.f32 %v811_v54, %v759_v1 }
 0x14f   :  { %v762_v50 = vpop.f32.mrf.mxu0  ;;  %v815_v63 = vpop.f32.mrf.mxu1 }
 0x150   :  { %v763_v13 = vadd.f32 %v762_v50, %v239_v60  ;;  %v814_v18 = vadd.f32 %v813_v59, %v761_v5 }
 0x151   :  { %v766_v52 = vpop.f32.mrf.mxu0  ;;  %v819_v2 = vpop.f32.mrf.mxu1 }
 0x152   :  { %v767_v15 = vadd.f32 %v766_v52, %v235_v58  ;;  %v816_v25 = vadd.f32 %v815_v63, %v763_v13  ;;  %v919_v63 = vpop.permute.xlu1 %918 }
 0x153   :  { %v768_v56 = vpop.f32.mrf.mxu0  ;;  %v821_v16 = vpop.f32.mrf.mxu1  ;;  %v927_v5 = vmul.f32 %v919_v63, %v894_v6 }
 0x154   :  { %v769_v22 = vadd.f32 %v768_v56, %v239_v60  ;;  %v820_v30 = vadd.f32 %v819_v2, %v767_v15  ;;  %v925_v56 = vmul.f32 %v914_v43, %v894_v6  ;;  %v1102_v15 = vld [vmem:[%s7525_s7 + $0x1c0] sm:$0xff]  ;;  %v1103_v6 = vld [vmem:[%s7525_s7 + $0x1c8] sm:$0xff] }
 0x155   :  { %v770_v61 = vpop.f32.mrf.mxu0  ;;  %v823_v32 = vpop.f32.mrf.mxu1 }
 0x156   :  { %v771_v31 = vadd.f32 %v770_v61, %v235_v58  ;;  %v822_v41 = vadd.f32 %v821_v16, %v769_v22  ;;  %v926_v58 = vmul.f32 %v914_v43, %v898_v8 }
 0x157   :  { %v772_v3 = vpop.f32.mrf.mxu0  ;;  %v825_v48 = vpop.f32.mrf.mxu1 }
 0x158   :  { %v773_v44 = vadd.f32 %v772_v3, %v239_v60  ;;  %v824_v47 = vadd.f32 %v823_v32, %v771_v31  ;;  %v1091_v31 = vld [vmem:[%s7525_s7 + $0x168] sm:$0xff] }
 0x15a   :  { %v826_v60 = vadd.f32 %v825_v48, %v773_v44  ;;  %v1075_v48 = vld [vmem:[%s7525_s7 + $0xe8] sm:$0xff] }
 0x189   :  { %v862_v7 = vpop.f32.mrf.mxu0 }
 0x18a   :  { %v863_v14 = vadd.f32 %v862_v7, %v810_v4  ;;  %v928_v7 = vmul.f32 %v919_v63, %v898_v8 }
 0x18b   :  { %v864_v17 = vpop.f32.mrf.mxu0 }
 0x18c   :  { %v881_v19 = vmul.f32 %v863_v14, %v5582_v11  ;;  %v865_v20 = vadd.f32 %v864_v17, %v812_v10  ;;  %v1107_v17 = vld [vmem:[%s7525_s7 + $0x1e8] sm:$0xff] }
 0x18d   :  { %v866_v23 = vpop.f32.mrf.mxu0 }
 0x18e   :  { %v882_v27 = vmul.f32 %v865_v20, %v5582_v11  ;;  %v867_v28 = vadd.f32 %v866_v23, %v814_v18  ;;  %v5796_v35 = vadd.f32 %v921_v21, %v881_v19  ;;  %v1094_v18 = vld [vmem:[%s7525_s7 + $0x180] sm:$0xff]  ;;  %v4419_v20 = vcombine.low %v1103_v6, %v1107_v17  ;;  %v1095_v23 = vld [vmem:[%s7525_s7 + $0x188] sm:$0xff] }
 0x18f   :  { %v868_v33 = vpop.f32.mrf.mxu0  ;;  %v1098_v19 = vld [vmem:[%s7525_s7 + $0x1a0] sm:$0xff]  ;;  %v4420_v21 = vcombine.high %v1103_v6, %v1107_v17 }
 0x190   :  { %v5798_v36 = vadd.f32 %v922_v24, %v882_v27  ;;  %v883_v37 = vmul.f32 %v867_v28, %v5621_v26  ;;  %v869_v38 = vadd.f32 %v868_v33, %v816_v25  ;;  %v4410_v22 = vcombine.high %v1094_v18, %v1098_v19  ;;  %v1099_v24 = vld [vmem:[%s7525_s7 + $0x1a8] sm:$0xff]  ;;  %v1086_v25 = vld [vmem:[%s7525_s7 + $0x140] sm:$0xff] }
 0x191   :  { %v872_v42 = vpop.f32.mrf.mxu0  ;;  %v4412_v27 = vcombine.high %v1095_v23, %v1099_v24  ;;  %v1090_v28 = vld [vmem:[%s7525_s7 + $0x160] sm:$0xff]  ;;  %1909 = vmatprep.subr.bf16.mxu0 %v4420_v21  ;;  %v4409_v32 = vcombine.low %v1094_v18, %v1098_v19  ;;  %v4411_v33 = vcombine.low %v1095_v23, %v1099_v24  ;;  %v1167_v23 = vld [vmem:[%s7525_s7 + $0x3c8] sm:$0xff] }
 0x192   :  { %v884_v11 = vmul.f32 %v869_v38, %v5621_v26  ;;  %v873_v45 = vadd.f32 %v872_v42, %v820_v30  ;;  %v937_v46 = vadd.f32 %v5798_v36, %v5796_v35  ;;  %v5804_v50 = vadd.f32 %v923_v39, %v883_v37  ;;  %v1087_v30 = vld [vmem:[%s7525_s7 + $0x148] sm:$0xff]  ;;  %1910 = vmatpush1.bf16.msra.mxu0 %v4419_v20  ;;  %v1078_v38 = vld [vmem:[%s7525_s7 + $0x100] sm:$0xff] }
 0x193   :  { %v874_v49 = vpop.f32.mrf.mxu0  ;;  %v4402_v34 = vcombine.high %v1086_v25, %v1090_v28  ;;  %1911 = vmatprep.subr.bf16.mxu0 %v4412_v27  ;;  %v4404_v37 = vcombine.high %v1087_v30, %v1091_v31  ;;  %v1082_v39 = vld [vmem:[%s7525_s7 + $0x120] sm:$0xff]  ;;  %v4401_v42 = vcombine.low %v1086_v25, %v1090_v28  ;;  %v4403_v43 = vcombine.low %v1087_v30, %v1091_v31  ;;  %v1171_v24 = vld [vmem:[%s7525_s7 + $0x3e8] sm:$0xff] }
 0x194   :  { %v5806_v52 = vadd.f32 %v924_v40, %v884_v11  ;;  %v885_v53 = vmul.f32 %v873_v45, %v5584_v12  ;;  %v875_v54 = vadd.f32 %v874_v49, %v822_v41  ;;  %938 = vadd.xlane.f32.xlu0 %v937_v46  ;;  %v1079_v40 = vld [vmem:[%s7525_s7 + $0x108] sm:$0xff]  ;;  %v4394_v44 = vcombine.high %v1078_v38, %v1082_v39  ;;  %v1070_v45 = vld [vmem:[%s7525_s7 + $0xc0] sm:$0xff] }
 0x195   :  { %v876_v59 = vpop.f32.mrf.mxu0  ;;  %v1083_v41 = vld [vmem:[%s7525_s7 + $0x128] sm:$0xff]  ;;  %v1074_v46 = vld [vmem:[%s7525_s7 + $0xe0] sm:$0xff]  ;;  %v4393_v49 = vcombine.low %v1078_v38, %v1082_v39  ;;  %v4484_v30 = vcombine.high %v1167_v23, %v1171_v24 }
 0x196   :  { %v886_v26 = vmul.f32 %v875_v54, %v5584_v12  ;;  %v877_v61 = vadd.f32 %v876_v59, %v824_v47  ;;  %v940_v62 = vadd.f32 %v5806_v52, %v5804_v50  ;;  %v5812_v1 = vadd.f32 %v925_v56, %v885_v53  ;;  %1912 = vmatpush1.bf16.msra.mxu0 %v4411_v33  ;;  %v1071_v47 = vld [vmem:[%s7525_s7 + $0xc8] sm:$0xff]  ;;  %v1066_v59 = vld [vmem:[%s7525_s7 + $0xa0] sm:$0xff] }
 0x197   :  { %v878_v0 = vpop.f32.mrf.mxu0  ;;  %1913 = vmatprep.subr.bf16.mxu0 %v4404_v37  ;;  %v4396_v11 = vcombine.high %v1079_v40, %v1083_v41  ;;  %v4395_v53 = vcombine.low %v1079_v40, %v1083_v41  ;;  %v4386_v54 = vcombine.high %v1070_v45, %v1074_v46  ;;  %v4388_v56 = vcombine.high %v1071_v47, %v1075_v48  ;;  %v1050_v6 = vld [vmem:[%s7525_s7 + $0x20] sm:$0xff] }
 0x198   :  { %v5814_v2 = vadd.f32 %v926_v58, %v886_v26  ;;  %v887_v3 = vmul.f32 %v877_v61, %v5625_v29  ;;  %v879_v4 = vadd.f32 %v878_v0, %v826_v60  ;;  %941 = vadd.xlane.f32.xlu1 %v940_v62  ;;  %v1062_v58 = vld [vmem:[%s7525_s7 + $0x80] sm:$0xff]  ;;  %v1063_v60 = vld [vmem:[%s7525_s7 + $0x88] sm:$0xff]  ;;  %v4385_v61 = vcombine.low %v1070_v45, %v1074_v46 }
 0x199   :  { %v1067_v26 = vld [vmem:[%s7525_s7 + $0xa8] sm:$0xff]  ;;  %v4387_v62 = vcombine.low %v1071_v47, %v1075_v48  ;;  %v4378_v63 = vcombine.high %v1062_v58, %v1066_v59  ;;  %v1166_v21 = vld [vmem:[%s7525_s7 + $0x3c0] sm:$0xff] }
 0x19a   :  { %v888_v9 = vmul.f32 %v879_v4, %v5625_v29  ;;  %v943_v12 = vadd.f32 %v5814_v2, %v5812_v1  ;;  %v5820_v10 = vadd.f32 %v927_v5, %v887_v3  ;;  %v1106_v29 = vld [vmem:[%s7525_s7 + $0x1e0] sm:$0xff]  ;;  %1914 = vmatpush1.bf16.msra.mxu0 %v4403_v43  ;;  %v4380_v0 = vcombine.high %v1063_v60, %v1067_v26  ;;  %v1055_v5 = vld [vmem:[%s7525_s7 + $0x48] sm:$0xff] }
 0x19b   :  { %v4417_v8 = vcombine.low %v1102_v15, %v1106_v29  ;;  %v4418_v16 = vcombine.high %v1102_v15, %v1106_v29  ;;  %1915 = vmatprep.subr.bf16.mxu0 %v4396_v11  ;;  %v1054_v3 = vld [vmem:[%s7525_s7 + $0x40] sm:$0xff] }
 0x19c   :  { %v5822_v13 = vadd.f32 %v928_v7, %v888_v9  ;;  %944 = vadd.xlane.f32.xlu0 %v943_v12  ;;  %v1058_v4 = vld [vmem:[%s7525_s7 + $0x60] sm:$0xff]  ;;  %v1059_v7 = vld [vmem:[%s7525_s7 + $0x68] sm:$0xff]  ;;  %v4377_v9 = vcombine.low %v1062_v58, %v1066_v59  ;;  %v4379_v12 = vcombine.low %v1063_v60, %v1067_v26 }
 0x19d   :  { %1856 = vmatprep.subr.bf16.mxu1 %v4418_v16  ;;  %v4372_v15 = vcombine.high %v1055_v5, %v1059_v7  ;;  %v1046_v29 = vld [vmem:[%s7525_s7] sm:$0xff]  ;;  %v1051_v16 = vld [vmem:[%s7525_s7 + $0x28] sm:$0xff]  ;;  %v4369_v17 = vcombine.low %v1054_v3, %v1058_v4  ;;  %v4371_v18 = vcombine.low %v1055_v5, %v1059_v7 }
 0x19e   :  { %v946_v14 = vadd.f32 %v5822_v13, %v5820_v10  ;;  %1857 = vmatpush1.bf16.msra.mxu1 %v4417_v8  ;;  %1916 = vmatpush1.bf16.msra.mxu0 %v4395_v53  ;;  %v1047_v8 = vld [vmem:[%s7525_s7 + $0x8] sm:$0xff]  ;;  %v4362_v19 = vcombine.high %v1046_v29, %v1050_v6  ;;  %v4361_v25 = vcombine.low %v1046_v29, %v1050_v6  ;;  %v1162_v5 = vld [vmem:[%s7525_s7 + $0x3a0] sm:$0xff] }
 0x19f   :  { %1858 = vmatprep.subr.bf16.mxu1 %v4410_v22  ;;  %1917 = vmatprep.subr.bf16.mxu0 %v4388_v56  ;;  %v4364_v20 = vcombine.high %v1047_v8, %v1051_v16  ;;  %v1170_v22 = vld [vmem:[%s7525_s7 + $0x3e0] sm:$0xff]  ;;  %v4363_v27 = vcombine.low %v1047_v8, %v1051_v16  ;;  %v1159_v7 = vld [vmem:[%s7525_s7 + $0x388] sm:$0xff] }
 0x1a0   :  { %947 = vadd.xlane.f32.xlu0 %v946_v14  ;;  %v4370_v14 = vcombine.high %v1054_v3, %v1058_v4  ;;  %v4482_v28 = vcombine.high %v1166_v21, %v1170_v22  ;;  %v4481_v31 = vcombine.low %v1166_v21, %v1170_v22  ;;  %v1158_v4 = vld [vmem:[%s7525_s7 + $0x380] sm:$0xff]  ;;  %v1151_v16 = vld [vmem:[%s7525_s7 + $0x348] sm:$0xff] }
 0x1a1   :  { %v1150_v6 = vld [vmem:[%s7525_s7 + $0x340] sm:$0xff] }
 0x1a2   :  { %1859 = vmatpush1.bf16.msra.mxu1 %v4409_v32  ;;  %1918 = vmatpush1.bf16.msra.mxu0 %v4387_v62  ;;  %v4483_v32 = vcombine.low %v1167_v23, %v1171_v24  ;;  %v1154_v8 = vld [vmem:[%s7525_s7 + $0x360] sm:$0xff]  ;;  %v1143_v24 = vld [vmem:[%s7525_s7 + $0x308] sm:$0xff] }
 0x1a3   :  { %1860 = vmatprep.subr.bf16.mxu1 %v4402_v34  ;;  %1919 = vmatprep.subr.bf16.mxu0 %v4380_v0  ;;  %v1142_v22 = vld [vmem:[%s7525_s7 + $0x300] sm:$0xff] }
 0x1a4   :  { %v1146_v23 = vld [vmem:[%s7525_s7 + $0x320] sm:$0xff] }
 0x1a6   :  { %1861 = vmatpush1.bf16.msra.mxu1 %v4401_v42  ;;  %1920 = vmatpush1.bf16.msra.mxu0 %v4379_v12  ;;  %v1163_v12 = vld [vmem:[%s7525_s7 + $0x3a8] sm:$0xff] }
 0x1a7   :  { %1862 = vmatprep.subr.bf16.mxu1 %v4394_v44  ;;  %1921 = vmatprep.subr.bf16.mxu0 %v4372_v15  ;;  %v4475_v15 = vcombine.low %v1159_v7, %v1163_v12  ;;  %v4476_v29 = vcombine.high %v1159_v7, %v1163_v12  ;;  %v1114_v7 = vld [vmem:[%s7525_s7 + $0x220] sm:$0xff] }
 0x1aa   :  { %1863 = vmatpush1.bf16.msra.mxu1 %v4393_v49  ;;  %1922 = vmatpush1.bf16.msra.mxu0 %v4371_v18  ;;  %v1155_v18 = vld [vmem:[%s7525_s7 + $0x368] sm:$0xff] }
 0x1ab   :  { %1864 = vmatprep.subr.bf16.mxu1 %v4386_v54  ;;  %1923 = vmatprep.subr.bf16.mxu0 %v4364_v20  ;;  %v4467_v20 = vcombine.low %v1151_v16, %v1155_v18  ;;  %v4468_v21 = vcombine.high %v1151_v16, %v1155_v18  ;;  %v6066_v18 = vld [vmem:[%s7525_s7 + $0x1f0] sm:$0xff] }
 0x1ae   :  { %1865 = vmatpush1.bf16.msra.mxu1 %v4385_v61  ;;  %1924 = vmatpush1.bf16.msra.mxu0 %v4363_v27  ;;  %v1147_v27 = vld [vmem:[%s7525_s7 + $0x328] sm:$0xff] }
 0x1af   :  { %1866 = vmatprep.subr.bf16.mxu1 %v4378_v63  ;;  %1925 = vmatprep.subr.bf16.mxu0 %v4484_v30  ;;  %v4459_v30 = vcombine.low %v1143_v24, %v1147_v27 }
 0x1b2   :  { %1867 = vmatpush1.bf16.msra.mxu1 %v4377_v9  ;;  %1926 = vmatpush2.bf16.msra.mxu0 %v4483_v32  ;;  %v4474_v9 = vcombine.high %v1158_v4, %v1162_v5  ;;  %v1134_v32 = vld [vmem:[%s7525_s7 + $0x2c0] sm:$0xff] }
 0x1b3   :  { %1868 = vmatprep.subr.bf16.mxu1 %v4370_v14  ;;  %v4473_v14 = vcombine.low %v1158_v4, %v1162_v5  ;;  %1927 = vmatprep.subr.bf16.mxu0 %v4476_v29  ;;  %v1123_v4 = vld [vmem:[%s7525_s7 + $0x268] sm:$0xff]  ;;  %v1110_v5 = vld [vmem:[%s7525_s7 + $0x200] sm:$0xff] }
 0x1b4   :  { %v1115_v29 = vld [vmem:[%s7525_s7 + $0x228] sm:$0xff] }
 0x1b6   :  { %1869 = vmatpush1.bf16.msra.mxu1 %v4369_v17  ;;  %1928 = vmatpush2.bf16.msra.mxu0 %v4475_v15  ;;  %v4466_v17 = vcombine.high %v1150_v6, %v1154_v8  ;;  %v1111_v15 = vld [vmem:[%s7525_s7 + $0x208] sm:$0xff] }
 0x1b7   :  { %1870 = vmatprep.subr.bf16.mxu1 %v4362_v19  ;;  %v4465_v19 = vcombine.low %v1150_v6, %v1154_v8  ;;  %1929 = vmatprep.subr.bf16.mxu0 %v4468_v21  ;;  %v4428_v6 = vcombine.high %v1111_v15, %v1115_v29  ;;  %v4425_v8 = vcombine.low %v1110_v5, %v1114_v7 }
 0x1b8   :  { %v4427_v16 = vcombine.low %v1111_v15, %v1115_v29 }
 0x1ba   :  { %1871 = vmatpush1.bf16.msra.mxu1 %v4361_v25  ;;  %1930 = vmatpush2.bf16.msra.mxu0 %v4467_v20  ;;  %v4458_v25 = vcombine.high %v1142_v22, %v1146_v23 }
 0x1bb   :  { %1872 = vmatprep.subr.bf16.mxu1 %v4482_v28  ;;  %v4457_v28 = vcombine.low %v1142_v22, %v1146_v23  ;;  %v6080_v22 = vld [vmem:[%s7525_s7 + $0x1f8] sm:$0xff] }
 0x1be   :  { %1873 = vmatpush2.bf16.msra.mxu1 %v4481_v31  ;;  %v4460_v31 = vcombine.high %v1143_v24, %v1147_v27 }
 0x1bf   :  { %1874 = vmatprep.subr.bf16.mxu1 %v4474_v9 }
 0x1c0   :  { %1931 = vmatprep.subr.bf16.mxu0 %v4460_v31 }
 0x1c1   :  { %1932 = vmatpush2.bf16.msra.mxu0 %v4459_v30 }
 0x1c2   :  { %1875 = vmatpush2.bf16.msra.mxu1 %v4473_v14  ;;  %v4426_v14 = vcombine.high %v1110_v5, %v1114_v7  ;;  %v1096_v7 = vld [vmem:[%s7525_s7 + $0x190] sm:$0xff] }
 0x1c3   :  { %1876 = vmatprep.subr.bf16.mxu1 %v4466_v17  ;;  %v6061_v17 = vld [vmem:[%s7525_s7 + $0x1d0] sm:$0xff] }
 0x1c4   :  { %v4421_v20 = vcombine.low %v6061_v17, %v6066_v18  ;;  %v4422_v21 = vcombine.high %v6061_v17, %v6066_v18  ;;  %v1080_v17 = vld [vmem:[%s7525_s7 + $0x110] sm:$0xff] }
 0x1c6   :  { %1877 = vmatpush2.bf16.msra.mxu1 %v4465_v19  ;;  %v6071_v19 = vld [vmem:[%s7525_s7 + $0x1d8] sm:$0xff] }
 0x1c7   :  { %1878 = vmatprep.subr.bf16.mxu1 %v4458_v25  ;;  %v4423_v23 = vcombine.low %v6071_v19, %v6080_v22  ;;  %v4424_v24 = vcombine.high %v6071_v19, %v6080_v22  ;;  %v1084_v19 = vld [vmem:[%s7525_s7 + $0x130] sm:$0xff]  ;;  %v1085_v22 = vld [vmem:[%s7525_s7 + $0x138] sm:$0xff] }
 0x1ca   :  { %1879 = vmatpush2.bf16.msra.mxu1 %v4457_v28 }
 0x21d   :  { %v939_v33 = vpop.xlane.xlu0 %938 }
 0x21e   :  { %v950_v34 = vmul.f32 0.00390625, %v939_v33  ;;  %v1138_v33 = vld [vmem:[%s7525_s7 + $0x2e0] sm:$0xff] }
 0x220   :  { %v5935_v37 = vsub.f32 %v5796_v35, %v950_v34  ;;  %v5938_v38 = vsub.f32 %v5798_v36, %v950_v34  ;;  %v1135_v34 = vld [vmem:[%s7525_s7 + $0x2c8] sm:$0xff] }
 0x221   :  { %v942_v39 = vpop.xlane.xlu1 %941 }
 0x222   :  { %v951_v40 = vmul.f32 0.00390625, %v942_v39  ;;  %v962_v41 = vmul.f32 %v5935_v37, %v5935_v37  ;;  %v963_v42 = vmul.f32 %v5938_v38, %v5938_v38  ;;  %v4450_v39 = vcombine.high %v1134_v32, %v1138_v33 }
 0x224   :  { %v5945_v43 = vsub.f32 %v5804_v50, %v951_v40  ;;  %v5948_v44 = vsub.f32 %v5806_v52, %v951_v40  ;;  %v970_v11 = vadd.f32 %v963_v42, %v962_v41  ;;  %v1139_v40 = vld [vmem:[%s7525_s7 + $0x2e8] sm:$0xff]  ;;  %v4449_v41 = vcombine.low %v1134_v32, %v1138_v33  ;;  %1880 = vmatprep.subr.bf16.mxu1 %v4450_v39 }
 0x225   :  { %v945_v45 = vpop.xlane.xlu0 %944  ;;  %v4451_v42 = vcombine.low %v1135_v34, %v1139_v40 }
 0x226   :  { %v952_v46 = vmul.f32 0.00390625, %v945_v45  ;;  %971 = vadd.xlane.f32.xlu1 %v970_v11  ;;  %v964_v47 = vmul.f32 %v5945_v43, %v5945_v43  ;;  %v965_v48 = vmul.f32 %v5948_v44, %v5948_v44  ;;  %v4452_v11 = vcombine.high %v1135_v34, %v1139_v40  ;;  %1881 = vmatpush2.bf16.msra.mxu1 %v4449_v41  ;;  %v1126_v45 = vld [vmem:[%s7525_s7 + $0x280] sm:$0xff] }
 0x228   :  { %v5955_v49 = vsub.f32 %v5812_v1, %v952_v46  ;;  %v5958_v53 = vsub.f32 %v5814_v2, %v952_v46  ;;  %v973_v54 = vadd.f32 %v965_v48, %v964_v47  ;;  %1933 = vmatprep.subr.bf16.mxu0 %v4452_v11  ;;  %v1130_v46 = vld [vmem:[%s7525_s7 + $0x2a0] sm:$0xff]  ;;  %v1127_v47 = vld [vmem:[%s7525_s7 + $0x288] sm:$0xff] }
 0x229   :  { %v948_v56 = vpop.xlane.xlu0 %947  ;;  %1934 = vmatpush2.bf16.msra.mxu0 %v4451_v42  ;;  %v4442_v48 = vcombine.high %v1126_v45, %v1130_v46  ;;  %v1002_v42 = vld [vmem:[%s7527_s5] sm:$0x3] }
 0x22a   :  { %v953_v58 = vmul.f32 0.00390625, %v948_v56  ;;  %974 = vadd.xlane.f32.xlu0 %v973_v54  ;;  %v966_v59 = vmul.f32 %v5955_v49, %v5955_v49  ;;  %v967_v60 = vmul.f32 %v5958_v53, %v5958_v53  ;;  %v1131_v54 = vld [vmem:[%s7525_s7 + $0x2a8] sm:$0xff]  ;;  %v4441_v56 = vcombine.low %v1126_v45, %v1130_v46  ;;  %v1022_v45 = vld [vmem:[%s7528_s6] sm:$0x3] }
 0x22b   :  { %1882 = vmatprep.subr.bf16.mxu1 %v4442_v48  ;;  %v1011_v48 = vrot.slane %v1002_v42, %v5785_v57 }
 0x22c   :  { %v5965_v26 = vsub.f32 %v5820_v10, %v953_v58  ;;  %v5968_v61 = vsub.f32 %v5822_v13, %v953_v58  ;;  %v976_v62 = vadd.f32 %v967_v60, %v966_v59  ;;  %v4443_v58 = vcombine.low %v1127_v47, %v1131_v54  ;;  %v1118_v60 = vld [vmem:[%s7525_s7 + $0x240] sm:$0xff]  ;;  %1883 = vmatpush2.bf16.msra.mxu1 %v4441_v56 }
 0x22d   :  { %v4444_v59 = vcombine.high %v1127_v47, %v1131_v54  ;;  %v1007_v47 = vrot.slane %v1002_v42, %v5782_v55 }
 0x22e   :  { %977 = vadd.xlane.f32.xlu1 %v976_v62  ;;  %v968_v63 = vmul.f32 %v5965_v26, %v5965_v26  ;;  %v969_v0 = vmul.f32 %v5968_v61, %v5968_v61  ;;  %v1122_v62 = vld [vmem:[%s7525_s7 + $0x260] sm:$0xff] }
 0x22f   :  { %1935 = vmatprep.subr.bf16.mxu0 %v4444_v59 }
 0x230   :  { %v979_v3 = vadd.f32 %v969_v0, %v968_v63  ;;  %v1119_v63 = vld [vmem:[%s7525_s7 + $0x248] sm:$0xff]  ;;  %v4433_v0 = vcombine.low %v1118_v60, %v1122_v62  ;;  %1936 = vmatpush2.bf16.msra.mxu0 %v4443_v58 }
 0x231   :  { %v4435_v9 = vcombine.low %v1119_v63, %v1123_v4  ;;  %v4436_v12 = vcombine.high %v1119_v63, %v1123_v4 }
 0x232   :  { %980 = vadd.xlane.f32.xlu0 %v979_v3  ;;  %v4434_v3 = vcombine.high %v1118_v60, %v1122_v62  ;;  %v1027_v60 = vrot.slane %v1022_v45, %v5782_v55  ;;  %v1031_v62 = vrot.slane %v1022_v45, %v5785_v57 }
 0x233   :  { %1937 = vmatprep.subr.bf16.mxu0 %v4436_v12 }
 0x234   :  { %1884 = vmatprep.subr.bf16.mxu1 %v4434_v3  ;;  %1938 = vmatpush2.bf16.msra.mxu0 %v4435_v9 }
 0x235   :  { %1885 = vmatpush2.bf16.msra.mxu1 %v4433_v0  ;;  %1939 = vmatprep.subr.bf16.mxu0 %v4428_v6 }
 0x236   :  { %1886 = vmatprep.subr.bf16.mxu1 %v4426_v14 }
 0x238   :  { %1940 = vmatpush2.bf16.msra.mxu0 %v4427_v16 }
 0x239   :  { %1887 = vmatpush2.bf16.msra.mxu1 %v4425_v8  ;;  %2015 = vmatprep.subr.bf16.mxu0 %v4424_v24 }
 0x23a   :  { %1962 = vmatprep.subr.bf16.mxu1 %v4422_v21 }
 0x2af   :  { %v972_v25 = vpop.xlane.xlu1 %971 }
 0x2b0   :  { %v982_v27 = vmul.f32 0.00390625, %v972_v25 }
 0x2b2   :  { %v986_v28 = vadd.f32 1e-06, %v982_v27 }
 0x2b3   :  { %v975_v30 = vpop.xlane.xlu0 %974 }
 0x2b4   :  { %5196 = vrsqrt.f32 %v986_v28  ;;  %v983_v31 = vmul.f32 0.00390625, %v975_v30  ;;  %v1088_v28 = vld [vmem:[%s7525_s7 + $0x150] sm:$0xff] }
 0x2b6   :  { %v987_v32 = vadd.f32 1e-06, %v983_v31  ;;  %v1093_v31 = vld [vmem:[%s7525_s7 + $0x178] sm:$0xff] }
 0x2b7   :  { %v978_v33 = vpop.xlane.xlu1 %977 }
 0x2b8   :  { %5198 = vrsqrt.f32 %v987_v32  ;;  %v984_v34 = vmul.f32 0.00390625, %v978_v33 }
 0x2ba   :  { %v988_v39 = vadd.f32 1e-06, %v984_v34 }
 0x2bb   :  { %v981_v40 = vpop.xlane.xlu0 %980 }
 0x2bc   :  { %5200 = vrsqrt.f32 %v988_v39  ;;  %v985_v41 = vmul.f32 0.00390625, %v981_v40 }
 0x2be   :  { %v989_v11 = vadd.f32 1e-06, %v985_v41 }
 0x2c0   :  { %5202 = vrsqrt.f32 %v989_v11 }
 0x2c1   :  { %v5197_v46 = vpop.eup %5196 }
 0x2c2   :  { %v994_v54 = vmul.f32 %v5197_v46, %v5935_v37  ;;  %v995_v56 = vmul.f32 %v5197_v46, %v5938_v38  ;;  %v1100_v37 = vld [vmem:[%s7525_s7 + $0x1b0] sm:$0xff]  ;;  %v1097_v38 = vld [vmem:[%s7525_s7 + $0x198] sm:$0xff] }
 0x2c3   :  { %v4414_v24 = vcombine.high %v1096_v7, %v1100_v37 }
 0x2c4   :  { %v1015_v59 = vmul.f32 %v1011_v48, %v995_v56  ;;  %v1014_v63 = vmul.f32 %v1007_v47, %v994_v54  ;;  %v1072_v54 = vld [vmem:[%s7525_s7 + $0xd0] sm:$0xff]  ;;  %v4398_v56 = vcombine.high %v1080_v17, %v1084_v19 }
 0x2c5   :  { %v5199_v58 = vpop.eup %5198 }
 0x2c6   :  { %v996_v0 = vmul.f32 %v5199_v58, %v5945_v43  ;;  %v997_v3 = vmul.f32 %v5199_v58, %v5948_v44  ;;  %v1101_v43 = vld [vmem:[%s7525_s7 + $0x1b8] sm:$0xff]  ;;  %v1035_v44 = vadd.f32 %v1031_v62, %v1015_v59  ;;  %v1034_v12 = vadd.f32 %v1027_v60, %v1014_v63  ;;  %v1076_v59 = vld [vmem:[%s7525_s7 + $0xf0] sm:$0xff] }
 0x2c7   :  { %v4416_v25 = vcombine.high %v1097_v38, %v1101_v43  ;;  %v4415_v34 = vcombine.low %v1097_v38, %v1101_v43  ;;  %v4397_v63 = vcombine.low %v1080_v17, %v1084_v19  ;;  %v1069_v38 = vld [vmem:[%s7525_s7 + $0xb8] sm:$0xff]  ;;  %v4389_v43 = vcombine.low %v1072_v54, %v1076_v59 }
 0x2c8   :  { %v1017_v4 = vmul.f32 %v1011_v48, %v997_v3  ;;  %v1016_v5 = vmul.f32 %v1007_v47, %v996_v0  ;;  %v4390_v3 = vcombine.high %v1072_v54, %v1076_v59  ;;  %v1161_v17 = vld [vmem:[%s7525_s7 + $0x398] sm:$0xff]  ;;  %v1152_v54 = vld [vmem:[%s7525_s7 + $0x350] sm:$0xff] }
 0x2c9   :  { %v5201_v9 = vpop.eup %5200  ;;  %v1157_v59 = vld [vmem:[%s7525_s7 + $0x378] sm:$0xff] }
 0x2ca   :  { %v1037_v14 = vadd.f32 %v1031_v62, %v1017_v4  ;;  %v1036_v15 = vadd.f32 %v1027_v60, %v1016_v5  ;;  %v999_v29 = vmul.f32 %v5201_v9, %v5958_v53  ;;  %v998_v6 = vmul.f32 %v5201_v9, %v5955_v49  ;;  %v1092_v53 = vld [vmem:[%s7525_s7 + $0x170] sm:$0xff]  ;;  %v1089_v49 = vld [vmem:[%s7525_s7 + $0x158] sm:$0xff] }
 0x2cb   :  { %v4408_v41 = vcombine.high %v1089_v49, %v1093_v31  ;;  %v4405_v18 = vcombine.low %v1088_v28, %v1092_v53  ;;  %v1064_v5 = vld [vmem:[%s7525_s7 + $0x90] sm:$0xff] }
 0x2cc   :  { %v1043_v8 = vpack.c.bf16 %v1037_v14, %v1035_v44  ;;  %v6114_v16 = vpack.c.bf16 %v1036_v15, %v1034_v12  ;;  %v1019_v27 = vmul.f32 %v1011_v48, %v999_v29  ;;  %v1018_v33 = vmul.f32 %v1007_v47, %v998_v6  ;;  %v1056_v14 = vld [vmem:[%s7525_s7 + $0x50] sm:$0xff]  ;;  %v1057_v29 = vld [vmem:[%s7525_s7 + $0x58] sm:$0xff] }
 0x2cd   :  { %v5203_v21 = vpop.eup %5202  ;;  %v1060_v15 = vld [vmem:[%s7525_s7 + $0x70] sm:$0xff]  ;;  %v1061_v6 = vld [vmem:[%s7525_s7 + $0x78] sm:$0xff] }
 0x2ce   :  { %1888 = vmatprep.mubr.bf16.mxu1 %v1043_v8  ;;  %1941 = vmatprep.mubr.bf16.mxu0 %v1043_v8  ;;  %v1001_v30 = vmul.f32 %v5203_v21, %v5968_v61  ;;  %v1000_v32 = vmul.f32 %v5203_v21, %v5965_v26  ;;  %v4413_v61 = vcombine.low %v1096_v7, %v1100_v37  ;;  %v1068_v7 = vld [vmem:[%s7525_s7 + $0xb0] sm:$0xff]  ;;  %v1065_v37 = vld [vmem:[%s7525_s7 + $0x98] sm:$0xff] }
 0x2cf   :  { %1889 = vmatmul.mubr.bf16.vlgmr.msra.gmra.mxu1 %v6114_v16  ;;  %1942 = vmatmul.mubr.bf16.vlgmr.msra.gmra.mxu0 %v6114_v16  ;;  %v4406_v26 = vcombine.high %v1088_v28, %v1092_v53  ;;  %v1039_v42 = vadd.f32 %v1031_v62, %v1019_v27  ;;  %v1038_v45 = vadd.f32 %v1027_v60, %v1018_v33  ;;  %v1048_v27 = vld [vmem:[%s7525_s7 + $0x10] sm:$0xff]  ;;  %v1053_v53 = vld [vmem:[%s7525_s7 + $0x38] sm:$0xff] }
 0x2d0   :  { %1963 = vmatpush1.bf16.msra.mxu1 %v4421_v20  ;;  %2016 = vmatpush1.bf16.msra.mxu0 %v4423_v23  ;;  %v1021_v39 = vmul.f32 %v1011_v48, %v1001_v30  ;;  %v1020_v40 = vmul.f32 %v1007_v47, %v1000_v32  ;;  %v1081_v20 = vld [vmem:[%s7525_s7 + $0x118] sm:$0xff]  ;;  %v4407_v47 = vcombine.low %v1089_v49, %v1093_v31  ;;  %v1052_v28 = vld [vmem:[%s7525_s7 + $0x30] sm:$0xff] }
 0x2d1   :  { %1964 = vmatprep.subr.bf16.mxu1 %v4414_v24  ;;  %2017 = vmatprep.subr.bf16.mxu0 %v4416_v25  ;;  %v4400_v58 = vcombine.high %v1081_v20, %v1085_v22  ;;  %v4399_v0 = vcombine.low %v1081_v20, %v1085_v22  ;;  %v4382_v44 = vcombine.high %v1064_v5, %v1068_v7  ;;  %v1049_v30 = vld [vmem:[%s7525_s7 + $0x18] sm:$0xff] }
 0x2d2   :  { %v1041_v11 = vadd.f32 %v1031_v62, %v1021_v39  ;;  %v1040_v46 = vadd.f32 %v1027_v60, %v1020_v40  ;;  %v1073_v60 = vld [vmem:[%s7525_s7 + $0xd8] sm:$0xff]  ;;  %v4384_v12 = vcombine.high %v1065_v37, %v1069_v38  ;;  %v4383_v21 = vcombine.low %v1065_v37, %v1069_v38 }
 0x2d3   :  { %v1077_v62 = vld [vmem:[%s7525_s7 + $0xf8] sm:$0xff]  ;;  %v4374_v24 = vcombine.high %v1056_v14, %v1060_v15  ;;  %v4376_v25 = vcombine.high %v1057_v29, %v1061_v6  ;;  %v4373_v49 = vcombine.low %v1056_v14, %v1060_v15  ;;  %v4375_v31 = vcombine.low %v1057_v29, %v1061_v6 }
 0x2d4   :  { %1965 = vmatpush1.bf16.msra.mxu1 %v4413_v61  ;;  %2018 = vmatpush1.bf16.msra.mxu0 %v4415_v34  ;;  %v6150_v23 = vpack.c.bf16 %v1041_v11, %v1039_v42  ;;  %v6152_v48 = vpack.c.bf16 %v1040_v46, %v1038_v45  ;;  %v4392_v4 = vcombine.high %v1073_v60, %v1077_v62  ;;  %v1168_v61 = vld [vmem:[%s7525_s7 + $0x3d0] sm:$0xff]  ;;  %v1169_v39 = vld [vmem:[%s7525_s7 + $0x3d8] sm:$0xff] }
 0x2d5   :  { %1966 = vmatprep.subr.bf16.mxu1 %v4406_v26  ;;  %2019 = vmatprep.subr.bf16.mxu0 %v4408_v41  ;;  %v4391_v9 = vcombine.low %v1073_v60, %v1077_v62  ;;  %v4366_v32 = vcombine.high %v1048_v27, %v1052_v28  ;;  %v4368_v33 = vcombine.high %v1049_v30, %v1053_v53  ;;  %v1172_v34 = vld [vmem:[%s7525_s7 + $0x3f0] sm:$0xff]  ;;  %v1173_v40 = vld [vmem:[%s7525_s7 + $0x3f8] sm:$0xff] }
 0x2d6   :  { %1898 = vmatprep.mubr.bf16.mxu1 %v6150_v23  ;;  %1951 = vmatprep.mubr.bf16.mxu0 %v6150_v23  ;;  %v4365_v26 = vcombine.low %v1048_v27, %v1052_v28  ;;  %v4367_v41 = vcombine.low %v1049_v30, %v1053_v53  ;;  %v4486_v42 = vcombine.high %v1168_v61, %v1172_v34  ;;  %v1160_v45 = vld [vmem:[%s7525_s7 + $0x390] sm:$0xff]  ;;  %v1137_v14 = vld [vmem:[%s7525_s7 + $0x2d8] sm:$0xff] }
 0x2d7   :  { %1899 = vmatmul.mubr.bf16.gmra.mxu1 %v6152_v48  ;;  %1952 = vmatmul.mubr.bf16.gmra.mxu0 %v6152_v48  ;;  %v4488_v11 = vcombine.high %v1169_v39, %v1173_v40  ;;  %v1164_v46 = vld [vmem:[%s7525_s7 + $0x3b0] sm:$0xff]  ;;  %v4485_v19 = vcombine.low %v1168_v61, %v1172_v34  ;;  %v4487_v20 = vcombine.low %v1169_v39, %v1173_v40  ;;  %v1141_v15 = vld [vmem:[%s7525_s7 + $0x2f8] sm:$0xff] }
 0x2d8   :  { %1967 = vmatpush1.bf16.msra.mxu1 %v4405_v18  ;;  %2020 = vmatpush1.bf16.msra.mxu0 %v4407_v47  ;;  %v1165_v18 = vld [vmem:[%s7525_s7 + $0x3b8] sm:$0xff]  ;;  %v4478_v22 = vcombine.high %v1160_v45, %v1164_v46  ;;  %v4477_v60 = vcombine.low %v1160_v45, %v1164_v46  ;;  %v4455_v53 = vcombine.low %v1137_v14, %v1141_v15 }
 0x2d9   :  { %1994 = vmatprep.mubr.bf16.mxu1 %v1043_v8  ;;  %2047 = vmatprep.mubr.bf16.mxu0 %v1043_v8  ;;  %v4381_v8 = vcombine.low %v1064_v5, %v1068_v7  ;;  %v4480_v47 = vcombine.high %v1161_v17, %v1165_v18  ;;  %v4479_v62 = vcombine.low %v1161_v17, %v1165_v18  ;;  %v1145_v5 = vld [vmem:[%s7525_s7 + $0x318] sm:$0xff] }
 0x2da   :  { %1968 = vmatprep.subr.bf16.mxu1 %v4398_v56  ;;  %2021 = vmatprep.subr.bf16.mxu0 %v4400_v58  ;;  %v1156_v56 = vld [vmem:[%s7525_s7 + $0x370] sm:$0xff]  ;;  %v1153_v58 = vld [vmem:[%s7525_s7 + $0x358] sm:$0xff] }
 0x2db   :  { %v1149_v7 = vld [vmem:[%s7525_s7 + $0x338] sm:$0xff]  ;;  %v4469_v37 = vcombine.low %v1152_v54, %v1156_v56  ;;  %v4471_v38 = vcombine.low %v1153_v58, %v1157_v59 }
 0x2dc   :  { %1969 = vmatpush1.bf16.msra.mxu1 %v4397_v63  ;;  %2022 = vmatpush1.bf16.msra.mxu0 %v4399_v0  ;;  %v4470_v63 = vcombine.high %v1152_v54, %v1156_v56  ;;  %v4472_v0 = vcombine.high %v1153_v58, %v1157_v59  ;;  %v4463_v6 = vcombine.low %v1145_v5, %v1149_v7  ;;  %v1129_v27 = vld [vmem:[%s7525_s7 + $0x298] sm:$0xff] }
 0x2dd   :  { %1970 = vmatprep.subr.bf16.mxu1 %v4390_v3  ;;  %2023 = vmatprep.subr.bf16.mxu0 %v4392_v4  ;;  %v1144_v3 = vld [vmem:[%s7525_s7 + $0x310] sm:$0xff]  ;;  %v1133_v28 = vld [vmem:[%s7525_s7 + $0x2b8] sm:$0xff] }
 0x2de   :  { %v1148_v4 = vld [vmem:[%s7525_s7 + $0x330] sm:$0xff]  ;;  %v1121_v61 = vld [vmem:[%s7525_s7 + $0x258] sm:$0xff]  ;;  %v4447_v40 = vcombine.low %v1129_v27, %v1133_v28 }
 0x2df   :  { %v4461_v29 = vcombine.low %v1144_v3, %v1148_v4  ;;  %v1125_v34 = vld [vmem:[%s7525_s7 + $0x278] sm:$0xff] }
 0x2e0   :  { %1971 = vmatpush1.bf16.msra.mxu1 %v4389_v43  ;;  %2024 = vmatpush1.bf16.msra.mxu0 %v4391_v9  ;;  %v4462_v43 = vcombine.high %v1144_v3, %v1148_v4  ;;  %v4464_v9 = vcombine.high %v1145_v5, %v1149_v7  ;;  %v1113_v45 = vld [vmem:[%s7525_s7 + $0x218] sm:$0xff]  ;;  %v4439_v18 = vcombine.low %v1121_v61, %v1125_v34  ;;  %v4880_v5 = vld [vmem:[%s7526_s9 + $0x44] ss:$8 sps:$4 sm:$0xff]  }
 0x2e1   :  { %1972 = vmatprep.subr.bf16.mxu1 %v4382_v44  ;;  %2025 = vmatprep.subr.bf16.mxu0 %v4384_v12  ;;  %v1136_v44 = vld [vmem:[%s7525_s7 + $0x2d0] sm:$0xff]  ;;  %v1117_v46 = vld [vmem:[%s7525_s7 + $0x238] sm:$0xff]  ;;  %v4883_v7 = vld [vmem:[%s7526_s9 + $0x144] ss:$8 sps:$4 sm:$0xff]  }
 0x2e2   :  { %v1140_v12 = vld [vmem:[%s7525_s7 + $0x2f0] sm:$0xff] }
 0x2e3   :  { %v4453_v30 = vcombine.low %v1136_v44, %v1140_v12  ;;  %v4862_v54 = vld [vmem:[%s7526_s9 + $0x74] ss:$8 sps:$4 sm:$0xff]   ;;  %v4860_v58 = vld [vmem:[%s7526_s9 + $0x70] ss:$8 sps:$4 sm:$0xff]  }
 0x2e4   :  { %1973 = vmatpush1.bf16.msra.mxu1 %v4381_v8  ;;  %2026 = vmatpush1.bf16.msra.mxu0 %v4383_v21  ;;  %v4454_v8 = vcombine.high %v1136_v44, %v1140_v12  ;;  %v4456_v21 = vcombine.high %v1137_v14, %v1141_v15  ;;  %v4865_v56 = vld [vmem:[%s7526_s9 + $0x174] ss:$8 sps:$4 sm:$0xff]   ;;  %v4863_v59 = vld [vmem:[%s7526_s9 + $0x170] ss:$8 sps:$4 sm:$0xff]   ;;  %v4892_v12 = vld [vmem:[%s7526_s9 + $0x24] ss:$8 sps:$4 sm:$0xff]  }
 0x2e5   :  { %1974 = vmatprep.subr.bf16.mxu1 %v4374_v24  ;;  %2027 = vmatprep.subr.bf16.mxu0 %v4376_v25  ;;  %v1128_v24 = vld [vmem:[%s7525_s7 + $0x290] sm:$0xff]  ;;  %v4895_v14 = vld [vmem:[%s7526_s9 + $0x124] ss:$8 sps:$4 sm:$0xff]   ;;  %v4890_v15 = vld [vmem:[%s7526_s9 + $0x20] ss:$8 sps:$4 sm:$0xff]  }
 0x2e6   :  { %v1132_v25 = vld [vmem:[%s7525_s7 + $0x2b0] sm:$0xff] }
 0x2e7   :  { %v4445_v39 = vcombine.low %v1128_v24, %v1132_v25  ;;  %v4872_v3 = vld [vmem:[%s7526_s9 + $0x50] ss:$8 sps:$4 sm:$0xff]  }
 0x2e8   :  { %1975 = vmatpush1.bf16.msra.mxu1 %v4373_v49  ;;  %2028 = vmatpush1.bf16.msra.mxu0 %v4375_v31  ;;  %v4446_v49 = vcombine.high %v1128_v24, %v1132_v25  ;;  %v4448_v31 = vcombine.high %v1129_v27, %v1133_v28  ;;  %v4875_v4 = vld [vmem:[%s7526_s9 + $0x150] ss:$8 sps:$4 sm:$0xff]   ;;  %v4904_v25 = vld [vmem:[%s7526_s9 + $0x4] ss:$8 sps:$4 sm:$0xff]   ;;  %v4902_v28 = vld [vmem:[%s7526_s9] ss:$8 sps:$4 sm:$0xff]  }
 0x2e9   :  { %1976 = vmatprep.subr.bf16.mxu1 %v4366_v32  ;;  %2029 = vmatprep.subr.bf16.mxu0 %v4368_v33  ;;  %v1120_v32 = vld [vmem:[%s7525_s7 + $0x250] sm:$0xff]  ;;  %v4907_v27 = vld [vmem:[%s7526_s9 + $0x104] ss:$8 sps:$4 sm:$0xff]  }
 0x2ea   :  { %v1124_v33 = vld [vmem:[%s7525_s7 + $0x270] sm:$0xff] }
 0x2eb   :  { %v4437_v17 = vcombine.low %v1120_v32, %v1124_v33  ;;  %v4887_v44 = vld [vmem:[%s7526_s9 + $0x130] ss:$8 sps:$4 sm:$0xff]  }
 0x2ec   :  { %1977 = vmatpush1.bf16.msra.mxu1 %v4365_v26  ;;  %2030 = vmatpush1.bf16.msra.mxu0 %v4367_v41  ;;  %v4438_v26 = vcombine.high %v1120_v32, %v1124_v33  ;;  %v4440_v41 = vcombine.high %v1121_v61, %v1125_v34  ;;  %v4899_v24 = vld [vmem:[%s7526_s9 + $0x110] ss:$8 sps:$4 sm:$0xff]   ;;  %v4916_v33 = vld [vmem:[%s7526_s9 + $0xe4] ss:$8 sps:$4 sm:$0xff]   ;;  %v4914_v34 = vld [vmem:[%s7526_s9 + $0xe0] ss:$8 sps:$4 sm:$0xff]  }
 0x2ed   :  { %1978 = vmatprep.subr.bf16.mxu1 %v4486_v42  ;;  %2031 = vmatprep.subr.bf16.mxu0 %v4488_v11  ;;  %v1112_v42 = vld [vmem:[%s7525_s7 + $0x210] sm:$0xff]  ;;  %v4919_v61 = vld [vmem:[%s7526_s9 + $0x1e4] ss:$8 sps:$4 sm:$0xff]  }
 0x2ee   :  { %v1116_v11 = vld [vmem:[%s7525_s7 + $0x230] sm:$0xff] }
 0x2ef   :  { %v4911_v32 = vld [vmem:[%s7526_s9 + $0x1f0] ss:$8 sps:$4 sm:$0xff]  }
 0x2f0   :  { %1979 = vmatpush2.bf16.msra.mxu1 %v4485_v19  ;;  %2032 = vmatpush2.bf16.msra.mxu0 %v4487_v20  ;;  %v4430_v19 = vcombine.high %v1112_v42, %v1116_v11  ;;  %v4432_v20 = vcombine.high %v1113_v45, %v1117_v46 }
 0x2f1   :  { %1980 = vmatprep.subr.bf16.mxu1 %v4478_v22  ;;  %2033 = vmatprep.subr.bf16.mxu0 %v4480_v47  ;;  %v4429_v22 = vcombine.low %v1112_v42, %v1116_v11  ;;  %v4431_v47 = vcombine.low %v1113_v45, %v1117_v46  ;;  %v4923_v42 = vld [vmem:[%s7526_s9 + $0x1d0] ss:$8 sps:$4 sm:$0xff]   ;;  %v4928_v11 = vld [vmem:[%s7526_s9 + $0xc4] ss:$8 sps:$4 sm:$0xff]   ;;  %v4926_v46 = vld [vmem:[%s7526_s9 + $0xc0] ss:$8 sps:$4 sm:$0xff]  }
 0x2f2   :  { %v4931_v45 = vld [vmem:[%s7526_s9 + $0x1c4] ss:$8 sps:$4 sm:$0xff]  }
 0x2f4   :  { %1981 = vmatpush2.bf16.msra.mxu1 %v4477_v60  ;;  %2034 = vmatpush2.bf16.msra.mxu0 %v4479_v62  ;;  %v4868_v60 = vld [vmem:[%s7526_s9 + $0x64] ss:$8 sps:$4 sm:$0xff]  }
 0x2f5   :  { %1982 = vmatprep.subr.bf16.mxu1 %v4470_v63  ;;  %2035 = vmatprep.subr.bf16.mxu0 %v4472_v0  ;;  %v4871_v62 = vld [vmem:[%s7526_s9 + $0x164] ss:$8 sps:$4 sm:$0xff]   ;;  %v4866_v63 = vld [vmem:[%s7526_s9 + $0x60] ss:$8 sps:$4 sm:$0xff]  }
 0x2f6   :  { %v4869_v0 = vld [vmem:[%s7526_s9 + $0x160] ss:$8 sps:$4 sm:$0xff]  }
 0x2f8   :  { %1983 = vmatpush2.bf16.msra.mxu1 %v4469_v37  ;;  %2036 = vmatpush2.bf16.msra.mxu0 %v4471_v38  ;;  %v4878_v37 = vld [vmem:[%s7526_s9 + $0x40] ss:$8 sps:$4 sm:$0xff]  }
 0x2f9   :  { %1984 = vmatprep.subr.bf16.mxu1 %v4462_v43  ;;  %2037 = vmatprep.subr.bf16.mxu0 %v4464_v9  ;;  %v4881_v38 = vld [vmem:[%s7526_s9 + $0x140] ss:$8 sps:$4 sm:$0xff]   ;;  %v4886_v43 = vld [vmem:[%s7526_s9 + $0x34] ss:$8 sps:$4 sm:$0xff]   ;;  %v4884_v9 = vld [vmem:[%s7526_s9 + $0x30] ss:$8 sps:$4 sm:$0xff]  }
 0x2fc   :  { %1985 = vmatpush2.bf16.msra.mxu1 %v4461_v29  ;;  %2038 = vmatpush2.bf16.msra.mxu0 %v4463_v6  ;;  %v4893_v29 = vld [vmem:[%s7526_s9 + $0x120] ss:$8 sps:$4 sm:$0xff]   ;;  %v4898_v6 = vld [vmem:[%s7526_s9 + $0x14] ss:$8 sps:$4 sm:$0xff]  }
 0x2fd   :  { %1986 = vmatprep.subr.bf16.mxu1 %v4454_v8  ;;  %2039 = vmatprep.subr.bf16.mxu0 %v4456_v21  ;;  %v4901_v8 = vld [vmem:[%s7526_s9 + $0x114] ss:$8 sps:$4 sm:$0xff]   ;;  %v4896_v21 = vld [vmem:[%s7526_s9 + $0x10] ss:$8 sps:$4 sm:$0xff]  }
 0x300   :  { %1987 = vmatpush2.bf16.msra.mxu1 %v4453_v30  ;;  %2040 = vmatpush2.bf16.msra.mxu0 %v4455_v53  ;;  %v4905_v30 = vld [vmem:[%s7526_s9 + $0x100] ss:$8 sps:$4 sm:$0xff]   ;;  %v4910_v53 = vld [vmem:[%s7526_s9 + $0xf4] ss:$8 sps:$4 sm:$0xff]  }
 0x301   :  { %1988 = vmatprep.subr.bf16.mxu1 %v4446_v49  ;;  %2041 = vmatprep.subr.bf16.mxu0 %v4448_v31  ;;  %v4913_v49 = vld [vmem:[%s7526_s9 + $0x1f4] ss:$8 sps:$4 sm:$0xff]   ;;  %v4908_v31 = vld [vmem:[%s7526_s9 + $0xf0] ss:$8 sps:$4 sm:$0xff]  }
 0x304   :  { %1989 = vmatpush2.bf16.msra.mxu1 %v4445_v39  ;;  %2042 = vmatpush2.bf16.msra.mxu0 %v4447_v40  ;;  %v4917_v39 = vld [vmem:[%s7526_s9 + $0x1e0] ss:$8 sps:$4 sm:$0xff]   ;;  %v4922_v40 = vld [vmem:[%s7526_s9 + $0xd4] ss:$8 sps:$4 sm:$0xff]  }
 0x305   :  { %1990 = vmatprep.subr.bf16.mxu1 %v4438_v26  ;;  %2043 = vmatprep.subr.bf16.mxu0 %v4440_v41  ;;  %v4925_v26 = vld [vmem:[%s7526_s9 + $0x1d4] ss:$8 sps:$4 sm:$0xff]   ;;  %v4920_v41 = vld [vmem:[%s7526_s9 + $0xd0] ss:$8 sps:$4 sm:$0xff]  }
 0x308   :  { %1991 = vmatpush2.bf16.msra.mxu1 %v4437_v17  ;;  %2044 = vmatpush2.bf16.msra.mxu0 %v4439_v18  ;;  %v4929_v17 = vld [vmem:[%s7526_s9 + $0x1c0] ss:$8 sps:$4 sm:$0xff]   ;;  %v4934_v18 = vld [vmem:[%s7526_s9 + $0xb4] ss:$8 sps:$4 sm:$0xff]  }
 0x309   :  { %1992 = vmatprep.subr.bf16.mxu1 %v4430_v19  ;;  %2045 = vmatprep.subr.bf16.mxu0 %v4432_v20  ;;  %v4937_v19 = vld [vmem:[%s7526_s9 + $0x1b4] ss:$8 sps:$4 sm:$0xff]   ;;  %v4932_v20 = vld [vmem:[%s7526_s9 + $0xb0] ss:$8 sps:$4 sm:$0xff]  }
 0x30c   :  { %1993 = vmatpush2.bf16.msra.mxu1 %v4429_v22  ;;  %2046 = vmatpush2.bf16.msra.mxu0 %v4431_v47  ;;  %v4935_v22 = vld [vmem:[%s7526_s9 + $0x1b0] ss:$8 sps:$4 sm:$0xff]   ;;  %v4940_v47 = vld [vmem:[%s7526_s9 + $0xa4] ss:$8 sps:$4 sm:$0xff]  }
 0x30d   :  { %3152 = vmatprep.subr.bf16.mxu1 %v4862_v54  ;;  %3205 = vmatprep.subr.bf16.mxu0 %v4865_v56  ;;  %v4943_v54 = vld [vmem:[%s7526_s9 + $0x1a4] ss:$8 sps:$4 sm:$0xff]   ;;  %v4938_v56 = vld [vmem:[%s7526_s9 + $0xa0] ss:$8 sps:$4 sm:$0xff]  }
 0x30f   :  { %1995 = vmatmul.mubr.bf16.vlgmr.msra.gmra.mxu1 %v6114_v16  ;;  %2048 = vmatmul.mubr.bf16.vlgmr.msra.gmra.mxu0 %v6114_v16  ;;  %v4874_v16 = vld [vmem:[%s7526_s9 + $0x54] ss:$8 sps:$4 sm:$0xff]  }
 0x310   :  { %2004 = vmatprep.mubr.bf16.mxu1 %v6150_v23  ;;  %2057 = vmatprep.mubr.bf16.mxu0 %v6150_v23  ;;  %v4877_v23 = vld [vmem:[%s7526_s9 + $0x154] ss:$8 sps:$4 sm:$0xff]  }
 0x311   :  { %3153 = vmatpush1.bf16.msra.mxu1 %v4860_v58  ;;  %3206 = vmatpush1.bf16.msra.mxu0 %v4863_v59  ;;  %v4941_v58 = vld [vmem:[%s7526_s9 + $0x1a0] ss:$8 sps:$4 sm:$0xff]   ;;  %v4946_v59 = vld [vmem:[%s7526_s9 + $0x94] ss:$8 sps:$4 sm:$0xff]  }
 0x312   :  { %3154 = vmatprep.subr.bf16.mxu1 %v4868_v60  ;;  %3207 = vmatprep.subr.bf16.mxu0 %v4871_v62  ;;  %v4949_v60 = vld [vmem:[%s7526_s9 + $0x194] ss:$8 sps:$4 sm:$0xff]   ;;  %v4944_v62 = vld [vmem:[%s7526_s9 + $0x90] ss:$8 sps:$4 sm:$0xff]  }
 0x315   :  { %3155 = vmatpush1.bf16.msra.mxu1 %v4866_v63  ;;  %3208 = vmatpush1.bf16.msra.mxu0 %v4869_v0  ;;  %v4947_v63 = vld [vmem:[%s7526_s9 + $0x190] ss:$8 sps:$4 sm:$0xff]   ;;  %v4952_v0 = vld [vmem:[%s7526_s9 + $0x84] ss:$8 sps:$4 sm:$0xff]  }
 0x316   :  { %3156 = vmatprep.subr.bf16.mxu1 %v4874_v16  ;;  %3209 = vmatprep.subr.bf16.mxu0 %v4877_v23  ;;  %v4955_v16 = vld [vmem:[%s7526_s9 + $0x184] ss:$8 sps:$4 sm:$0xff]   ;;  %v4950_v23 = vld [vmem:[%s7526_s9 + $0x80] ss:$8 sps:$4 sm:$0xff]  }
 0x317   :  { %2005 = vmatmul.mubr.bf16.gmra.mxu1 %v6152_v48  ;;  %2058 = vmatmul.mubr.bf16.gmra.mxu0 %v6152_v48  ;;  %v4889_v48 = vld [vmem:[%s7526_s9 + $0x134] ss:$8 sps:$4 sm:$0xff]  }
 0x319   :  { %3157 = vmatpush1.bf16.msra.mxu1 %v4872_v3  ;;  %3210 = vmatpush1.bf16.msra.mxu0 %v4875_v4  ;;  %v4953_v3 = vld [vmem:[%s7526_s9 + $0x180] ss:$8 sps:$4 sm:$0xff]   ;;  %v4958_v4 = vld [vmem:[%s7526_s9 + $0x274] ss:$8 sps:$4 sm:$0xff]  }
 0x31a   :  { %3158 = vmatprep.subr.bf16.mxu1 %v4880_v5  ;;  %3211 = vmatprep.subr.bf16.mxu0 %v4883_v7  ;;  %v4961_v5 = vld [vmem:[%s7526_s9 + $0x374] ss:$8 sps:$4 sm:$0xff]   ;;  %v1186_v7 = vsub.s32 2, %v5776_v51 }
 0x31d   :  { %3159 = vmatpush1.bf16.msra.mxu1 %v4878_v37  ;;  %3212 = vmatpush1.bf16.msra.mxu0 %v4881_v38  ;;  %v6510_v37 = vld [vmem:[%s7529_s8] sm:$0xff]  ;;  %v1190_v38 = vsub.s32 3, %v5776_v51 }
 0x31e   :  { %3160 = vmatprep.subr.bf16.mxu1 %v4886_v43  ;;  %3213 = vmatprep.subr.bf16.mxu0 %v4889_v48  ;;  %v6515_v43 = vrot.slane %v6510_v37, %v5782_v55  ;;  %v6520_v48 = vrot.slane %v6510_v37, %v1186_v7 }
 0x321   :  { %3161 = vmatpush1.bf16.msra.mxu1 %v4884_v9  ;;  %3214 = vmatpush1.bf16.msra.mxu0 %v4887_v44  ;;  %v6524_v9 = vrot.slane %v6510_v37, %v5785_v57  ;;  %v6529_v44 = vrot.slane %v6510_v37, %v1190_v38 }
 0x322   :  { %3162 = vmatprep.subr.bf16.mxu1 %v4892_v12  ;;  %3215 = vmatprep.subr.bf16.mxu0 %v4895_v14 }
 0x325   :  { %3163 = vmatpush1.bf16.msra.mxu1 %v4890_v15  ;;  %3216 = vmatpush1.bf16.msra.mxu0 %v4893_v29 }
 0x326   :  { %3164 = vmatprep.subr.bf16.mxu1 %v4898_v6  ;;  %3217 = vmatprep.subr.bf16.mxu0 %v4901_v8 }
 0x329   :  { %3165 = vmatpush1.bf16.msra.mxu1 %v4896_v21  ;;  %3218 = vmatpush1.bf16.msra.mxu0 %v4899_v24 }
 0x32a   :  { %3166 = vmatprep.subr.bf16.mxu1 %v4904_v25  ;;  %3219 = vmatprep.subr.bf16.mxu0 %v4907_v27 }
 0x32d   :  { %3167 = vmatpush1.bf16.msra.mxu1 %v4902_v28  ;;  %3220 = vmatpush1.bf16.msra.mxu0 %v4905_v30 }
 0x32e   :  { %3168 = vmatprep.subr.bf16.mxu1 %v4910_v53  ;;  %3221 = vmatprep.subr.bf16.mxu0 %v4913_v49 }
 0x331   :  { %3169 = vmatpush2.bf16.msra.mxu1 %v4908_v31  ;;  %3222 = vmatpush2.bf16.msra.mxu0 %v4911_v32 }
 0x332   :  { %3170 = vmatprep.subr.bf16.mxu1 %v4916_v33  ;;  %3223 = vmatprep.subr.bf16.mxu0 %v4919_v61 }
 0x335   :  { %3171 = vmatpush2.bf16.msra.mxu1 %v4914_v34  ;;  %3224 = vmatpush2.bf16.msra.mxu0 %v4917_v39 }
 0x336   :  { %3172 = vmatprep.subr.bf16.mxu1 %v4922_v40  ;;  %3225 = vmatprep.subr.bf16.mxu0 %v4925_v26 }
 0x339   :  { %3173 = vmatpush2.bf16.msra.mxu1 %v4920_v41  ;;  %3226 = vmatpush2.bf16.msra.mxu0 %v4923_v42 }
 0x33a   :  { %3174 = vmatprep.subr.bf16.mxu1 %v4928_v11  ;;  %3227 = vmatprep.subr.bf16.mxu0 %v4931_v45 }
 0x33d   :  { %3175 = vmatpush2.bf16.msra.mxu1 %v4926_v46  ;;  %3228 = vmatpush2.bf16.msra.mxu0 %v4929_v17 }
 0x33e   :  { %3176 = vmatprep.subr.bf16.mxu1 %v4934_v18  ;;  %3229 = vmatprep.subr.bf16.mxu0 %v4937_v19 }
 0x341   :  { %3177 = vmatpush2.bf16.msra.mxu1 %v4932_v20  ;;  %3230 = vmatpush2.bf16.msra.mxu0 %v4935_v22 }
 0x342   :  { %3178 = vmatprep.subr.bf16.mxu1 %v4940_v47  ;;  %3231 = vmatprep.subr.bf16.mxu0 %v4943_v54 }
 0x345   :  { %3179 = vmatpush2.bf16.msra.mxu1 %v4938_v56  ;;  %3232 = vmatpush2.bf16.msra.mxu0 %v4941_v58 }
 0x346   :  { %3180 = vmatprep.subr.bf16.mxu1 %v4946_v59  ;;  %3233 = vmatprep.subr.bf16.mxu0 %v4949_v60 }
 0x349   :  { %3181 = vmatpush2.bf16.msra.mxu1 %v4944_v62  ;;  %3234 = vmatpush2.bf16.msra.mxu0 %v4947_v63 }
 0x34a   :  { %3182 = vmatprep.subr.bf16.mxu1 %v4952_v0  ;;  %3235 = vmatprep.subr.bf16.mxu0 %v4955_v16 }
 0x34d   :  { %3183 = vmatpush2.bf16.msra.mxu1 %v4950_v23  ;;  %3236 = vmatpush2.bf16.msra.mxu0 %v4953_v3 }
 0x34e   :  { %3258 = vmatprep.subr.bf16.mxu1 %v4958_v4  ;;  %3311 = vmatprep.subr.bf16.mxu0 %v4961_v5 }
 0x38f   :  { %v1890_v12 = vpop.f32.mrf.mxu1  ;;  %v1943_v14 = vpop.f32.mrf.mxu0 }
 0x390   :  { %v6532_v15 = vadd.f32 %v1890_v12, %v6515_v43  ;;  %v6535_v29 = vadd.f32 %v1943_v14, %v6520_v48 }
 0x391   :  { %v1892_v6 = vpop.f32.mrf.mxu1  ;;  %v1945_v8 = vpop.f32.mrf.mxu0 }
 0x392   :  { %v2068_v21 = vmul.f32 %v6532_v15, %v6532_v15  ;;  %v2070_v24 = vmul.f32 %v6535_v29, %v6535_v29  ;;  %v6542_v25 = vadd.f32 %v1892_v6, %v6524_v9  ;;  %v6545_v27 = vadd.f32 %v1945_v8, %v6529_v44 }
 0x393   :  { %v1894_v28 = vpop.f32.mrf.mxu1  ;;  %v1947_v30 = vpop.f32.mrf.mxu0 }
 0x394   :  { %v2100_v53 = vmul.f32 %v2068_v21, %v6532_v15  ;;  %v2102_v49 = vmul.f32 %v2070_v24, %v6535_v29  ;;  %v2069_v31 = vmul.f32 %v6542_v25, %v6542_v25  ;;  %v2071_v32 = vmul.f32 %v6545_v27, %v6545_v27 }
 0x395   :  { %v6554_v33 = vadd.f32 %v1894_v28, %v6515_v43  ;;  %v6557_v61 = vadd.f32 %v1947_v30, %v6520_v48  ;;  %v1896_v34 = vpop.f32.mrf.mxu1  ;;  %v1949_v39 = vpop.f32.mrf.mxu0 }
 0x396   :  { %v2132_v40 = vmul.f32 0.044715, %v2100_v53  ;;  %v2134_v26 = vmul.f32 0.044715, %v2102_v49  ;;  %v2101_v41 = vmul.f32 %v2069_v31, %v6542_v25  ;;  %v2103_v42 = vmul.f32 %v2071_v32, %v6545_v27 }
 0x397   :  { %v2076_v11 = vmul.f32 %v6554_v33, %v6554_v33  ;;  %v2078_v45 = vmul.f32 %v6557_v61, %v6557_v61  ;;  %v6566_v46 = vadd.f32 %v1896_v34, %v6524_v9  ;;  %v6569_v17 = vadd.f32 %v1949_v39, %v6529_v44  ;;  %v1900_v18 = vpop.f32.mrf.mxu1  ;;  %v1953_v19 = vpop.f32.mrf.mxu0 }
 0x398   :  { %v2164_v20 = vadd.f32 %v2132_v40, %v6532_v15  ;;  %v2166_v22 = vadd.f32 %v2134_v26, %v6535_v29  ;;  %v2133_v47 = vmul.f32 0.044715, %v2101_v41  ;;  %v2135_v54 = vmul.f32 0.044715, %v2103_v42 }
 0x399   :  { %v2108_v56 = vmul.f32 %v2076_v11, %v6554_v33  ;;  %v2110_v58 = vmul.f32 %v2078_v45, %v6557_v61  ;;  %v2077_v59 = vmul.f32 %v6566_v46, %v6566_v46  ;;  %v2079_v60 = vmul.f32 %v6569_v17, %v6569_v17  ;;  %v1902_v23 = vpop.f32.mrf.mxu1  ;;  %v1955_v14 = vpop.f32.mrf.mxu0 }
 0x39a   :  { %v2196_v62 = vmul.f32 0.7978846, %v2164_v20  ;;  %v2198_v63 = vmul.f32 0.7978846, %v2166_v22  ;;  %v2165_v0 = vadd.f32 %v2133_v47, %v6542_v25  ;;  %v2167_v16 = vadd.f32 %v2135_v54, %v6545_v27 }
 0x39b   :  { %v2140_v3 = vmul.f32 0.044715, %v2108_v56  ;;  %v2142_v4 = vmul.f32 0.044715, %v2110_v58  ;;  %v2109_v5 = vmul.f32 %v2077_v59, %v6566_v46  ;;  %v2111_v12 = vmul.f32 %v2079_v60, %v6569_v17  ;;  %v1904_v32 = vpop.f32.mrf.mxu1  ;;  %v1957_v26 = vpop.f32.mrf.mxu0 }
 0x39c   :  { %5204 = vtanh.f32 %v2196_v62  ;;  %v2197_v6 = vmul.f32 0.7978846, %v2165_v0  ;;  %v2199_v8 = vmul.f32 0.7978846, %v2167_v16  ;;  %v6584_v21 = vadd.f32 %v1900_v18, %v6515_v43 }
 0x39d   :  { %5206 = vtanh.f32 %v2198_v63  ;;  %v2172_v24 = vadd.f32 %v2140_v3, %v6554_v33  ;;  %v2174_v28 = vadd.f32 %v2142_v4, %v6557_v61  ;;  %v2141_v30 = vmul.f32 0.044715, %v2109_v5  ;;  %v1906_v56 = vpop.f32.mrf.mxu1  ;;  %v1959_v62 = vpop.f32.mrf.mxu0 }
 0x39e   :  { %5208 = vtanh.f32 %v2197_v6  ;;  %v2143_v53 = vmul.f32 0.044715, %v2111_v12  ;;  %v2084_v49 = vmul.f32 %v6584_v21, %v6584_v21  ;;  %v6591_v31 = vadd.f32 %v1953_v19, %v6520_v48 }
 0x39f   :  { %5210 = vtanh.f32 %v2199_v8  ;;  %v2204_v34 = vmul.f32 0.7978846, %v2172_v24  ;;  %v2206_v39 = vmul.f32 0.7978846, %v2174_v28  ;;  %v2173_v40 = vadd.f32 %v2141_v30, %v6566_v46 }
 0x3a0   :  { %v2175_v41 = vadd.f32 %v2143_v53, %v6569_v17  ;;  %v2116_v42 = vmul.f32 %v2084_v49, %v6584_v21  ;;  %v2086_v11 = vmul.f32 %v6591_v31, %v6591_v31  ;;  %v6599_v45 = vadd.f32 %v1902_v23, %v6524_v9 }
 0x3a1   :  { %5212 = vtanh.f32 %v2204_v34  ;;  %v2205_v18 = vmul.f32 0.7978846, %v2173_v40  ;;  %v6602_v19 = vadd.f32 %v1955_v14, %v6529_v44  ;;  %v6605_v20 = vadd.f32 %v1904_v32, %v6515_v43 }
 0x3a2   :  { %5214 = vtanh.f32 %v2206_v39  ;;  %v2207_v22 = vmul.f32 0.7978846, %v2175_v41  ;;  %v2148_v47 = vmul.f32 0.044715, %v2116_v42  ;;  %v2118_v54 = vmul.f32 %v2086_v11, %v6591_v31 }
 0x3a3   :  { %5216 = vtanh.f32 %v2205_v18  ;;  %v2085_v58 = vmul.f32 %v6599_v45, %v6599_v45  ;;  %v2087_v59 = vmul.f32 %v6602_v19, %v6602_v19  ;;  %v2092_v60 = vmul.f32 %v6605_v20, %v6605_v20 }
 0x3a4   :  { %5218 = vtanh.f32 %v2207_v22  ;;  %v2180_v43 = vadd.f32 %v2148_v47, %v6584_v21  ;;  %v2150_v63 = vmul.f32 0.044715, %v2118_v54  ;;  %v6616_v0 = vadd.f32 %v1957_v26, %v6520_v48 }
 0x3a5   :  { %v2117_v16 = vmul.f32 %v2085_v58, %v6599_v45  ;;  %v2119_v23 = vmul.f32 %v2087_v59, %v6602_v19  ;;  %v2124_v3 = vmul.f32 %v2092_v60, %v6605_v20  ;;  %v6622_v4 = vadd.f32 %v1906_v56, %v6524_v9 }
 0x3a6   :  { %v2212_v5 = vmul.f32 0.7978846, %v2180_v43  ;;  %v2182_v12 = vadd.f32 %v2150_v63, %v6591_v31  ;;  %v2094_v14 = vmul.f32 %v6616_v0, %v6616_v0  ;;  %v6628_v6 = vadd.f32 %v1959_v62, %v6529_v44 }
 0x3a7   :  { %v2149_v48 = vmul.f32 0.044715, %v2117_v16  ;;  %v2151_v8 = vmul.f32 0.044715, %v2119_v23  ;;  %v2156_v24 = vmul.f32 0.044715, %v2124_v3  ;;  %v2093_v28 = vmul.f32 %v6622_v4, %v6622_v4 }
 0x3a8   :  { %v2214_v30 = vmul.f32 0.7978846, %v2182_v12  ;;  %v2126_v53 = vmul.f32 %v2094_v14, %v6616_v0  ;;  %v2095_v9 = vmul.f32 %v6628_v6, %v6628_v6  ;;  %5220 = vtanh.f32 %v2212_v5 }
 0x3a9   :  { %v5205_v49 = vpop.eup %5204  ;;  %v2181_v32 = vadd.f32 %v2149_v48, %v6599_v45  ;;  %v2183_v34 = vadd.f32 %v2151_v8, %v6602_v19  ;;  %v2188_v44 = vadd.f32 %v2156_v24, %v6605_v20  ;;  %v2125_v39 = vmul.f32 %v2093_v28, %v6622_v4 }
 0x3aa   :  { %v5207_v40 = vpop.eup %5206  ;;  %v2158_v26 = vmul.f32 0.044715, %v2126_v53  ;;  %v2127_v41 = vmul.f32 %v2095_v9, %v6628_v6  ;;  %5222 = vtanh.f32 %v2214_v30  ;;  %v2260_v62 = vadd.f32 1.0, %v5205_v49 }
 0x3ab   :  { %v5209_v42 = vpop.eup %5208  ;;  %v2213_v11 = vmul.f32 0.7978846, %v2181_v32  ;;  %v2215_v18 = vmul.f32 0.7978846, %v2183_v34  ;;  %v2220_v47 = vmul.f32 0.7978846, %v2188_v44 }
 0x3ac   :  { %v5211_v22 = vpop.eup %5210  ;;  %v2190_v54 = vadd.f32 %v2158_v26, %v6616_v0  ;;  %v2157_v56 = vmul.f32 0.044715, %v2125_v39  ;;  %v2159_v58 = vmul.f32 0.044715, %v2127_v41  ;;  %v2261_v59 = vadd.f32 1.0, %v5209_v42 }
 0x3ad   :  { %5224 = vtanh.f32 %v2213_v11  ;;  %v2262_v23 = vadd.f32 1.0, %v5207_v40  ;;  %v2263_v9 = vadd.f32 1.0, %v5211_v22  ;;  %v2292_v49 = vmul.f32 0.5, %v2260_v62 }
 0x3ae   :  { %v5213_v60 = vpop.eup %5212  ;;  %5226 = vtanh.f32 %v2215_v18  ;;  %v2222_v43 = vmul.f32 0.7978846, %v2190_v54  ;;  %v2189_v63 = vadd.f32 %v2157_v56, %v6622_v4  ;;  %v2191_v5 = vadd.f32 %v2159_v58, %v6628_v6 }
 0x3af   :  { %v5215_v16 = vpop.eup %5214  ;;  %v2268_v3 = vadd.f32 1.0, %v5213_v60  ;;  %5228 = vtanh.f32 %v2220_v47  ;;  %v2293_v8 = vmul.f32 0.5, %v2261_v59  ;;  %v2294_v44 = vmul.f32 0.5, %v2262_v23 }
 0x3b0   :  { %v5217_v12 = vpop.eup %5216  ;;  %v2270_v14 = vadd.f32 1.0, %v5215_v16  ;;  %5230 = vtanh.f32 %v2222_v43  ;;  %v2221_v48 = vmul.f32 0.7978846, %v2189_v63  ;;  %v2223_v30 = vmul.f32 0.7978846, %v2191_v5 }
 0x3b1   :  { %v5219_v24 = vpop.eup %5218  ;;  %v2300_v28 = vmul.f32 0.5, %v2268_v3  ;;  %v2269_v53 = vadd.f32 1.0, %v5217_v12  ;;  %v2295_v40 = vmul.f32 0.5, %v2263_v9  ;;  %v2325_v11 = vmul.f32 %v2293_v8, %v6542_v25  ;;  %v4959_v25 = vld [vmem:[%s7526_s9 + $0x370] ss:$8 sps:$4 sm:$0xff]  }
 0x3b2   :  { %v2302_v32 = vmul.f32 0.5, %v2270_v14  ;;  %5232 = vtanh.f32 %v2221_v48  ;;  %v2271_v34 = vadd.f32 1.0, %v5219_v24  ;;  %v2324_v47 = vmul.f32 %v2292_v49, %v6532_v15  ;;  %v4964_v15 = vld [vmem:[%s7526_s9 + $0x264] ss:$8 sps:$4 sm:$0xff]   ;;  %v4962_v43 = vld [vmem:[%s7526_s9 + $0x260] ss:$8 sps:$4 sm:$0xff]  }
 0x3b3   :  { %5234 = vtanh.f32 %v2223_v30  ;;  %v2301_v39 = vmul.f32 0.5, %v2269_v53  ;;  %v2332_v26 = vmul.f32 %v2300_v28, %v6554_v33  ;;  %v2327_v22 = vmul.f32 %v2295_v40, %v6545_v27  ;;  %v4956_v33 = vld [vmem:[%s7526_s9 + $0x270] ss:$8 sps:$4 sm:$0xff]   ;;  %v4965_v16 = vld [vmem:[%s7526_s9 + $0x360] ss:$8 sps:$4 sm:$0xff]  }
 0x3b4   :  { %v2303_v41 = vmul.f32 0.5, %v2271_v34  ;;  %v2334_v42 = vmul.f32 %v2302_v32, %v6557_v61  ;;  %v2326_v56 = vmul.f32 %v2294_v44, %v6535_v29  ;;  %v4967_v29 = vld [vmem:[%s7526_s9 + $0x364] ss:$8 sps:$4 sm:$0xff]   ;;  %v4970_v3 = vld [vmem:[%s7526_s9 + $0x254] ss:$8 sps:$4 sm:$0xff]  }
 0x3b5   :  { %v2333_v18 = vmul.f32 %v2301_v39, %v6566_v46  ;;  %v5221_v59 = vpop.eup %5220  ;;  %v2356_v60 = vpack.c.bf16 %v2332_v26, %v2324_v47  ;;  %v4973_v14 = vld [vmem:[%s7526_s9 + $0x354] ss:$8 sps:$4 sm:$0xff]   ;;  %v4968_v53 = vld [vmem:[%s7526_s9 + $0x250] ss:$8 sps:$4 sm:$0xff]   ;;  %v4976_v40 = vld [vmem:[%s7526_s9 + $0x244] ss:$8 sps:$4 sm:$0xff]  }
 0x3b6   :  { %v2335_v54 = vmul.f32 %v2303_v41, %v6569_v17  ;;  %v2358_v46 = vpack.c.bf16 %v2334_v42, %v2326_v56  ;;  %v2276_v48 = vadd.f32 1.0, %v5221_v59  ;;  %v4971_v9 = vld [vmem:[%s7526_s9 + $0x350] ss:$8 sps:$4 sm:$0xff]   ;;  %v4974_v56 = vld [vmem:[%s7526_s9 + $0x240] ss:$8 sps:$4 sm:$0xff]  }
 0x3b7   :  { %v2357_v58 = vpack.c.bf16 %v2333_v18, %v2325_v11  ;;  %v5223_v27 = vpop.eup %5222  ;;  %v4979_v11 = vld [vmem:[%s7526_s9 + $0x344] ss:$8 sps:$4 sm:$0xff]  }
 0x3b8   :  { %v2359_v61 = vpack.c.bf16 %v2335_v54, %v2327_v22  ;;  %v2278_v24 = vadd.f32 1.0, %v5223_v27  ;;  %v2308_v42 = vmul.f32 0.5, %v2276_v48 }
 0x3b9   :  { %3184 = vmatprep.mubr.bf16.mxu1 %v2357_v58 }
 0x3ba   :  { %v5225_v17 = vpop.eup %5224  ;;  %3237 = vmatprep.mubr.bf16.mxu0 %v2359_v61  ;;  %3185 = vmatmul.mubr.bf16.vlgmr.msra.gmra.mxu1 %v2356_v60  ;;  %v2310_v47 = vmul.f32 0.5, %v2278_v24  ;;  %v4977_v60 = vld [vmem:[%s7526_s9 + $0x340] ss:$8 sps:$4 sm:$0xff]  }
 0x3bb   :  { %v5227_v62 = vpop.eup %5226  ;;  %3238 = vmatmul.mubr.bf16.vlgmr.msra.gmra.mxu0 %v2358_v46  ;;  %3259 = vmatpush1.bf16.msra.mxu1 %v4956_v33  ;;  %v2277_v23 = vadd.f32 1.0, %v5225_v17  ;;  %v4980_v46 = vld [vmem:[%s7526_s9 + $0x230] ss:$8 sps:$4 sm:$0xff]   ;;  %v1202_v17 = vsub.s32 6, %v5776_v51 }
 0x3bc   :  { %v5229_v63 = vpop.eup %5228  ;;  %3312 = vmatpush1.bf16.msra.mxu0 %v4959_v25  ;;  %3260 = vmatprep.subr.bf16.mxu1 %v4964_v15  ;;  %v2279_v12 = vadd.f32 1.0, %v5227_v62  ;;  %v2340_v25 = vmul.f32 %v2308_v42, %v6584_v21  ;;  %v4991_v62 = vld [vmem:[%s7526_s9 + $0x324] ss:$8 sps:$4 sm:$0xff]  }
 0x3bd   :  { %v5231_v5 = vpop.eup %5230  ;;  %3313 = vmatprep.subr.bf16.mxu0 %v4967_v29  ;;  %v2284_v8 = vadd.f32 1.0, %v5229_v63  ;;  %v2309_v44 = vmul.f32 0.5, %v2277_v23  ;;  %v1194_v29 = vsub.s32 4, %v5776_v51  ;;  %v1206_v63 = vsub.s32 7, %v5776_v51  ;;  %v4989_v23 = vld [vmem:[%s7526_s9 + $0x320] ss:$8 sps:$4 sm:$0xff]  }
 0x3be   :  { %v2286_v28 = vadd.f32 1.0, %v5231_v5  ;;  %v2311_v41 = vmul.f32 0.5, %v2279_v12  ;;  %v6735_v5 = vrot.slane %v6510_v37, %v1202_v17  ;;  %v4994_v12 = vld [vmem:[%s7526_s9 + $0x214] ss:$8 sps:$4 sm:$0xff]   ;;  %v5004_v17 = vld [vmem:[%s7526_s9 + $0x2f0] ss:$8 sps:$4 sm:$0xff]  }
 0x3bf   :  { %v5233_v30 = vpop.eup %5232  ;;  %3261 = vmatpush1.bf16.msra.mxu1 %v4962_v43  ;;  %v2316_v49 = vmul.f32 0.5, %v2284_v8  ;;  %v2341_v58 = vmul.f32 %v2309_v44, %v6599_v45  ;;  %v2342_v45 = vmul.f32 %v2310_v47, %v6591_v31  ;;  %v4983_v31 = vld [vmem:[%s7526_s9 + $0x330] ss:$8 sps:$4 sm:$0xff]   ;;  %v1198_v43 = vsub.s32 5, %v5776_v51  ;;  %v5003_v44 = vld [vmem:[%s7526_s9 + $0x304] ss:$8 sps:$4 sm:$0xff]  }
 0x3c0   :  { %v5235_v32 = vpop.eup %5234  ;;  %3314 = vmatpush1.bf16.msra.mxu0 %v4965_v16  ;;  %v2285_v34 = vadd.f32 1.0, %v5233_v30  ;;  %3262 = vmatprep.subr.bf16.mxu1 %v4970_v3  ;;  %v2318_v39 = vmul.f32 0.5, %v2286_v28  ;;  %v2343_v61 = vmul.f32 %v2311_v41, %v6602_v19  ;;  %v4985_v19 = vld [vmem:[%s7526_s9 + $0x334] ss:$8 sps:$4 sm:$0xff]   ;;  %v4986_v16 = vld [vmem:[%s7526_s9 + $0x220] ss:$8 sps:$4 sm:$0xff]   ;;  %v6732_v3 = vrot.slane %v6510_v37, %v1194_v29 }
 0x3c1   :  { %v2287_v26 = vadd.f32 1.0, %v5235_v32  ;;  %3315 = vmatprep.subr.bf16.mxu0 %v4973_v14  ;;  %v2348_v54 = vmul.f32 %v2316_v49, %v6605_v20  ;;  %v4997_v14 = vld [vmem:[%s7526_s9 + $0x314] ss:$8 sps:$4 sm:$0xff]   ;;  %v6746_v48 = vrot.slane %v6510_v37, %v1198_v43  ;;  %v6749_v8 = vrot.slane %v6510_v37, %v1206_v63  ;;  %v4992_v30 = vld [vmem:[%s7526_s9 + $0x210] ss:$8 sps:$4 sm:$0xff]  }
 0x3c2   :  { %v2317_v18 = vmul.f32 0.5, %v2285_v34  ;;  %v2350_v59 = vmul.f32 %v2318_v39, %v6616_v0  ;;  %v4982_v0 = vld [vmem:[%s7526_s9 + $0x234] ss:$8 sps:$4 sm:$0xff]   ;;  %v4995_v37 = vld [vmem:[%s7526_s9 + $0x310] ss:$8 sps:$4 sm:$0xff]  }
 0x3c3   :  { %v2319_v22 = vmul.f32 0.5, %v2287_v26  ;;  %3263 = vmatpush1.bf16.msra.mxu1 %v4968_v53  ;;  %v2364_v27 = vpack.c.bf16 %v2348_v54, %v2340_v25  ;;  %v5000_v34 = vld [vmem:[%s7526_s9 + $0x204] ss:$8 sps:$4 sm:$0xff]   ;;  %v5009_v25 = vld [vmem:[%s7526_s9 + $0x3f4] ss:$8 sps:$4 sm:$0xff]  }
 0x3c4   :  { %v2349_v33 = vmul.f32 %v2317_v18, %v6622_v4  ;;  %3316 = vmatpush1.bf16.msra.mxu0 %v4971_v9  ;;  %3264 = vmatprep.subr.bf16.mxu1 %v4976_v40  ;;  %v2366_v21 = vpack.c.bf16 %v2350_v59, %v2342_v45  ;;  %v4998_v18 = vld [vmem:[%s7526_s9 + $0x200] ss:$8 sps:$4 sm:$0xff]  }
 0x3c5   :  { %v2351_v20 = vmul.f32 %v2319_v22, %v6628_v6  ;;  %3317 = vmatprep.subr.bf16.mxu0 %v4979_v11  ;;  %v4988_v6 = vld [vmem:[%s7526_s9 + $0x224] ss:$8 sps:$4 sm:$0xff]  }
 0x3c6   :  { %v2365_v15 = vpack.c.bf16 %v2349_v33, %v2341_v58  ;;  %v5001_v58 = vld [vmem:[%s7526_s9 + $0x300] ss:$8 sps:$4 sm:$0xff]   ;;  %v5006_v33 = vld [vmem:[%s7526_s9 + $0x2f4] ss:$8 sps:$4 sm:$0xff]  }
 0x3c7   :  { %v2367_v4 = vpack.c.bf16 %v2351_v20, %v2343_v61  ;;  %3265 = vmatpush1.bf16.msra.mxu1 %v4974_v56 }
 0x3c8   :  { %3194 = vmatprep.mubr.bf16.mxu1 %v2365_v15  ;;  %3318 = vmatpush1.bf16.msra.mxu0 %v4977_v60 }
 0x3c9   :  { %3247 = vmatprep.mubr.bf16.mxu0 %v2367_v4  ;;  %3195 = vmatmul.mubr.bf16.gmra.mxu1 %v2364_v27 }
 0x3ca   :  { %3248 = vmatmul.mubr.bf16.gmra.mxu0 %v2366_v21  ;;  %3266 = vmatprep.subr.bf16.mxu1 %v4982_v0 }
 0x3cb   :  { %3319 = vmatprep.subr.bf16.mxu0 %v4985_v19  ;;  %3267 = vmatpush1.bf16.msra.mxu1 %v4980_v46 }
 0x3cc   :  { %3320 = vmatpush1.bf16.msra.mxu0 %v4983_v31  ;;  %3268 = vmatprep.subr.bf16.mxu1 %v4988_v6 }
 0x3cd   :  { %3321 = vmatprep.subr.bf16.mxu0 %v4991_v62  ;;  %v5007_v62 = vld [vmem:[%s7526_s9 + $0x3f0] ss:$8 sps:$4 sm:$0xff]  }
 0x3cf   :  { %3269 = vmatpush1.bf16.msra.mxu1 %v4986_v16  ;;  %v1996_v24 = vpop.f32.mrf.mxu1  ;;  %v2049_v28 = vpop.f32.mrf.mxu0 }
 0x3d0   :  { %3322 = vmatpush1.bf16.msra.mxu0 %v4989_v23  ;;  %v6755_v53 = vadd.f32 %v1996_v24, %v6732_v3  ;;  %v6758_v9 = vadd.f32 %v2049_v28, %v6735_v5  ;;  %3270 = vmatprep.subr.bf16.mxu1 %v4994_v12 }
 0x3d1   :  { %v1998_v49 = vpop.f32.mrf.mxu1  ;;  %v2051_v32 = vpop.f32.mrf.mxu0  ;;  %3323 = vmatprep.subr.bf16.mxu0 %v4997_v14  ;;  %v5012_v14 = vld [vmem:[%s7526_s9 + $0x2e4] ss:$8 sps:$4 sm:$0xff]  }
 0x3d2   :  { %v2072_v39 = vmul.f32 %v6755_v53, %v6755_v53  ;;  %v2074_v40 = vmul.f32 %v6758_v9, %v6758_v9  ;;  %v6774_v26 = vadd.f32 %v1998_v49, %v6746_v48  ;;  %v6777_v41 = vadd.f32 %v2051_v32, %v6749_v8  ;;  %v5015_v49 = vld [vmem:[%s7526_s9 + $0x3e4] ss:$8 sps:$4 sm:$0xff]  }
 0x3d3   :  { %3271 = vmatpush1.bf16.msra.mxu1 %v4992_v30  ;;  %v2000_v42 = vpop.f32.mrf.mxu1  ;;  %v2053_v11 = vpop.f32.mrf.mxu0 }
 0x3d4   :  { %v2104_v47 = vmul.f32 %v2072_v39, %v6755_v53  ;;  %v2106_v22 = vmul.f32 %v2074_v40, %v6758_v9  ;;  %v2073_v54 = vmul.f32 %v6774_v26, %v6774_v26  ;;  %v2075_v56 = vmul.f32 %v6777_v41, %v6777_v41  ;;  %3324 = vmatpush1.bf16.msra.mxu0 %v4995_v37 }
 0x3d5   :  { %v6795_v59 = vadd.f32 %v2000_v42, %v6732_v3  ;;  %v6798_v60 = vadd.f32 %v2053_v11, %v6735_v5  ;;  %v2002_v61 = vpop.f32.mrf.mxu1  ;;  %v2055_v20 = vpop.f32.mrf.mxu0  ;;  %3272 = vmatprep.subr.bf16.mxu1 %v5000_v34  ;;  %3325 = vmatprep.subr.bf16.mxu0 %v5003_v44 }
 0x3d6   :  { %v2136_v15 = vmul.f32 0.044715, %v2104_v47  ;;  %v2138_v45 = vmul.f32 0.044715, %v2106_v22  ;;  %v2105_v0 = vmul.f32 %v2073_v54, %v6774_v26  ;;  %v2107_v4 = vmul.f32 %v2075_v56, %v6777_v41  ;;  %v5010_v54 = vld [vmem:[%s7526_s9 + $0x2e0] ss:$8 sps:$4 sm:$0xff]  }
 0x3d7   :  { %v2080_v27 = vmul.f32 %v6795_v59, %v6795_v59  ;;  %v2082_v46 = vmul.f32 %v6798_v60, %v6798_v60  ;;  %v6810_v19 = vadd.f32 %v2002_v61, %v6746_v48  ;;  %v6813_v21 = vadd.f32 %v2055_v20, %v6749_v8  ;;  %3273 = vmatpush1.bf16.msra.mxu1 %v4998_v18  ;;  %v2006_v31 = vpop.f32.mrf.mxu1  ;;  %v2059_v6 = vpop.f32.mrf.mxu0  ;;  %v5013_v61 = vld [vmem:[%s7526_s9 + $0x3e0] ss:$8 sps:$4 sm:$0xff]  }
 0x3d8   :  { %v2168_v63 = vadd.f32 %v2136_v15, %v6755_v53  ;;  %v2170_v16 = vadd.f32 %v2138_v45, %v6758_v9  ;;  %v2137_v23 = vmul.f32 0.044715, %v2105_v0  ;;  %v2139_v12 = vmul.f32 0.044715, %v2107_v4  ;;  %3326 = vmatpush1.bf16.msra.mxu0 %v5001_v58  ;;  %3274 = vmatprep.subr.bf16.mxu1 %v5006_v33  ;;  %v5018_v45 = vld [vmem:[%s7526_s9 + $0x2d4] ss:$8 sps:$4 sm:$0xff]  }
 0x3d9   :  { %v2112_v24 = vmul.f32 %v2080_v27, %v6795_v59  ;;  %v2114_v28 = vmul.f32 %v2082_v46, %v6798_v60  ;;  %v2081_v30 = vmul.f32 %v6810_v19, %v6810_v19  ;;  %v2083_v37 = vmul.f32 %v6813_v21, %v6813_v21  ;;  %3327 = vmatprep.subr.bf16.mxu0 %v5009_v25  ;;  %v2008_v40 = vpop.f32.mrf.mxu1  ;;  %v2061_v22 = vpop.f32.mrf.mxu0  ;;  %v5021_v0 = vld [vmem:[%s7526_s9 + $0x3d4] ss:$8 sps:$4 sm:$0xff]  }
 0x3da   :  { %v2200_v32 = vmul.f32 0.7978846, %v2168_v63  ;;  %v2202_v34 = vmul.f32 0.7978846, %v2170_v16  ;;  %v2169_v44 = vadd.f32 %v2137_v23, %v6774_v26  ;;  %v2171_v39 = vadd.f32 %v2139_v12, %v6777_v41  ;;  %v5016_v23 = vld [vmem:[%s7526_s9 + $0x2d0] ss:$8 sps:$4 sm:$0xff]  }
 0x3db   :  { %v2144_v42 = vmul.f32 0.044715, %v2112_v24  ;;  %v2146_v11 = vmul.f32 0.044715, %v2114_v28  ;;  %v2113_v18 = vmul.f32 %v2081_v30, %v6810_v19  ;;  %v2115_v47 = vmul.f32 %v2083_v37, %v6813_v21  ;;  %3275 = vmatpush2.bf16.msra.mxu1 %v5004_v17  ;;  %v2063_v16 = vpop.f32.mrf.mxu0  ;;  %v5019_v28 = vld [vmem:[%s7526_s9 + $0x3d0] ss:$8 sps:$4 sm:$0xff]  }
 0x3dc   :  { %5236 = vtanh.f32 %v2200_v32  ;;  %v2201_v56 = vmul.f32 0.7978846, %v2169_v44  ;;  %v2203_v58 = vmul.f32 0.7978846, %v2171_v39  ;;  %v6843_v33 = vadd.f32 %v2006_v31, %v6732_v3  ;;  %3328 = vmatpush2.bf16.msra.mxu0 %v5007_v62  ;;  %3276 = vmatprep.subr.bf16.mxu1 %v5012_v14  ;;  %v2010_v31 = vpop.f32.mrf.mxu1  ;;  %v5024_v30 = vld [vmem:[%s7526_s9 + $0x2c4] ss:$8 sps:$4 sm:$0xff]  }
 0x3dd   :  { %5238 = vtanh.f32 %v2202_v34  ;;  %v2176_v20 = vadd.f32 %v2144_v42, %v6795_v59  ;;  %v2178_v25 = vadd.f32 %v2146_v11, %v6798_v60  ;;  %v2145_v15 = vmul.f32 0.044715, %v2113_v18  ;;  %3329 = vmatprep.subr.bf16.mxu0 %v5015_v49  ;;  %v5027_v34 = vld [vmem:[%s7526_s9 + $0x3c4] ss:$8 sps:$4 sm:$0xff]  }
 0x3de   :  { %5240 = vtanh.f32 %v2201_v56  ;;  %v2147_v4 = vmul.f32 0.044715, %v2115_v47  ;;  %v2088_v27 = vmul.f32 %v6843_v33, %v6843_v33  ;;  %v6859_v46 = vadd.f32 %v2059_v6, %v6735_v5  ;;  %v2012_v42 = vpop.f32.mrf.mxu1  ;;  %v2065_v47 = vpop.f32.mrf.mxu0 }
 0x3df   :  { %5242 = vtanh.f32 %v2203_v58  ;;  %v2208_v17 = vmul.f32 0.7978846, %v2176_v20  ;;  %v2210_v62 = vmul.f32 0.7978846, %v2178_v25  ;;  %v2177_v63 = vadd.f32 %v2145_v15, %v6810_v19  ;;  %3277 = vmatpush2.bf16.msra.mxu1 %v5010_v54  ;;  %v5030_v20 = vld [vmem:[%s7526_s9 + $0x2b4] ss:$8 sps:$4 sm:$0xff]  }
 0x3e0   :  { %v2179_v12 = vadd.f32 %v2147_v4, %v6813_v21  ;;  %v2120_v14 = vmul.f32 %v2088_v27, %v6843_v33  ;;  %v2090_v6 = vmul.f32 %v6859_v46, %v6859_v46  ;;  %v6870_v24 = vadd.f32 %v2008_v40, %v6746_v48  ;;  %3330 = vmatpush2.bf16.msra.mxu0 %v5013_v61  ;;  %v5025_v61 = vld [vmem:[%s7526_s9 + $0x3c0] ss:$8 sps:$4 sm:$0xff]  }
 0x3e1   :  { %5244 = vtanh.f32 %v2208_v17  ;;  %v2209_v37 = vmul.f32 0.7978846, %v2177_v63  ;;  %v6879_v49 = vadd.f32 %v2061_v22, %v6749_v8  ;;  %v6882_v32 = vadd.f32 %v2010_v31, %v6732_v3  ;;  %3278 = vmatprep.subr.bf16.mxu1 %v5018_v45  ;;  %3331 = vmatprep.subr.bf16.mxu0 %v5021_v0  ;;  %v5022_v22 = vld [vmem:[%s7526_s9 + $0x2c0] ss:$8 sps:$4 sm:$0xff]  }
 0x3e2   :  { %5246 = vtanh.f32 %v2210_v62  ;;  %v2211_v44 = vmul.f32 0.7978846, %v2179_v12  ;;  %v2152_v39 = vmul.f32 0.044715, %v2120_v14  ;;  %v2122_v40 = vmul.f32 %v2090_v6, %v6859_v46  ;;  %v5028_v62 = vld [vmem:[%s7526_s9 + $0x2b0] ss:$8 sps:$4 sm:$0xff]  }
 0x3e3   :  { %5248 = vtanh.f32 %v2209_v37  ;;  %v2089_v11 = vmul.f32 %v6870_v24, %v6870_v24  ;;  %v2091_v3 = vmul.f32 %v6879_v49, %v6879_v49  ;;  %v2096_v18 = vmul.f32 %v6882_v32, %v6882_v32  ;;  %3279 = vmatpush2.bf16.msra.mxu1 %v5016_v23 }
 0x3e4   :  { %5250 = vtanh.f32 %v2211_v44  ;;  %v2184_v54 = vadd.f32 %v2152_v39, %v6843_v33  ;;  %v2154_v56 = vmul.f32 0.044715, %v2122_v40  ;;  %v6899_v58 = vadd.f32 %v2063_v16, %v6735_v5  ;;  %3332 = vmatpush2.bf16.msra.mxu0 %v5019_v28  ;;  %3280 = vmatprep.subr.bf16.mxu1 %v5024_v30  ;;  %v5033_v5 = vld [vmem:[%s7526_s9 + $0x3b4] ss:$8 sps:$4 sm:$0xff]   ;;  %v5036_v28 = vld [vmem:[%s7526_s9 + $0x2a4] ss:$8 sps:$4 sm:$0xff]  }
 0x3e5   :  { %v2121_v25 = vmul.f32 %v2089_v11, %v6870_v24  ;;  %v2123_v15 = vmul.f32 %v2091_v3, %v6879_v49  ;;  %v2128_v45 = vmul.f32 %v2096_v18, %v6882_v32  ;;  %v6911_v0 = vadd.f32 %v2012_v42, %v6746_v48  ;;  %3333 = vmatprep.subr.bf16.mxu0 %v5027_v34  ;;  %v5039_v40 = vld [vmem:[%s7526_s9 + $0x3a4] ss:$8 sps:$4 sm:$0xff]   ;;  %v5034_v18 = vld [vmem:[%s7526_s9 + $0x2a0] ss:$8 sps:$4 sm:$0xff]  }
 0x3e6   :  { %v2216_v4 = vmul.f32 0.7978846, %v2184_v54  ;;  %v2186_v27 = vadd.f32 %v2154_v56, %v6859_v46  ;;  %v2098_v31 = vmul.f32 %v6899_v58, %v6899_v58  ;;  %v6920_v17 = vadd.f32 %v2065_v47, %v6749_v8  ;;  %v5031_v8 = vld [vmem:[%s7526_s9 + $0x3b0] ss:$8 sps:$4 sm:$0xff]   ;;  %v5037_v56 = vld [vmem:[%s7526_s9 + $0x3a0] ss:$8 sps:$4 sm:$0xff]  }
 0x3e7   :  { %v2153_v48 = vmul.f32 0.044715, %v2121_v25  ;;  %v2155_v63 = vmul.f32 0.044715, %v2123_v15  ;;  %v2160_v16 = vmul.f32 0.044715, %v2128_v45  ;;  %v2097_v23 = vmul.f32 %v6911_v0, %v6911_v0  ;;  %3281 = vmatpush2.bf16.msra.mxu1 %v5022_v22 }
 0x3e8   :  { %v2218_v12 = vmul.f32 0.7978846, %v2186_v27  ;;  %v2130_v14 = vmul.f32 %v2098_v31, %v6899_v58  ;;  %v2099_v6 = vmul.f32 %v6920_v17, %v6920_v17  ;;  %3334 = vmatpush2.bf16.msra.mxu0 %v5025_v61  ;;  %3282 = vmatprep.subr.bf16.mxu1 %v5030_v20  ;;  %5252 = vtanh.f32 %v2216_v4  ;;  %v5042_v45 = vld [vmem:[%s7526_s9 + $0x294] ss:$8 sps:$4 sm:$0xff]  }
 0x3e9   :  { %v5237_v30 = vpop.eup %5236  ;;  %v2185_v37 = vadd.f32 %v2153_v48, %v6870_v24  ;;  %v2187_v34 = vadd.f32 %v2155_v63, %v6879_v49  ;;  %v2192_v44 = vadd.f32 %v2160_v16, %v6882_v32  ;;  %v2129_v39 = vmul.f32 %v2097_v23, %v6911_v0  ;;  %3335 = vmatprep.subr.bf16.mxu0 %v5033_v5  ;;  %v5045_v4 = vld [vmem:[%s7526_s9 + $0x394] ss:$8 sps:$4 sm:$0xff]   ;;  %v5040_v16 = vld [vmem:[%s7526_s9 + $0x290] ss:$8 sps:$4 sm:$0xff]  }
 0x3ea   :  { %v5239_v42 = vpop.eup %5238  ;;  %v2162_v11 = vmul.f32 0.044715, %v2130_v14  ;;  %v2131_v3 = vmul.f32 %v2099_v6, %v6920_v17  ;;  %5254 = vtanh.f32 %v2218_v12 }
 0x3eb   :  { %v5241_v47 = vpop.eup %5240  ;;  %v2217_v22 = vmul.f32 0.7978846, %v2185_v37  ;;  %v2219_v54 = vmul.f32 0.7978846, %v2187_v34  ;;  %3283 = vmatpush2.bf16.msra.mxu1 %v5028_v62  ;;  %v2224_v20 = vmul.f32 0.7978846, %v2192_v44 }
 0x3ec   :  { %v5243_v61 = vpop.eup %5242  ;;  %v2194_v25 = vadd.f32 %v2162_v11, %v6899_v58  ;;  %v2161_v15 = vmul.f32 0.044715, %v2129_v39  ;;  %3336 = vmatpush2.bf16.msra.mxu0 %v5031_v8  ;;  %3284 = vmatprep.subr.bf16.mxu1 %v5036_v28  ;;  %v2163_v5 = vmul.f32 0.044715, %v2131_v3  ;;  %v2265_v27 = vadd.f32 1.0, %v5241_v47 }
 0x3ed   :  { %5256 = vtanh.f32 %v2217_v22  ;;  %3337 = vmatprep.subr.bf16.mxu0 %v5039_v40  ;;  %v2264_v62 = vadd.f32 1.0, %v5237_v30  ;;  %v2266_v12 = vadd.f32 1.0, %v5239_v42  ;;  %v5043_v8 = vld [vmem:[%s7526_s9 + $0x390] ss:$8 sps:$4 sm:$0xff]   ;;  %v5048_v28 = vld [vmem:[%s7526_s9 + $0x284] ss:$8 sps:$4 sm:$0xff]  }
 0x3ee   :  { %v5245_v31 = vpop.eup %5244  ;;  %5258 = vtanh.f32 %v2219_v54  ;;  %v2226_v48 = vmul.f32 0.7978846, %v2194_v25  ;;  %v2193_v63 = vadd.f32 %v2161_v15, %v6911_v0  ;;  %v2195_v6 = vadd.f32 %v2163_v5, %v6920_v17  ;;  %v5051_v44 = vld [vmem:[%s7526_s9 + $0x384] ss:$8 sps:$4 sm:$0xff]  }
 0x3ef   :  { %v5247_v23 = vpop.eup %5246  ;;  %v2272_v14 = vadd.f32 1.0, %v5245_v31  ;;  %5260 = vtanh.f32 %v2224_v20  ;;  %3285 = vmatpush2.bf16.msra.mxu1 %v5034_v18  ;;  %v2297_v39 = vmul.f32 0.5, %v2265_v27  ;;  %v2267_v18 = vadd.f32 1.0, %v5243_v61  ;;  %v5049_v61 = vld [vmem:[%s7526_s9 + $0x380] ss:$8 sps:$4 sm:$0xff]  }
 0x3f0   :  { %v5249_v30 = vpop.eup %5248  ;;  %v2274_v37 = vadd.f32 1.0, %v5247_v23  ;;  %5262 = vtanh.f32 %v2226_v48  ;;  %v2225_v34 = vmul.f32 0.7978846, %v2193_v63  ;;  %3338 = vmatpush2.bf16.msra.mxu0 %v5037_v56  ;;  %3286 = vmatprep.subr.bf16.mxu1 %v5042_v45  ;;  %v2227_v11 = vmul.f32 0.7978846, %v2195_v6 }
 0x3f1   :  { %v5251_v40 = vpop.eup %5250  ;;  %v2304_v42 = vmul.f32 0.5, %v2272_v14  ;;  %3339 = vmatprep.subr.bf16.mxu0 %v5045_v4  ;;  %v2273_v3 = vadd.f32 1.0, %v5249_v30  ;;  %v2296_v47 = vmul.f32 0.5, %v2264_v62  ;;  %v2298_v20 = vmul.f32 0.5, %v2266_v12  ;;  %v5046_v56 = vld [vmem:[%s7526_s9 + $0x280] ss:$8 sps:$4 sm:$0xff]  }
 0x3f2   :  { %v2306_v22 = vmul.f32 0.5, %v2274_v37  ;;  %5264 = vtanh.f32 %v2225_v34  ;;  %v2275_v54 = vadd.f32 1.0, %v5251_v40  ;;  %v2299_v15 = vmul.f32 0.5, %v2267_v18 }
 0x3f3   :  { %5266 = vtanh.f32 %v2227_v11  ;;  %3287 = vmatpush2.bf16.msra.mxu1 %v5040_v16  ;;  %v2305_v25 = vmul.f32 0.5, %v2273_v3  ;;  %v2336_v45 = vmul.f32 %v2304_v42, %v6795_v59  ;;  %v2329_v27 = vmul.f32 %v2297_v39, %v6774_v26 }
 0x3f4   :  { %3340 = vmatpush2.bf16.msra.mxu0 %v5043_v8  ;;  %3288 = vmatprep.subr.bf16.mxu1 %v5048_v28  ;;  %v2307_v5 = vmul.f32 0.5, %v2275_v54  ;;  %v2338_v4 = vmul.f32 %v2306_v22, %v6798_v60  ;;  %v2328_v62 = vmul.f32 %v2296_v47, %v6755_v53  ;;  %v2331_v48 = vmul.f32 %v2299_v15, %v6777_v41 }
 0x3f5   :  { %3341 = vmatprep.subr.bf16.mxu0 %v5051_v44  ;;  %v2337_v31 = vmul.f32 %v2305_v25, %v6810_v19  ;;  %v2330_v63 = vmul.f32 %v2298_v20, %v6758_v9  ;;  %v5253_v23 = vpop.eup %5252 }
 0x3f6   :  { %v2339_v59 = vmul.f32 %v2307_v5, %v6813_v21  ;;  %v2360_v12 = vpack.c.bf16 %v2336_v45, %v2328_v62  ;;  %v2280_v28 = vadd.f32 1.0, %v5253_v23  ;;  %v5069_v23 = vld [vmem:[%s7530_s11 + $0xfc] ss:$24 sps:$4 sm:$0xff]  }
 0x3f7   :  { %3289 = vmatpush2.bf16.msra.mxu1 %v5046_v56  ;;  %v2361_v16 = vpack.c.bf16 %v2337_v31, %v2329_v27  ;;  %v5255_v60 = vpop.eup %5254  ;;  %v2362_v6 = vpack.c.bf16 %v2338_v4, %v2330_v63  ;;  %v5066_v63 = vld [vmem:[%s7530_s11 + $0xf4] ss:$24 sps:$4 sm:$0xff]  }
 0x3f8   :  { %3342 = vmatpush2.bf16.msra.mxu0 %v5049_v61  ;;  %v2363_v14 = vpack.c.bf16 %v2339_v59, %v2331_v48  ;;  %v2282_v30 = vadd.f32 1.0, %v5255_v60  ;;  %v2312_v47 = vmul.f32 0.5, %v2280_v28  ;;  %v5075_v60 = vld [vmem:[%s7530_s11 + $0xcc] ss:$24 sps:$4 sm:$0xff]  }
 0x3f9   :  { %3290 = vmatprep.mubr.bf16.mxu1 %v2361_v16  ;;  %v5064_v16 = vld [vmem:[%s7530_s11 + $0xf0] ss:$24 sps:$4 sm:$0xff]   ;;  %v5087_v28 = vld [vmem:[%s7530_s11 + $0x6c] ss:$24 sps:$4 sm:$0xff]  }
 0x3fa   :  { %v5257_v26 = vpop.eup %5256  ;;  %3343 = vmatprep.mubr.bf16.mxu0 %v2363_v14  ;;  %3291 = vmatmul.mubr.bf16.vlgmr.msra.gmra.mxu1 %v2360_v12  ;;  %v2314_v54 = vmul.f32 0.5, %v2282_v30  ;;  %v2344_v4 = vmul.f32 %v2312_v47, %v6843_v33  ;;  %v5055_v33 = vld [vmem:[%s7530_s11 + $0x158] ss:$24 sps:$4 sm:$0xff]   ;;  %v5072_v14 = vld [vmem:[%s7530_s11 + $0xc4] ss:$24 sps:$4 sm:$0xff]  }
 0x3fb   :  { %v5259_v19 = vpop.eup %5258  ;;  %3344 = vmatmul.mubr.bf16.vlgmr.msra.gmra.mxu0 %v2362_v6  ;;  %v2281_v41 = vadd.f32 1.0, %v5257_v26  ;;  %v5067_v12 = vld [vmem:[%s7530_s11 + $0xf8] ss:$24 sps:$4 sm:$0xff]   ;;  %v5078_v26 = vld [vmem:[%s7530_s11 + $0x94] ss:$24 sps:$4 sm:$0xff]  }
 0x3fc   :  { %v5261_v53 = vpop.eup %5260  ;;  %v2283_v21 = vadd.f32 1.0, %v5259_v19  ;;  %v2346_v31 = vmul.f32 %v2314_v54, %v6859_v46  ;;  %v5057_v46 = vld [vmem:[%s7530_s11 + $0x15c] ss:$24 sps:$4 sm:$0xff]   ;;  %v5070_v6 = vld [vmem:[%s7530_s11 + $0xc0] ss:$24 sps:$4 sm:$0xff]  }
 0x3fd   :  { %v5263_v8 = vpop.eup %5262  ;;  %v2288_v9 = vadd.f32 1.0, %v5261_v53  ;;  %v2313_v42 = vmul.f32 0.5, %v2281_v41  ;;  %4037 = vmatprep.subr.bf16.mxu0 %v5057_v46  ;;  %v5073_v19 = vld [vmem:[%s7530_s11 + $0xc8] ss:$24 sps:$4 sm:$0xff]   ;;  %v5081_v53 = vld [vmem:[%s7530_s11 + $0x9c] ss:$24 sps:$4 sm:$0xff]  }
 0x3fe   :  { %v2290_v37 = vadd.f32 1.0, %v5263_v8  ;;  %v2315_v18 = vmul.f32 0.5, %v2283_v21  ;;  %4038 = vmatpush1.bf16.msra.mxu0 %v5055_v33  ;;  %v5076_v41 = vld [vmem:[%s7530_s11 + $0x90] ss:$24 sps:$4 sm:$0xff]   ;;  %v5084_v8 = vld [vmem:[%s7530_s11 + $0x64] ss:$24 sps:$4 sm:$0xff]  }
 0x3ff   :  { %v5265_v34 = vpop.eup %5264  ;;  %v2320_v44 = vmul.f32 0.5, %v2288_v9  ;;  %v2345_v25 = vmul.f32 %v2313_v42, %v6870_v24  ;;  %v5054_v24 = vld [vmem:[%s7530_s11 + $0x154] ss:$24 sps:$4 sm:$0xff]   ;;  %v5079_v21 = vld [vmem:[%s7530_s11 + $0x98] ss:$24 sps:$4 sm:$0xff]  }
 0x400   :  { %v5267_v39 = vpop.eup %5266  ;;  %v2289_v40 = vadd.f32 1.0, %v5265_v34  ;;  %v2322_v11 = vmul.f32 0.5, %v2290_v37  ;;  %v2347_v61 = vmul.f32 %v2315_v18, %v6879_v49  ;;  %v5052_v49 = vld [vmem:[%s7530_s11 + $0x150] ss:$24 sps:$4 sm:$0xff]   ;;  %3984 = vmatprep.subr.bf16.mxu1 %v5054_v24  ;;  %v5082_v9 = vld [vmem:[%s7530_s11 + $0x60] ss:$24 sps:$4 sm:$0xff]  }
 0x401   :  { %v2291_v3 = vadd.f32 1.0, %v5267_v39  ;;  %v2352_v56 = vmul.f32 %v2320_v44, %v6882_v32  ;;  %3985 = vmatpush1.bf16.msra.mxu1 %v5052_v49  ;;  %v5058_v32 = vld [vmem:[%s7530_s11 + $0x120] ss:$24 sps:$4 sm:$0xff]   ;;  %v5090_v30 = vld [vmem:[%s7530_s11 + $0x34] ss:$24 sps:$4 sm:$0xff]  }
 0x402   :  { %v2321_v22 = vmul.f32 0.5, %v2289_v40  ;;  %v2354_v45 = vmul.f32 %v2322_v11, %v6899_v58  ;;  %v5060_v58 = vld [vmem:[%s7530_s11 + $0x124] ss:$24 sps:$4 sm:$0xff]   ;;  %v5085_v37 = vld [vmem:[%s7530_s11 + $0x68] ss:$24 sps:$4 sm:$0xff]  }
 0x403   :  { %v2323_v20 = vmul.f32 0.5, %v2291_v3  ;;  %v2368_v48 = vpack.c.bf16 %v2352_v56, %v2344_v4  ;;  %3986 = vmatprep.subr.bf16.mxu1 %v5060_v58  ;;  %v5093_v34 = vld [vmem:[%s7530_s11 + $0x3c] ss:$24 sps:$4 sm:$0xff]   ;;  %v5088_v44 = vld [vmem:[%s7530_s11 + $0x30] ss:$24 sps:$4 sm:$0xff]  }
 0x404   :  { %v2353_v15 = vmul.f32 %v2321_v22, %v6911_v0  ;;  %v2370_v59 = vpack.c.bf16 %v2354_v45, %v2346_v31  ;;  %v5061_v0 = vld [vmem:[%s7530_s11 + $0x128] ss:$24 sps:$4 sm:$0xff]   ;;  %v5096_v39 = vld [vmem:[%s7530_s11 + $0x4] ss:$24 sps:$4 sm:$0xff]   ;;  %v5091_v40 = vld [vmem:[%s7530_s11 + $0x38] ss:$24 sps:$4 sm:$0xff]  }
 0x405   :  { %v2355_v5 = vmul.f32 %v2323_v20, %v6920_v17  ;;  %v5063_v17 = vld [vmem:[%s7530_s11 + $0x12c] ss:$24 sps:$4 sm:$0xff]   ;;  %3987 = vmatpush1.bf16.msra.mxu1 %v5058_v32  ;;  %v5094_v11 = vld [vmem:[%s7530_s11] ss:$24 sps:$4 sm:$0xff]   ;;  %v5105_v47 = vld [vmem:[%s7530_s11 + $0x2dc] ss:$24 sps:$4 sm:$0xff]  }
 0x406   :  { %v2369_v27 = vpack.c.bf16 %v2353_v15, %v2345_v25  ;;  %4039 = vmatprep.subr.bf16.mxu0 %v5063_v17  ;;  %3988 = vmatprep.subr.bf16.mxu1 %v5066_v63  ;;  %v5099_v42 = vld [vmem:[%s7530_s11 + $0xc] ss:$24 sps:$4 sm:$0xff]   ;;  %v5097_v18 = vld [vmem:[%s7530_s11 + $0x8] ss:$24 sps:$4 sm:$0xff]   ;;  %v5103_v54 = vld [vmem:[%s7530_s11 + $0x2d8] ss:$24 sps:$4 sm:$0xff]  }
 0x407   :  { %v2371_v62 = vpack.c.bf16 %v2355_v5, %v2347_v61  ;;  %4040 = vmatpush1.bf16.msra.mxu0 %v5061_v0  ;;  %v5102_v3 = vld [vmem:[%s7530_s11 + $0x2d4] ss:$24 sps:$4 sm:$0xff]   ;;  %v5100_v22 = vld [vmem:[%s7530_s11 + $0x2d0] ss:$24 sps:$4 sm:$0xff]   ;;  %v5108_v20 = vld [vmem:[%s7530_s11 + $0x2a4] ss:$24 sps:$4 sm:$0xff]  }
 0x408   :  { %3300 = vmatprep.mubr.bf16.mxu1 %v2369_v27  ;;  %4041 = vmatprep.subr.bf16.mxu0 %v5069_v23  ;;  %v5106_v56 = vld [vmem:[%s7530_s11 + $0x2a0] ss:$24 sps:$4 sm:$0xff]   ;;  %v5111_v25 = vld [vmem:[%s7530_s11 + $0x2ac] ss:$24 sps:$4 sm:$0xff]   ;;  %v5117_v61 = vld [vmem:[%s7530_s11 + $0x27c] ss:$24 sps:$4 sm:$0xff]  }
 0x409   :  { %3353 = vmatprep.mubr.bf16.mxu0 %v2371_v62  ;;  %3301 = vmatmul.mubr.bf16.gmra.mxu1 %v2368_v48  ;;  %v5114_v15 = vld [vmem:[%s7530_s11 + $0x274] ss:$24 sps:$4 sm:$0xff]   ;;  %v5109_v45 = vld [vmem:[%s7530_s11 + $0x2a8] ss:$24 sps:$4 sm:$0xff]   ;;  %v5120_v4 = vld [vmem:[%s7530_s11 + $0x244] ss:$24 sps:$4 sm:$0xff]  }
 0x40a   :  { %3354 = vmatmul.mubr.bf16.gmra.mxu0 %v2370_v59  ;;  %3989 = vmatpush1.bf16.msra.mxu1 %v5064_v16  ;;  %v5112_v5 = vld [vmem:[%s7530_s11 + $0x270] ss:$24 sps:$4 sm:$0xff]   ;;  %v5123_v31 = vld [vmem:[%s7530_s11 + $0x24c] ss:$24 sps:$4 sm:$0xff]   ;;  %v5118_v62 = vld [vmem:[%s7530_s11 + $0x240] ss:$24 sps:$4 sm:$0xff]  }
 0x40b   :  { %3990 = vmatprep.subr.bf16.mxu1 %v5072_v14  ;;  %4042 = vmatpush1.bf16.msra.mxu0 %v5067_v12  ;;  %v5115_v27 = vld [vmem:[%s7530_s11 + $0x278] ss:$24 sps:$4 sm:$0xff]   ;;  %v5126_v48 = vld [vmem:[%s7530_s11 + $0x214] ss:$24 sps:$4 sm:$0xff]   ;;  %v5121_v59 = vld [vmem:[%s7530_s11 + $0x248] ss:$24 sps:$4 sm:$0xff]  }
 0x40c   :  { %4043 = vmatprep.subr.bf16.mxu0 %v5075_v60  ;;  %v5124_v24 = vld [vmem:[%s7530_s11 + $0x210] ss:$24 sps:$4 sm:$0xff]   ;;  %v5129_v49 = vld [vmem:[%s7530_s11 + $0x21c] ss:$24 sps:$4 sm:$0xff]   ;;  %v5130_v32 = vld [vmem:[%s7530_s11 + $0x1e0] ss:$24 sps:$4 sm:$0xff]  }
 0x40d   :  { %v5127_v33 = vld [vmem:[%s7530_s11 + $0x218] ss:$24 sps:$4 sm:$0xff]   ;;  %v5132_v46 = vld [vmem:[%s7530_s11 + $0x1e4] ss:$24 sps:$4 sm:$0xff]   ;;  %v5133_v0 = vld [vmem:[%s7530_s11 + $0x1e8] ss:$24 sps:$4 sm:$0xff]  }
 0x40e   :  { %3991 = vmatpush1.bf16.msra.mxu1 %v5070_v6  ;;  %v5135_v58 = vld [vmem:[%s7530_s11 + $0x1ec] ss:$24 sps:$4 sm:$0xff]   ;;  %v5136_v63 = vld [vmem:[%s7530_s11 + $0x1b0] ss:$24 sps:$4 sm:$0xff]   ;;  %v5141_v16 = vld [vmem:[%s7530_s11 + $0x1bc] ss:$24 sps:$4 sm:$0xff]  }
 0x40f   :  { %3992 = vmatprep.subr.bf16.mxu1 %v5078_v26  ;;  %4044 = vmatpush1.bf16.msra.mxu0 %v5073_v19  ;;  %v5138_v17 = vld [vmem:[%s7530_s11 + $0x1b4] ss:$24 sps:$4 sm:$0xff]   ;;  %v5139_v23 = vld [vmem:[%s7530_s11 + $0x1b8] ss:$24 sps:$4 sm:$0xff]   ;;  %v5144_v12 = vld [vmem:[%s7530_s11 + $0x184] ss:$24 sps:$4 sm:$0xff]  }
 0x410   :  { %4045 = vmatprep.subr.bf16.mxu0 %v5081_v53  ;;  %v5142_v14 = vld [vmem:[%s7530_s11 + $0x180] ss:$24 sps:$4 sm:$0xff]   ;;  %v5147_v60 = vld [vmem:[%s7530_s11 + $0x18c] ss:$24 sps:$4 sm:$0xff]  }
 0x411   :  { %v5145_v6 = vld [vmem:[%s7530_s11 + $0x188] ss:$24 sps:$4 sm:$0xff]   ;;  %v5150_v26 = vld [vmem:[%s7530_s11 + $0x164] ss:$24 sps:$4 sm:$0xff]  }
 0x412   :  { %3993 = vmatpush1.bf16.msra.mxu1 %v5076_v41 }
 0x413   :  { %3994 = vmatprep.subr.bf16.mxu1 %v5084_v8  ;;  %4046 = vmatpush1.bf16.msra.mxu0 %v5079_v21 }
 0x414   :  { %4047 = vmatprep.subr.bf16.mxu0 %v5087_v28 }
 0x416   :  { %3995 = vmatpush1.bf16.msra.mxu1 %v5082_v9 }
 0x417   :  { %3996 = vmatprep.subr.bf16.mxu1 %v5090_v30  ;;  %4048 = vmatpush1.bf16.msra.mxu0 %v5085_v37 }
 0x418   :  { %4049 = vmatprep.subr.bf16.mxu0 %v5093_v34 }
 0x41a   :  { %3997 = vmatpush1.bf16.msra.mxu1 %v5088_v44 }
 0x41b   :  { %3998 = vmatprep.subr.bf16.mxu1 %v5096_v39  ;;  %4050 = vmatpush1.bf16.msra.mxu0 %v5091_v40  ;;  %v2500_v39 = vld [vmem:[%s7531_s10] sm:$0x3] }
 0x41c   :  { %4051 = vmatprep.subr.bf16.mxu0 %v5099_v42  ;;  %v2509_v42 = vrot.slane %v2500_v39, %v5785_v57 }
 0x41e   :  { %3999 = vmatpush1.bf16.msra.mxu1 %v5094_v11  ;;  %v2505_v11 = vrot.slane %v2500_v39, %v5782_v55 }
 0x41f   :  { %4000 = vmatprep.subr.bf16.mxu1 %v5102_v3  ;;  %4052 = vmatpush1.bf16.msra.mxu0 %v5097_v18 }
 0x420   :  { %4053 = vmatprep.subr.bf16.mxu0 %v5105_v47 }
 0x422   :  { %4001 = vmatpush2.bf16.msra.mxu1 %v5100_v22 }
 0x423   :  { %4002 = vmatprep.subr.bf16.mxu1 %v5108_v20  ;;  %4054 = vmatpush2.bf16.msra.mxu0 %v5103_v54 }
 0x424   :  { %4055 = vmatprep.subr.bf16.mxu0 %v5111_v25 }
 0x426   :  { %4003 = vmatpush2.bf16.msra.mxu1 %v5106_v56 }
 0x427   :  { %4004 = vmatprep.subr.bf16.mxu1 %v5114_v15  ;;  %4056 = vmatpush2.bf16.msra.mxu0 %v5109_v45 }
 0x428   :  { %4057 = vmatprep.subr.bf16.mxu0 %v5117_v61 }
 0x42a   :  { %4005 = vmatpush2.bf16.msra.mxu1 %v5112_v5 }
 0x42b   :  { %4006 = vmatprep.subr.bf16.mxu1 %v5120_v4  ;;  %4058 = vmatpush2.bf16.msra.mxu0 %v5115_v27 }
 0x42c   :  { %4059 = vmatprep.subr.bf16.mxu0 %v5123_v31 }
 0x42e   :  { %4007 = vmatpush2.bf16.msra.mxu1 %v5118_v62 }
 0x42f   :  { %4008 = vmatprep.subr.bf16.mxu1 %v5126_v48  ;;  %4060 = vmatpush2.bf16.msra.mxu0 %v5121_v59 }
 0x430   :  { %4061 = vmatprep.subr.bf16.mxu0 %v5129_v49 }
 0x432   :  { %4009 = vmatpush2.bf16.msra.mxu1 %v5124_v24 }
 0x433   :  { %4010 = vmatprep.subr.bf16.mxu1 %v5132_v46  ;;  %4062 = vmatpush2.bf16.msra.mxu0 %v5127_v33 }
 0x434   :  { %4063 = vmatprep.subr.bf16.mxu0 %v5135_v58 }
 0x436   :  { %4011 = vmatpush2.bf16.msra.mxu1 %v5130_v32 }
 0x437   :  { %4012 = vmatprep.subr.bf16.mxu1 %v5138_v17  ;;  %4064 = vmatpush2.bf16.msra.mxu0 %v5133_v0 }
 0x438   :  { %4065 = vmatprep.subr.bf16.mxu0 %v5141_v16 }
 0x43a   :  { %4013 = vmatpush2.bf16.msra.mxu1 %v5136_v63 }
 0x43b   :  { %4066 = vmatpush2.bf16.msra.mxu0 %v5139_v23  ;;  %4014 = vmatprep.subr.bf16.mxu1 %v5144_v12 }
 0x43c   :  { %4067 = vmatprep.subr.bf16.mxu0 %v5147_v60 }
 0x43e   :  { %4015 = vmatpush2.bf16.msra.mxu1 %v5142_v14 }
 0x43f   :  { %4068 = vmatpush2.bf16.msra.mxu0 %v5145_v6  ;;  %4090 = vmatprep.subr.bf16.mxu1 %v5150_v26 }
 0x47a   :  { %v3186_v19 = vpop.f32.mrf.mxu1 }
 0x47b   :  { %v3239_v53 = vpop.f32.mrf.mxu0  ;;  %v3187_v22 = vadd.f32 %v3186_v19, %v2505_v11 }
 0x47c   :  { %v3188_v41 = vpop.f32.mrf.mxu1 }
 0x47d   :  { %v3241_v8 = vpop.f32.mrf.mxu0  ;;  %v3189_v47 = vadd.f32 %v3188_v41, %v2509_v42  ;;  %v3240_v5 = vadd.f32 %v3239_v53, %v3187_v22  ;;  %v5148_v53 = vld [vmem:[%s7530_s11 + $0x160] ss:$24 sps:$4 sm:$0xff]  }
 0x47e   :  { %v3190_v21 = vpop.f32.mrf.mxu1 }
 0x47f   :  { %v3243_v28 = vpop.f32.mrf.mxu0  ;;  %v3191_v20 = vadd.f32 %v3190_v21, %v2505_v11  ;;  %v3242_v15 = vadd.f32 %v3241_v8, %v3189_v47 }
 0x480   :  { %v3192_v9 = vpop.f32.mrf.mxu1 }
 0x481   :  { %v3245_v30 = vpop.f32.mrf.mxu0  ;;  %v3193_v45 = vadd.f32 %v3192_v9, %v2509_v42  ;;  %v3244_v27 = vadd.f32 %v3243_v28, %v3191_v20 }
 0x483   :  { %v3246_v24 = vadd.f32 %v3245_v30, %v3193_v45  ;;  %v5151_v30 = vld [vmem:[%s7530_s11 + $0x130] ss:$24 sps:$4 sm:$0xff]  }
 0x489   :  { %v3196_v37 = vpop.f32.mrf.mxu1 }
 0x48a   :  { %v3249_v34 = vpop.f32.mrf.mxu0  ;;  %v3197_v26 = vadd.f32 %v3196_v37, %v2505_v11 }
 0x48b   :  { %v3198_v44 = vpop.f32.mrf.mxu1 }
 0x48c   :  { %v3251_v40 = vpop.f32.mrf.mxu0  ;;  %v3199_v60 = vadd.f32 %v3198_v44, %v2509_v42 }
 0x48d   :  { %v3200_v3 = vpop.f32.mrf.mxu1 }
 0x48e   :  { %v3253_v18 = vpop.f32.mrf.mxu0  ;;  %v3201_v41 = vadd.f32 %v3200_v3, %v2505_v11 }
 0x48f   :  { %v3202_v54 = vpop.f32.mrf.mxu1 }
 0x490   :  { %v3255_v56 = vpop.f32.mrf.mxu0  ;;  %v3254_v37 = vadd.f32 %v3253_v18, %v3201_v41  ;;  %v5195_v41 = vld [vmem:[%s7530_s11 + $0x194] ss:$24 sps:$4 sm:$0xff]  }
 0x4ba   :  { %v3292_v25 = vpop.f32.mrf.mxu1 }
 0x4bb   :  { %v3345_v61 = vpop.f32.mrf.mxu0  ;;  %v3293_v48 = vadd.f32 %v3292_v25, %v3240_v5 }
 0x4bc   :  { %v3294_v4 = vpop.f32.mrf.mxu1 }
 0x4bd   :  { %v3295_v31 = vadd.f32 %v3294_v4, %v3242_v15  ;;  %v3347_v62 = vpop.f32.mrf.mxu0  ;;  %v3346_v17 = vadd.f32 %v3345_v61, %v3293_v48  ;;  %v5159_v15 = vld [vmem:[%s7530_s11 + $0xd4] ss:$24 sps:$4 sm:$0xff]   ;;  %v5157_v4 = vld [vmem:[%s7530_s11 + $0xd0] ss:$24 sps:$4 sm:$0xff]  }
 0x4be   :  { %v3296_v59 = vpop.f32.mrf.mxu1 }
 0x4bf   :  { %v3297_v49 = vadd.f32 %v3296_v59, %v3244_v27  ;;  %v3349_v33 = vpop.f32.mrf.mxu0  ;;  %v3348_v32 = vadd.f32 %v3347_v62, %v3295_v31  ;;  %v3364_v6 = vadd.f32 %v3346_v17, %v5796_v35  ;;  %v3250_v35 = vadd.f32 %v3249_v34, %v3197_v26  ;;  %v5162_v59 = vld [vmem:[%s7530_s11 + $0xa4] ss:$24 sps:$4 sm:$0xff]   ;;  %v5175_v17 = vld [vmem:[%s7530_s11 + $0x2b0] ss:$24 sps:$4 sm:$0xff]  }
 0x4c0   :  { %v3298_v46 = vpop.f32.mrf.mxu1  ;;  %v5187_v26 = vld [vmem:[%s7530_s11 + $0x1f0] ss:$24 sps:$4 sm:$0xff]  }
 0x4c1   :  { %v3350_v58 = vadd.f32 %v3349_v33, %v3297_v49  ;;  %v3299_v0 = vadd.f32 %v3298_v46, %v3246_v24  ;;  %v3351_v63 = vpop.f32.mrf.mxu0  ;;  %v3365_v12 = vadd.f32 %v3348_v32, %v5798_v36  ;;  %v3252_v36 = vadd.f32 %v3251_v40, %v3199_v60  ;;  %v5156_v40 = vld [vmem:[%s7530_s11 + $0x104] ss:$24 sps:$4 sm:$0xff]   ;;  %v5166_v49 = vld [vmem:[%s7530_s11 + $0x40] ss:$24 sps:$4 sm:$0xff]   ;;  %v5171_v33 = vld [vmem:[%s7530_s11 + $0x14] ss:$24 sps:$4 sm:$0xff]  }
 0x4c2   :  { %v5169_v46 = vld [vmem:[%s7530_s11 + $0x10] ss:$24 sps:$4 sm:$0xff]   ;;  %v5174_v32 = vld [vmem:[%s7530_s11 + $0x2e4] ss:$24 sps:$4 sm:$0xff]   ;;  %v5184_v60 = vld [vmem:[%s7530_s11 + $0x220] ss:$24 sps:$4 sm:$0xff]  }
 0x4c3   :  { %v3352_v16 = vadd.f32 %v3351_v63, %v3299_v0  ;;  %v3366_v23 = vadd.f32 %v3350_v58, %v5804_v50  ;;  %v5153_v50 = vld [vmem:[%s7530_s11 + $0x134] ss:$24 sps:$4 sm:$0xff]   ;;  %v5172_v58 = vld [vmem:[%s7530_s11 + $0x2e0] ss:$24 sps:$4 sm:$0xff]   ;;  %v5180_v63 = vld [vmem:[%s7530_s11 + $0x284] ss:$24 sps:$4 sm:$0xff]  }
 0x4c4   :  { %v5177_v0 = vld [vmem:[%s7530_s11 + $0x2b4] ss:$24 sps:$4 sm:$0xff]  }
 0x4c5   :  { %v3367_v14 = vadd.f32 %v3352_v16, %v5806_v52  ;;  %v7200_v8 = vpack.c.bf16 %v3366_v23, %v3364_v6  ;;  %v3203_v52 = vadd.f32 %v3202_v54, %v2509_v42  ;;  %v5154_v54 = vld [vmem:[%s7530_s11 + $0x100] ss:$24 sps:$4 sm:$0xff]   ;;  %v5183_v23 = vld [vmem:[%s7530_s11 + $0x254] ss:$24 sps:$4 sm:$0xff]  }
 0x4c6   :  { %v5178_v16 = vld [vmem:[%s7530_s11 + $0x280] ss:$24 sps:$4 sm:$0xff]   ;;  %v5189_v6 = vld [vmem:[%s7530_s11 + $0x1f4] ss:$24 sps:$4 sm:$0xff]  }
 0x4c7   :  { %v3373_v19 = vpack.c.bf16 %v3367_v14, %v3365_v12  ;;  %v3256_v3 = vadd.f32 %v3255_v56, %v3203_v52  ;;  %v5181_v12 = vld [vmem:[%s7530_s11 + $0x250] ss:$24 sps:$4 sm:$0xff]   ;;  %v5186_v14 = vld [vmem:[%s7530_s11 + $0x224] ss:$24 sps:$4 sm:$0xff]  }
 0x4c9   :  { %v3302_v21 = vpop.f32.mrf.mxu1  ;;  %4016 = vmatprep.mubr.bf16.mxu1 %v3373_v19  ;;  %4069 = vmatprep.mubr.bf16.mxu0 %v3373_v19 }
 0x4ca   :  { %v3355_v28 = vpop.f32.mrf.mxu0  ;;  %4017 = vmatmul.mubr.bf16.vlgmr.msra.gmra.mxu1 %v7200_v8  ;;  %4070 = vmatmul.mubr.bf16.vlgmr.msra.gmra.mxu0 %v7200_v8  ;;  %v3303_v42 = vadd.f32 %v3302_v21, %v3250_v35  ;;  %v7302_v21 = vld [vmem:[%s7532_s12] sm:$0x3f] }
 0x4cb   :  { %v3304_v9 = vpop.f32.mrf.mxu1  ;;  %4091 = vmatpush1.bf16.msra.mxu1 %v5148_v53  ;;  %v5190_v53 = vld [vmem:[%s7530_s11 + $0x1c0] ss:$24 sps:$4 sm:$0xff]   ;;  %v3485_v52 = vrot.slane %v7302_v21, %v1186_v7 }
 0x4cc   :  { %v3305_v44 = vadd.f32 %v3304_v9, %v3252_v36  ;;  %v3357_v39 = vpop.f32.mrf.mxu0  ;;  %4092 = vmatprep.subr.bf16.mxu1 %v5153_v50  ;;  %v3356_v45 = vadd.f32 %v3355_v28, %v3303_v42  ;;  %v5193_v50 = vld [vmem:[%s7530_s11 + $0x190] ss:$24 sps:$4 sm:$0xff]   ;;  %v3477_v36 = vrot.slane %v7302_v21, %v5782_v55  ;;  %v3481_v28 = vrot.slane %v7302_v21, %v5785_v57 }
 0x4cd   :  { %v3306_v11 = vpop.f32.mrf.mxu1 }
 0x4ce   :  { %v3307_v47 = vadd.f32 %v3306_v11, %v3254_v37  ;;  %v3359_v22 = vpop.f32.mrf.mxu0  ;;  %v3358_v20 = vadd.f32 %v3357_v39, %v3305_v44  ;;  %v3368_v62 = vadd.f32 %v3356_v45, %v5812_v1  ;;  %v5163_v1 = vld [vmem:[%s7530_s11 + $0x70] ss:$24 sps:$4 sm:$0xff]  }
 0x4cf   :  { %v3308_v34 = vpop.f32.mrf.mxu1  ;;  %4093 = vmatpush1.bf16.msra.mxu1 %v5151_v30 }
 0x4d0   :  { %v3360_v18 = vadd.f32 %v3359_v22, %v3307_v47  ;;  %v3309_v25 = vadd.f32 %v3308_v34, %v3256_v3  ;;  %4094 = vmatprep.subr.bf16.mxu1 %v5156_v40  ;;  %v3361_v61 = vpop.f32.mrf.mxu0  ;;  %v3369_v27 = vadd.f32 %v3358_v20, %v5814_v2  ;;  %v5165_v2 = vld [vmem:[%s7530_s11 + $0x74] ss:$24 sps:$4 sm:$0xff]  }
 0x4d2   :  { %v3362_v5 = vadd.f32 %v3361_v61, %v3309_v25  ;;  %v3370_v56 = vadd.f32 %v3360_v18, %v5820_v10  ;;  %v5160_v10 = vld [vmem:[%s7530_s11 + $0xa0] ss:$24 sps:$4 sm:$0xff]  }
 0x4d3   :  { %4095 = vmatpush1.bf16.msra.mxu1 %v5154_v54 }
 0x4d4   :  { %v3371_v31 = vadd.f32 %v3362_v5, %v5822_v13  ;;  %4096 = vmatprep.subr.bf16.mxu1 %v5159_v15  ;;  %v3374_v24 = vpack.c.bf16 %v3370_v56, %v3368_v62  ;;  %v5168_v13 = vld [vmem:[%s7530_s11 + $0x44] ss:$24 sps:$4 sm:$0xff]  }
 0x4d6   :  { %v3375_v48 = vpack.c.bf16 %v3371_v31, %v3369_v27 }
 0x4d7   :  { %4097 = vmatpush1.bf16.msra.mxu1 %v5157_v4 }
 0x4d8   :  { %4026 = vmatprep.mubr.bf16.mxu1 %v3375_v48  ;;  %4079 = vmatprep.mubr.bf16.mxu0 %v3375_v48 }
 0x4d9   :  { %4027 = vmatmul.mubr.bf16.gmra.mxu1 %v3374_v24  ;;  %4080 = vmatmul.mubr.bf16.gmra.mxu0 %v3374_v24 }
 0x4da   :  { %4122 = vmatprep.mubr.bf16.mxu1 %v3373_v19  ;;  %4098 = vmatprep.subr.bf16.mxu1 %v5162_v59  ;;  %v5192_v19 = vld [vmem:[%s7530_s11 + $0x1c4] ss:$24 sps:$4 sm:$0xff]  }
 0x4db   :  { %4099 = vmatpush1.bf16.msra.mxu1 %v5160_v10 }
 0x4dc   :  { %4100 = vmatprep.subr.bf16.mxu1 %v5165_v2  ;;  %v5269_v2 = vld [vmem:[%s7522_s0] sm:$0xff] }
 0x4df   :  { %4101 = vmatpush1.bf16.msra.mxu1 %v5163_v1 }
 0x4e0   :  { %4102 = vmatprep.subr.bf16.mxu1 %v5168_v13  ;;  %v5270_v13 = vld [vmem:[%s7522_s0 + $0x38] sm:$0xff] }
 0x4e3   :  { %4103 = vmatpush1.bf16.msra.mxu1 %v5166_v49 }
 0x4e4   :  { %4104 = vmatprep.subr.bf16.mxu1 %v5171_v33 }
 0x4e7   :  { %4105 = vmatpush1.bf16.msra.mxu1 %v5169_v46  ;;  %v5271_v46 = vld [vmem:[%s7522_s0 + $0x30] sm:$0xff] }
 0x4e8   :  { %4106 = vmatprep.subr.bf16.mxu1 %v5174_v32 }
 0x4eb   :  { %4107 = vmatpush2.bf16.msra.mxu1 %v5172_v58 }
 0x4ec   :  { %4108 = vmatprep.subr.bf16.mxu1 %v5177_v0  ;;  %v5272_v0 = vld [vmem:[%s7522_s0 + $0x10] sm:$0xff] }
 0x4ef   :  { %4109 = vmatpush2.bf16.msra.mxu1 %v5175_v17 }
 0x4f0   :  { %4110 = vmatprep.subr.bf16.mxu1 %v5180_v63 }
 0x4f3   :  { %4111 = vmatpush2.bf16.msra.mxu1 %v5178_v16  ;;  %v5273_v16 = vld [vmem:[%s7522_s0 + $0x68] sm:$0xff] }
 0x4f4   :  { %4112 = vmatprep.subr.bf16.mxu1 %v5183_v23 }
 0x4f7   :  { %4113 = vmatpush2.bf16.msra.mxu1 %v5181_v12 }
 0x4f8   :  { %4114 = vmatprep.subr.bf16.mxu1 %v5186_v14  ;;  %v7395_v14 = vrot.slane %v7302_v21, %v1194_v29  ;;  %v7410_v29 = vrot.slane %v7302_v21, %v1198_v43  ;;  %v5279_v43 = vld [vmem:[%s7522_s0 + $0x70] sm:$0xff] }
 0x4fb   :  { %4115 = vmatpush2.bf16.msra.mxu1 %v5184_v60 }
 0x4fc   :  { %4116 = vmatprep.subr.bf16.mxu1 %v5189_v6  ;;  %v5274_v6 = vld [vmem:[%s7522_s0 + $0x40] sm:$0xff] }
 0x4ff   :  { %4117 = vmatpush2.bf16.msra.mxu1 %v5187_v26 }
 0x500   :  { %4118 = vmatprep.subr.bf16.mxu1 %v5192_v19  ;;  %v5275_v19 = vld [vmem:[%s7522_s0 + $0x60] sm:$0xff] }
 0x503   :  { %4119 = vmatpush2.bf16.msra.mxu1 %v5190_v53 }
 0x504   :  { %4120 = vmatprep.subr.bf16.mxu1 %v5195_v41 }
 0x507   :  { %4121 = vmatpush2.bf16.msra.mxu1 %v5193_v50  ;;  %v5276_v50 = vld [vmem:[%s7522_s0 + $0x18] sm:$0xff] }
 0x50a   :  { %4123 = vmatmul.mubr.bf16.vlgmr.msra.gmra.mxu1 %v7200_v8  ;;  %v3489_v8 = vrot.slane %v7302_v21, %v1190_v38 }
 0x50b   :  { %4132 = vmatprep.mubr.bf16.mxu1 %v3375_v48 }
 0x512   :  { %4133 = vmatmul.mubr.bf16.gmra.mxu1 %v3374_v24  ;;  %v5268_v24 = vld [vmem:[%s7522_s0 + $0x8] sm:$0xff] }
 0x58a   :  { %v4018_v35 = vpop.f32.mrf.mxu1  ;;  %v4071_v9 = vpop.f32.mrf.mxu0 }
 0x58b   :  { %v4019_v30 = vadd.f32 %v4018_v35, %v3477_v36  ;;  %v4072_v37 = vadd.f32 %v4071_v9, %v3485_v52  ;;  %v5278_v9 = vld [vmem:[%s7522_s0 + $0x98] sm:$0xff] }
 0x58c   :  { %v4020_v44 = vpop.f32.mrf.mxu1  ;;  %v4073_v39 = vpop.f32.mrf.mxu0 }
 0x58d   :  { %4143 = vst [vmem:[%s7533_s13] sm:$0xff] %v4019_v30  ;;  %4145 = vst [vmem:[%s7533_s13 + $0x10] sm:$0xff] %v4072_v37  ;;  %v4021_v55 = vadd.f32 %v4020_v44, %v3481_v28  ;;  %v7320_v57 = vadd.f32 %v4073_v39, %v3489_v8  ;;  %v4167_v1 = vsub.f32 %v4019_v30, %v5269_v2 }
 0x58e   :  { %v4022_v7 = vpop.f32.mrf.mxu1  ;;  %v4075_v40 = vpop.f32.mrf.mxu0  ;;  %v4169_v17 = vsub.f32 %v4072_v37, %v5272_v0 }
 0x58f   :  { %4144 = vst [vmem:[%s7533_s13 + $0x8] sm:$0xff] %v4021_v55  ;;  %4146 = vst [vmem:[%s7533_s13 + $0x18] sm:$0xff] %v7320_v57  ;;  %v4023_v38 = vadd.f32 %v4022_v7, %v3477_v36  ;;  %v4076_v42 = vadd.f32 %v4075_v40, %v3485_v52  ;;  %v4168_v10 = vsub.f32 %v4021_v55, %v5268_v24 }
 0x590   :  { %v4024_v11 = vpop.f32.mrf.mxu1  ;;  %v4077_v3 = vpop.f32.mrf.mxu0  ;;  %v4191_v58 = vmul.f32 %v4167_v1, %v4167_v1  ;;  %v4193_v41 = vmul.f32 %v4169_v17, %v4169_v17  ;;  %v5285_v1 = vld [vmem:[%s7522_s0 + $0x50] sm:$0xff] }
 0x591   :  { %v4025_v47 = vadd.f32 %v4024_v11, %v3481_v28  ;;  %v4078_v22 = vadd.f32 %v4077_v3, %v3489_v8  ;;  %4149 = vst [vmem:[%s7533_s13 + $0x30] sm:$0xff] %v4023_v38  ;;  %4151 = vst [vmem:[%s7533_s13 + $0x40] sm:$0xff] %v4076_v42  ;;  %v4192_v33 = vmul.f32 %v4168_v10, %v4168_v10 }
 0x592   :  { %v4173_v32 = vsub.f32 %v4023_v38, %v5271_v46  ;;  %v4175_v26 = vsub.f32 %v4076_v42, %v5274_v6  ;;  %v5281_v42 = vld [vmem:[%s7522_s0 + $0x20] sm:$0xff] }
 0x593   :  { %4150 = vst [vmem:[%s7533_s13 + $0x38] sm:$0xff] %v4025_v47  ;;  %4152 = vst [vmem:[%s7533_s13 + $0x48] sm:$0xff] %v4078_v22  ;;  %v4174_v49 = vsub.f32 %v4025_v47, %v5270_v13  ;;  %v4215_v12 = vadd.f32 %v4192_v33, %v4191_v58 }
 0x594   :  { %v4197_v60 = vmul.f32 %v4173_v32, %v4173_v32  ;;  %v4199_v51 = vmul.f32 %v4175_v26, %v4175_v26 }
 0x595   :  { %v4198_v63 = vmul.f32 %v4174_v49, %v4174_v49  ;;  %v4216_v44 = vadd.f32 %v4215_v12, %v4193_v41 }
 0x599   :  { %v4028_v34 = vpop.f32.mrf.mxu1  ;;  %v4081_v54 = vpop.f32.mrf.mxu0 }
 0x59a   :  { %v4029_v20 = vadd.f32 %v4028_v34, %v3477_v36  ;;  %v4082_v18 = vadd.f32 %v4081_v54, %v3485_v52 }
 0x59b   :  { %v4030_v25 = vpop.f32.mrf.mxu1  ;;  %v4083_v15 = vpop.f32.mrf.mxu0 }
 0x59c   :  { %4155 = vst [vmem:[%s7533_s13 + $0x60] sm:$0xff] %v4029_v20  ;;  %4157 = vst [vmem:[%s7533_s13 + $0x70] sm:$0xff] %v4082_v18  ;;  %v4031_v45 = vadd.f32 %v4030_v25, %v3481_v28  ;;  %v7347_v61 = vadd.f32 %v4083_v15, %v3489_v8  ;;  %v4179_v53 = vsub.f32 %v4029_v20, %v5275_v19  ;;  %v5282_v15 = vld [vmem:[%s7522_s0 + $0x28] sm:$0xff] }
 0x59d   :  { %v4032_v5 = vpop.f32.mrf.mxu1  ;;  %v4085_v56 = vpop.f32.mrf.mxu0  ;;  %v4181_v21 = vsub.f32 %v4082_v18, %v5279_v43 }
 0x59e   :  { %4156 = vst [vmem:[%s7533_s13 + $0x68] sm:$0xff] %v4031_v45  ;;  %4158 = vst [vmem:[%s7533_s13 + $0x78] sm:$0xff] %v7347_v61  ;;  %v4033_v4 = vadd.f32 %v4032_v5, %v3477_v36  ;;  %v7356_v27 = vadd.f32 %v4085_v56, %v3485_v52  ;;  %v4180_v23 = vsub.f32 %v4031_v45, %v5273_v16 }
 0x59f   :  { %v4034_v31 = vpop.f32.mrf.mxu1  ;;  %v4087_v62 = vpop.f32.mrf.mxu0  ;;  %v4170_v36 = vsub.f32 %v7320_v57, %v5276_v50  ;;  %v4222_v52 = vadd.f32 %v4198_v63, %v4197_v60  ;;  %v4203_v55 = vmul.f32 %v4179_v53, %v4179_v53  ;;  %v5280_v57 = vld [vmem:[%s7522_s0 + $0x90] sm:$0xff]  ;;  %v4205_v56 = vmul.f32 %v4181_v21, %v4181_v21  ;;  %v5287_v60 = vld [vmem:[%s7522_s0 + $0xa8] sm:$0xff]  ;;  %v5288_v53 = vld [vmem:[%s7522_s0 + $0x80] sm:$0xff] }
 0x5a0   :  { %v4035_v48 = vadd.f32 %v4034_v31, %v3481_v28  ;;  %v7358_v59 = vadd.f32 %v4087_v62, %v3489_v8  ;;  %4161 = vst [vmem:[%s7533_s13 + $0x90] sm:$0xff] %v4033_v4  ;;  %4163 = vst [vmem:[%s7533_s13 + $0xa0] sm:$0xff] %v7356_v27  ;;  %v5277_v28 = vld [vmem:[%s7522_s0 + $0x48] sm:$0xff]  ;;  %v4204_v35 = vmul.f32 %v4180_v23, %v4180_v23 }
 0x5a1   :  { %v4176_v8 = vsub.f32 %v4078_v22, %v5277_v28  ;;  %v4185_v7 = vsub.f32 %v4033_v4, %v5280_v57  ;;  %v4194_v38 = vmul.f32 %v4170_v36, %v4170_v36  ;;  %v4223_v22 = vadd.f32 %v4222_v52, %v4199_v51  ;;  %v5283_v4 = vld [vmem:[%s7522_s0 + $0x78] sm:$0xff] }
 0x5a2   :  { %4162 = vst [vmem:[%s7533_s13 + $0x98] sm:$0xff] %v4035_v48  ;;  %4164 = vst [vmem:[%s7533_s13 + $0xa8] sm:$0xff] %v7358_v59  ;;  %v4186_v30 = vsub.f32 %v4035_v48, %v5278_v9  ;;  %v4229_v34 = vadd.f32 %v4204_v35, %v4203_v55  ;;  %v4182_v31 = vsub.f32 %v7347_v61, %v5283_v4  ;;  %v5284_v48 = vld [vmem:[%s7522_s0 + $0xa0] sm:$0xff]  ;;  %v5290_v55 = vld [vmem:[%s7522_s0 + $0xb0] sm:$0xff] }
 0x5a3   :  { %v4200_v47 = vmul.f32 %v4176_v8, %v4176_v8  ;;  %v4217_v18 = vadd.f32 %v4216_v44, %v4194_v38  ;;  %v4209_v62 = vmul.f32 %v4185_v7, %v4185_v7  ;;  %v4187_v24 = vsub.f32 %v7356_v27, %v5284_v48  ;;  %v5286_v27 = vld [vmem:[%s7522_s0 + $0x58] sm:$0xff] }
 0x5a4   :  { %v4210_v54 = vmul.f32 %v4186_v30, %v4186_v30  ;;  %v4230_v46 = vadd.f32 %v4229_v34, %v4205_v56  ;;  %v4206_v23 = vmul.f32 %v4182_v31, %v4182_v31  ;;  %v4188_v6 = vsub.f32 %v7358_v59, %v5287_v60  ;;  %v5289_v59 = vld [vmem:[%s7522_s0 + $0x88] sm:$0xff]  ;;  %v5292_v34 = vld [vmem:[%s7520_s1] sm:$0xff]  ;;  %v5294_v56 = vld [vmem:[%s7520_s1 + $0x10] sm:$0xff] }
 0x5a5   :  { %v4224_v33 = vadd.f32 %v4223_v22, %v4200_v47  ;;  %v4211_v12 = vmul.f32 %v4187_v24, %v4187_v24  ;;  %v5295_v48 = vld [vmem:[%s7520_s1 + $0x18] sm:$0xff] }
 0x5a6   :  { %v4236_v32 = vadd.f32 %v4210_v54, %v4209_v62  ;;  %v4231_v52 = vadd.f32 %v4230_v46, %v4206_v23  ;;  %v4212_v44 = vmul.f32 %v4188_v6, %v4188_v6 }
 0x5a8   :  { %v4237_v28 = vadd.f32 %v4236_v32, %v4211_v12 }
 0x5aa   :  { %v4238_v7 = vadd.f32 %v4237_v28, %v4212_v44 }
 0x5ca   :  { %v4124_v37 = vpop.f32.mrf.mxu1 }
 0x5cb   :  { %v4125_v39 = vadd.f32 %v4124_v37, %v7395_v14 }
 0x5cc   :  { %v4126_v40 = vpop.f32.mrf.mxu1 }
 0x5cd   :  { %4147 = vst [vmem:[%s7533_s13 + $0x20] sm:$0xff] %v4125_v39  ;;  %v4171_v11 = vsub.f32 %v4125_v39, %v5281_v42  ;;  %v4127_v3 = vadd.f32 %v4126_v40, %v7410_v29 }
 0x5ce   :  { %v4128_v20 = vpop.f32.mrf.mxu1 }
 0x5cf   :  { %v4195_v25 = vmul.f32 %v4171_v11, %v4171_v11  ;;  %4148 = vst [vmem:[%s7533_s13 + $0x28] sm:$0xff] %v4127_v3  ;;  %v4172_v45 = vsub.f32 %v4127_v3, %v5282_v15  ;;  %v4129_v5 = vadd.f32 %v4128_v20, %v7395_v14 }
 0x5d0   :  { %v4130_v10 = vpop.f32.mrf.mxu1 }
 0x5d1   :  { %v4196_v2 = vmul.f32 %v4172_v45, %v4172_v45  ;;  %4153 = vst [vmem:[%s7533_s13 + $0x50] sm:$0xff] %v4129_v5  ;;  %v4177_v13 = vsub.f32 %v4129_v5, %v5285_v1  ;;  %v4131_v61 = vadd.f32 %v4130_v10, %v7410_v29  ;;  %v4218_v49 = vadd.f32 %v4217_v18, %v4195_v25  ;;  %v5293_v25 = vld [vmem:[%s7520_s1 + $0x8] sm:$0xff] }
 0x5d2   :  { %v4134_v58 = vpop.f32.mrf.mxu1 }
 0x5d3   :  { %v4201_v0 = vmul.f32 %v4177_v13, %v4177_v13  ;;  %4154 = vst [vmem:[%s7533_s13 + $0x58] sm:$0xff] %v4131_v61  ;;  %v4178_v17 = vsub.f32 %v4131_v61, %v5286_v27  ;;  %v4135_v63 = vadd.f32 %v4134_v58, %v7395_v14  ;;  %v4219_v16 = vadd.f32 %v4218_v49, %v4196_v2 }
 0x5d4   :  { %v4136_v26 = vpop.f32.mrf.mxu1 }
 0x5d5   :  { %v4202_v19 = vmul.f32 %v4178_v17, %v4178_v17  ;;  %4159 = vst [vmem:[%s7533_s13 + $0x80] sm:$0xff] %v4135_v63  ;;  %v4183_v41 = vsub.f32 %v4135_v63, %v5288_v53  ;;  %v4137_v50 = vadd.f32 %v4136_v26, %v7410_v29  ;;  %4220 = vadd.xlane.f32.xlu1 %v4219_v16 }
 0x5d6   :  { %v4225_v36 = vadd.f32 %v4224_v33, %v4201_v0  ;;  %v4138_v8 = vpop.f32.mrf.mxu1 }
 0x5d7   :  { %v4207_v35 = vmul.f32 %v4183_v41, %v4183_v41  ;;  %4160 = vst [vmem:[%s7533_s13 + $0x88] sm:$0xff] %v4137_v50  ;;  %v4184_v9 = vsub.f32 %v4137_v50, %v5289_v59  ;;  %v4139_v30 = vadd.f32 %v4138_v8, %v7395_v14  ;;  %v5291_v14 = vld [vmem:[%s7522_s0 + $0xb8] sm:$0xff] }
 0x5d8   :  { %v4226_v37 = vadd.f32 %v4225_v36, %v4202_v19  ;;  %v4140_v39 = vpop.f32.mrf.mxu1 }
 0x5d9   :  { %v4208_v51 = vmul.f32 %v4184_v9, %v4184_v9  ;;  %4165 = vst [vmem:[%s7533_s13 + $0xb0] sm:$0xff] %v4139_v30  ;;  %v4189_v43 = vsub.f32 %v4139_v30, %v5290_v55  ;;  %v4141_v21 = vadd.f32 %v4140_v39, %v7410_v29  ;;  %v4232_v57 = vadd.f32 %v4231_v52, %v4207_v35 }
 0x5da   :  { %4227 = vadd.xlane.f32.xlu0 %v4226_v37 }
 0x5db   :  { %v4213_v40 = vmul.f32 %v4189_v43, %v4189_v43  ;;  %4166 = vst [vmem:[%s7533_s13 + $0xb8] sm:$0xff] %v4141_v21  ;;  %v4190_v38 = vsub.f32 %v4141_v21, %v5291_v14  ;;  %v4233_v42 = vadd.f32 %v4232_v57, %v4208_v51 }
 0x5dd   :  { %v4214_v11 = vmul.f32 %v4190_v38, %v4190_v38  ;;  %4234 = vadd.xlane.f32.xlu1 %v4233_v42  ;;  %v4239_v3 = vadd.f32 %v4238_v7, %v4213_v40 }
 0x5df   :  { %v4240_v47 = vadd.f32 %v4239_v3, %v4214_v11 }
 0x5e1   :  { %4241 = vadd.xlane.f32.xlu0 %v4240_v47 }
 0x65e   :  { %v4221_v29 = vpop.xlane.xlu1 %4220 }
 0x65f   :  { %v4244_v22 = vmul.f32 0.0013020834, %v4221_v29 }
 0x661   :  { %v4248_v54 = vmul.f32 %v5292_v34, %v4244_v22 }
 0x663   :  { %v4228_v20 = vpop.xlane.xlu0 %4227  ;;  %4253 = vst.msk [vmem:[%s7534_s14] sm:$0xff] %vm4252_vm0, %v4248_v54 }
 0x664   :  { %v4245_v18 = vmul.f32 0.0013020834, %v4228_v20 }
 0x666   :  { %v4249_v15 = vmul.f32 %v5293_v25, %v4245_v18  ;;  %v4235_v45 = vpop.xlane.xlu1 %4234 }
 0x667   :  { %v4246_v5 = vmul.f32 0.0013020834, %v4235_v45 }
 0x668   :  { %4254 = vst.msk [vmem:[%s7534_s14 + $0x8] sm:$0xff] %vm4252_vm0, %v4249_v15 }
 0x669   :  { %v4250_v4 = vmul.f32 %v5294_v56, %v4246_v5 }
 0x66a   :  { %v4242_v31 = vpop.xlane.xlu0 %4241 }
 0x66b   :  { %4255 = vst.msk [vmem:[%s7534_s14 + $0x10] sm:$0xff] %vm4252_vm0, %v4250_v4  ;;  %v4247_v62 = vmul.f32 0.0013020834, %v4242_v31 }
 0x66d   :  { %v4251_v24 = vmul.f32 %v5295_v48, %v4247_v62 }
 0x66f   :  { %4256 = vst.msk [vmem:[%s7534_s14 + $0x18] sm:$0xff] %vm4252_vm0, %v4251_v24 }

</bundles_post_ra>
